<compile_context>
chip_gen: v5e
topology: v5e:2x2
jax: 0.10.0
libtpu: 0.0.40
codegen_flags: <defaults>
</compile_context>

<pallas_src>
import math
import functools

import jax
import jax.numpy as jnp
from jax import lax
from jax.experimental import pallas as pl
from jax.experimental.pallas import tpu as pltpu


# ----------------------------------------------------------------------------
# Fixed parameter ordering (stacked over layers) for the fused kernel
# ----------------------------------------------------------------------------

ENC_PARAM_NAMES = (
    "wqkv", "bqkv", "wo", "bo",
    "ln1g", "ln1b", "w1", "b1", "w2", "b2", "ln2g", "ln2b",
)
DEC_PARAM_NAMES = (
    "s_wqkv", "s_bqkv", "s_wo", "s_bo",
    "c_wqkv", "c_bqkv", "c_wo", "c_bo",
    "ln1g", "ln1b", "ln2g", "ln2b", "ln3g", "ln3b",
    "w1", "b1", "w2", "b2",
)


# ----------------------------------------------------------------------------
# In-kernel building blocks (2-D [rows, E] values, single batch element)
# ----------------------------------------------------------------------------

def _attention(q_in, k_in, v_in, wqkv, bqkv, wo, bo, nhead, fuse_qk):
    """Multi-head attention with fused QKV weights and batched per-head dots.

    q_in [Nq,E], k_in/v_in [Nk,E] in f32; wqkv [E,3E] bf16 (scale folded into
    the Q columns), bqkv [1,3E] f32, wo [E,E] bf16, bo [1,E] f32.
    """
    Nq, E = q_in.shape
    dh = E // nhead

    q_in_b = q_in.astype(jnp.bfloat16)
    v_in_b = v_in.astype(jnp.bfloat16)

    if fuse_qk:
        # self-attention: query input == key input -> single [.,E]@[E,2E] matmul
        qk = jnp.dot(q_in_b, wqkv[:, :2 * E],
                     preferred_element_type=jnp.float32) + bqkv[:, :2 * E]
        q, k = qk[:, :E], qk[:, E:]
    else:
        k_in_b = k_in.astype(jnp.bfloat16)
        q = jnp.dot(q_in_b, wqkv[:, :E],
                    preferred_element_type=jnp.float32) + bqkv[:, :E]
        k = jnp.dot(k_in_b, wqkv[:, E:2 * E],
                    preferred_element_type=jnp.float32) + bqkv[:, E:2 * E]
    v = jnp.dot(v_in_b, wqkv[:, 2 * E:],
                preferred_element_type=jnp.float32) + bqkv[:, 2 * E:]

    # Pack heads into a leading batch dim via static lane slices (no 3-D
    # transposes needed), then do ONE batched matmul for scores and context.
    qh = jnp.stack([q[:, h * dh:(h + 1) * dh] for h in range(nhead)],
                   axis=0).astype(jnp.bfloat16)            # [H, Nq, dh]
    kh = jnp.stack([k[:, h * dh:(h + 1) * dh] for h in range(nhead)],
                   axis=0).astype(jnp.bfloat16)            # [H, Nk, dh]
    vh = jnp.stack([v[:, h * dh:(h + 1) * dh] for h in range(nhead)],
                   axis=0).astype(jnp.bfloat16)            # [H, Nk, dh]

    # scores [H, Nq, Nk]  (scale already folded into Wq / bq)
    s = lax.dot_general(qh, kh, (((2,), (2,)), ((0,), (0,))),
                        preferred_element_type=jnp.float32)
    s = s - jnp.max(s, axis=-1, keepdims=True)
    p = jnp.exp(s)
    p = p * pl.reciprocal(jnp.sum(p, axis=-1, keepdims=True), approx=True)

    # context [H, Nq, dh]
    ctx = lax.dot_general(p.astype(jnp.bfloat16), vh,
                          (((2,), (1,)), ((0,), (0,))),
                          preferred_element_type=jnp.float32)

    # concat heads along lanes -> one wide output projection
    ctx2 = jnp.concatenate([ctx[h] for h in range(nhead)], axis=-1)  # [Nq, E]
    out = jnp.dot(ctx2.astype(jnp.bfloat16), wo,
                  preferred_element_type=jnp.float32) + bo
    return out


def _add_ln(x, r, g, b):
    """LayerNorm(x + r) over last dim (eps=1e-5, biased variance), f32."""
    y = x + r
    mu = jnp.mean(y, axis=-1, keepdims=True)
    var = jnp.mean(jnp.square(y - mu), axis=-1, keepdims=True)
    return (y - mu) * lax.rsqrt(var + 1e-5) * g + b


def _ffn(x, w1, b1, w2, b2):
    h = jnp.dot(x.astype(jnp.bfloat16), w1,
                preferred_element_type=jnp.float32) + b1
    h = jnp.maximum(h, 0.0)
    return jnp.dot(h.astype(jnp.bfloat16), w2,
                   preferred_element_type=jnp.float32) + b2


# ----------------------------------------------------------------------------
# Fused whole-model kernel (one grid step == one batch element)
# ----------------------------------------------------------------------------

def _transformer_kernel(nhead, n_enc, n_dec, src_ref, pos_ref, qe_ref, *refs):
    out_ref = refs[-1]
    prefs = refs[:-1]
    ne = len(ENC_PARAM_NAMES)
    enc = dict(zip(ENC_PARAM_NAMES, prefs[:ne]))
    dec = dict(zip(DEC_PARAM_NAMES, prefs[ne:]))

    src = src_ref[0]          # [L, E]  f32
    pos = pos_ref[0]          # [L, E]  f32
    qpos = qe_ref[...]        # [Q, E]  f32 (shared across batch)

    # ------------------------- encoder -------------------------
    def enc_layer(l, mem):
        qk_in = mem + pos
        a = _attention(qk_in, qk_in, mem,
                       enc["wqkv"][l], enc["bqkv"][l],
                       enc["wo"][l], enc["bo"][l],
                       nhead, fuse_qk=True)
        mem = _add_ln(mem, a, enc["ln1g"][l], enc["ln1b"][l])
        f = _ffn(mem, enc["w1"][l], enc["b1"][l], enc["w2"][l], enc["b2"][l])
        return _add_ln(mem, f, enc["ln2g"][l], enc["ln2b"][l])

    mem = lax.fori_loop(0, n_enc, enc_layer, src)

    # ------------------------- decoder -------------------------
    mem_pos = mem + pos       # hoisted: same for every decoder layer

    def dec_layer(l, tgt):
        q_in = tgt + qpos
        a = _attention(q_in, q_in, tgt,
                       dec["s_wqkv"][l], dec["s_bqkv"][l],
                       dec["s_wo"][l], dec["s_bo"][l],
                       nhead, fuse_qk=True)
        tgt = _add_ln(tgt, a, dec["ln1g"][l], dec["ln1b"][l])
        a = _attention(tgt + qpos, mem_pos, mem,
                       dec["c_wqkv"][l], dec["c_bqkv"][l],
                       dec["c_wo"][l], dec["c_bo"][l],
                       nhead, fuse_qk=False)
        tgt = _add_ln(tgt, a, dec["ln2g"][l], dec["ln2b"][l])
        f = _ffn(tgt, dec["w1"][l], dec["b1"][l], dec["w2"][l], dec["b2"][l])
        return _add_ln(tgt, f, dec["ln3g"][l], dec["ln3b"][l])

    tgt = lax.fori_loop(0, n_dec, dec_layer, jnp.zeros_like(qpos))

    # NOTE: with realistic E (>=128) this store is lane-dense automatically;
    # at toy E=32 a (B, Q*E) repack would avoid masked stores but needs a
    # sublane->lane reshape, so it is intentionally skipped here.
    out_ref[...] = tgt[None].astype(out_ref.dtype)


# ----------------------------------------------------------------------------
# pallas_call wrapper
# ----------------------------------------------------------------------------

def transformer_forward(params, src, query_embed, pos_embed, *, nhead):
    B, L, E = src.shape
    Q = query_embed.shape[0]
    enc = params["encoder"]
    dec = params["decoder"]
    n_enc = enc["wqkv"].shape[0]
    n_dec = dec["s_wqkv"].shape[0]

    flat_params = ([enc[name] for name in ENC_PARAM_NAMES]
                   + [dec[name] for name in DEC_PARAM_NAMES])

    in_specs = [
        pl.BlockSpec((1, L, E), lambda b: (b, 0, 0)),   # src
        pl.BlockSpec((1, L, E), lambda b: (b, 0, 0)),   # pos_embed
        pl.BlockSpec((Q, E),    lambda b: (0, 0)),      # query_embed (shared)
    ]
    for a in flat_params:                               # weights: whole array, resident
        in_specs.append(pl.BlockSpec(a.shape, lambda b, _n=a.ndim: (0,) * _n))

    grid_spec = pltpu.PrefetchScalarGridSpec(
        num_scalar_prefetch=0,
        grid=(B,),
        in_specs=in_specs,
        out_specs=pl.BlockSpec((1, Q, E), lambda b: (b, 0, 0)),
    )

    # Size the VMEM budget from the actual resident (bf16) weight footprint,
    # capped at 64 MiB so the same config stays within v7x per-core VMEM.
    resident_bytes = sum(int(a.size) * a.dtype.itemsize for a in flat_params)
    vmem_limit = int(min(64 * 1024 * 1024,
                         max(32 * 1024 * 1024, 6 * resident_bytes + (2 << 20))))

    kernel = functools.partial(_transformer_kernel, nhead, n_enc, n_dec)
    return pl.pallas_call(
        kernel,
        out_shape=jax.ShapeDtypeStruct((B, Q, E), jnp.float32),
        grid_spec=grid_spec,
        compiler_params=pltpu.CompilerParams(
            dimension_semantics=("parallel",),          # megacore split on batch (v7x)
            vmem_limit_bytes=vmem_limit,
        ),
    )(src, pos_embed, query_embed, *flat_params)


# ----------------------------------------------------------------------------
# Parameter construction / packing
#   - xavier-uniform matrices, zero biases, unit LN (matches the PyTorch init)
#   - Wq/Wk/Wv fused to [E, 3E]; 1/sqrt(dh) folded into the Q columns & bias
#   - matmul weights cast to bf16 once, offline; biases / LN params stay f32
# ----------------------------------------------------------------------------

def _xavier(key, shape):
    fan_in, fan_out = shape
    limit = math.sqrt(6.0 / (fan_in + fan_out))
    return jax.random.uniform(key, shape, jnp.float32, -limit, limit)


def _fused_attn_params(key, E, nhead):
    kq, kk, kv, ko = jax.random.split(key, 4)
    scale = 1.0 / math.sqrt(E // nhead)
    wq = _xavier(kq, (E, E)) * scale           # fold score scale into Wq
    wk = _xavier(kk, (E, E))
    wv = _xavier(kv, (E, E))
    wqkv = jnp.concatenate([wq, wk, wv], axis=1).astype(jnp.bfloat16)
    # biases are zero; the Q-bias would also be multiplied by `scale`
    bqkv = jnp.zeros((1, 3 * E), jnp.float32)
    wo = _xavier(ko, (E, E)).astype(jnp.bfloat16)
    bo = jnp.zeros((1, E), jnp.float32)
    return wqkv, bqkv, wo, bo


def _make_encoder_layer(key, E, F, nhead):
    k_a, k1, k2 = jax.random.split(key, 3)
    wqkv, bqkv, wo, bo = _fused_attn_params(k_a, E, nhead)
    return dict(
        wqkv=wqkv, bqkv=bqkv, wo=wo, bo=bo,
        ln1g=jnp.ones((1, E), jnp.float32), ln1b=jnp.zeros((1, E), jnp.float32),
        w1=_xavier(k1, (E, F)).astype(jnp.bfloat16), b1=jnp.zeros((1, F), jnp.float32),
        w2=_xavier(k2, (F, E)).astype(jnp.bfloat16), b2=jnp.zeros((1, E), jnp.float32),
        ln2g=jnp.ones((1, E), jnp.float32), ln2b=jnp.zeros((1, E), jnp.float32),
    )


def _make_decoder_layer(key, E, F, nhead):
    k_s, k_c, k1, k2 = jax.random.split(key, 4)
    s_wqkv, s_bqkv, s_wo, s_bo = _fused_attn_params(k_s, E, nhead)
    c_wqkv, c_bqkv, c_wo, c_bo = _fused_attn_params(k_c, E, nhead)
    return dict(
        s_wqkv=s_wqkv, s_bqkv=s_bqkv, s_wo=s_wo, s_bo=s_bo,
        c_wqkv=c_wqkv, c_bqkv=c_bqkv, c_wo=c_wo, c_bo=c_bo,
        ln1g=jnp.ones((1, E), jnp.float32), ln1b=jnp.zeros((1, E), jnp.float32),
        ln2g=jnp.ones((1, E), jnp.float32), ln2b=jnp.zeros((1, E), jnp.float32),
        ln3g=jnp.ones((1, E), jnp.float32), ln3b=jnp.zeros((1, E), jnp.float32),
        w1=_xavier(k1, (E, F)).astype(jnp.bfloat16), b1=jnp.zeros((1, F), jnp.float32),
        w2=_xavier(k2, (F, E)).astype(jnp.bfloat16), b2=jnp.zeros((1, E), jnp.float32),
    )


def _stack(layer_dicts):
    return {k: jnp.stack([d[k] for d in layer_dicts], axis=0)
            for k in layer_dicts[0]}


def make_transformer_params(key, E, F, n_enc, n_dec, *, nhead):
    keys = jax.random.split(key, n_enc + n_dec)
    enc = _stack([_make_encoder_layer(keys[i], E, F, nhead) for i in range(n_enc)])
    dec = _stack([_make_decoder_layer(keys[n_enc + i], E, F, nhead)
                  for i in range(n_dec)])
    return dict(encoder=enc, decoder=dec)


# ----------------------------------------------------------------------------
# Main
# ----------------------------------------------------------------------------

if __name__ == "__main__":
    E, H, F = 32, 4, 64          # embed_dim, nhead, dim_feedforward
    N_ENC, N_DEC = 2, 2
    B, L, Q = 2, 8, 8            # batch, src seq len, num queries

    key = jax.random.PRNGKey(0)
    kp, k1, k2, k3 = jax.random.split(key, 4)

    params = make_transformer_params(kp, E, F, N_ENC, N_DEC, nhead=H)

    src = jax.random.normal(k1, (B, L, E), jnp.float32)
    pos_embed = jax.random.normal(k2, (B, L, E), jnp.float32)
    query_embed = jax.random.normal(k3, (Q, E), jnp.float32)

    fwd = jax.jit(functools.partial(transformer_forward, nhead=H))
    out = fwd(params, src, query_embed, pos_embed)
    jax.block_until_ready(out)
    assert out.shape == (B, Q, E)
    print("KERNEL_OK")
</pallas_src>

<mosaic_0001>
module attributes {stable_mosaic.version = 11 : i64} {
  func.func @_transformer_kernel(%arg0: i32, %arg1: memref<1x8x32xf32, #tpu.memory_space<vmem>>, %arg2: memref<1x8x32xf32, #tpu.memory_space<vmem>>, %arg3: memref<8x32xf32, #tpu.memory_space<vmem>>, %arg4: memref<2x32x96xbf16, #tpu.memory_space<vmem>>, %arg5: memref<2x1x96xf32, #tpu.memory_space<vmem>>, %arg6: memref<2x32x32xbf16, #tpu.memory_space<vmem>>, %arg7: memref<2x1x32xf32, #tpu.memory_space<vmem>>, %arg8: memref<2x1x32xf32, #tpu.memory_space<vmem>>, %arg9: memref<2x1x32xf32, #tpu.memory_space<vmem>>, %arg10: memref<2x32x64xbf16, #tpu.memory_space<vmem>>, %arg11: memref<2x1x64xf32, #tpu.memory_space<vmem>>, %arg12: memref<2x64x32xbf16, #tpu.memory_space<vmem>>, %arg13: memref<2x1x32xf32, #tpu.memory_space<vmem>>, %arg14: memref<2x1x32xf32, #tpu.memory_space<vmem>>, %arg15: memref<2x1x32xf32, #tpu.memory_space<vmem>>, %arg16: memref<2x32x96xbf16, #tpu.memory_space<vmem>>, %arg17: memref<2x1x96xf32, #tpu.memory_space<vmem>>, %arg18: memref<2x32x32xbf16, #tpu.memory_space<vmem>>, %arg19: memref<2x1x32xf32, #tpu.memory_space<vmem>>, %arg20: memref<2x32x96xbf16, #tpu.memory_space<vmem>>, %arg21: memref<2x1x96xf32, #tpu.memory_space<vmem>>, %arg22: memref<2x32x32xbf16, #tpu.memory_space<vmem>>, %arg23: memref<2x1x32xf32, #tpu.memory_space<vmem>>, %arg24: memref<2x1x32xf32, #tpu.memory_space<vmem>>, %arg25: memref<2x1x32xf32, #tpu.memory_space<vmem>>, %arg26: memref<2x1x32xf32, #tpu.memory_space<vmem>>, %arg27: memref<2x1x32xf32, #tpu.memory_space<vmem>>, %arg28: memref<2x1x32xf32, #tpu.memory_space<vmem>>, %arg29: memref<2x1x32xf32, #tpu.memory_space<vmem>>, %arg30: memref<2x32x64xbf16, #tpu.memory_space<vmem>>, %arg31: memref<2x1x64xf32, #tpu.memory_space<vmem>>, %arg32: memref<2x64x32xbf16, #tpu.memory_space<vmem>>, %arg33: memref<2x1x32xf32, #tpu.memory_space<vmem>>, %arg34: memref<1x8x32xf32, #tpu.memory_space<vmem>>) attributes {dimension_semantics = [#tpu.dimension_semantics<parallel>], iteration_bounds = array<i64: 2>, scalar_prefetch = 0 : i64, scratch_operands = 0 : i64, tpu.core_type = #tpu.core_type<tc>, window_params = [{transform_indices = @transform_0, window_bounds = array<i64: 1, 8, 32>}, {transform_indices = @transform_1, window_bounds = array<i64: 1, 8, 32>}, {pipeline_mode = #tpu.pipeline_mode<synchronous>, transform_indices = @transform_2, window_bounds = array<i64: 8, 32>}, {pipeline_mode = #tpu.pipeline_mode<synchronous>, transform_indices = @transform_3, window_bounds = array<i64: 2, 32, 96>}, {pipeline_mode = #tpu.pipeline_mode<synchronous>, transform_indices = @transform_4, window_bounds = array<i64: 2, 1, 96>}, {pipeline_mode = #tpu.pipeline_mode<synchronous>, transform_indices = @transform_5, window_bounds = array<i64: 2, 32, 32>}, {pipeline_mode = #tpu.pipeline_mode<synchronous>, transform_indices = @transform_6, window_bounds = array<i64: 2, 1, 32>}, {pipeline_mode = #tpu.pipeline_mode<synchronous>, transform_indices = @transform_7, window_bounds = array<i64: 2, 1, 32>}, {pipeline_mode = #tpu.pipeline_mode<synchronous>, transform_indices = @transform_8, window_bounds = array<i64: 2, 1, 32>}, {pipeline_mode = #tpu.pipeline_mode<synchronous>, transform_indices = @transform_9, window_bounds = array<i64: 2, 32, 64>}, {pipeline_mode = #tpu.pipeline_mode<synchronous>, transform_indices = @transform_10, window_bounds = array<i64: 2, 1, 64>}, {pipeline_mode = #tpu.pipeline_mode<synchronous>, transform_indices = @transform_11, window_bounds = array<i64: 2, 64, 32>}, {pipeline_mode = #tpu.pipeline_mode<synchronous>, transform_indices = @transform_12, window_bounds = array<i64: 2, 1, 32>}, {pipeline_mode = #tpu.pipeline_mode<synchronous>, transform_indices = @transform_13, window_bounds = array<i64: 2, 1, 32>}, {pipeline_mode = #tpu.pipeline_mode<synchronous>, transform_indices = @transform_14, window_bounds = array<i64: 2, 1, 32>}, {pipeline_mode = #tpu.pipeline_mode<synchronous>, transform_indices = @transform_15, window_bounds = array<i64: 2, 32, 96>}, {pipeline_mode = #tpu.pipeline_mode<synchronous>, transform_indices = @transform_16, window_bounds = array<i64: 2, 1, 96>}, {pipeline_mode = #tpu.pipeline_mode<synchronous>, transform_indices = @transform_17, window_bounds = array<i64: 2, 32, 32>}, {pipeline_mode = #tpu.pipeline_mode<synchronous>, transform_indices = @transform_18, window_bounds = array<i64: 2, 1, 32>}, {pipeline_mode = #tpu.pipeline_mode<synchronous>, transform_indices = @transform_19, window_bounds = array<i64: 2, 32, 96>}, {pipeline_mode = #tpu.pipeline_mode<synchronous>, transform_indices = @transform_20, window_bounds = array<i64: 2, 1, 96>}, {pipeline_mode = #tpu.pipeline_mode<synchronous>, transform_indices = @transform_21, window_bounds = array<i64: 2, 32, 32>}, {pipeline_mode = #tpu.pipeline_mode<synchronous>, transform_indices = @transform_22, window_bounds = array<i64: 2, 1, 32>}, {pipeline_mode = #tpu.pipeline_mode<synchronous>, transform_indices = @transform_23, window_bounds = array<i64: 2, 1, 32>}, {pipeline_mode = #tpu.pipeline_mode<synchronous>, transform_indices = @transform_24, window_bounds = array<i64: 2, 1, 32>}, {pipeline_mode = #tpu.pipeline_mode<synchronous>, transform_indices = @transform_25, window_bounds = array<i64: 2, 1, 32>}, {pipeline_mode = #tpu.pipeline_mode<synchronous>, transform_indices = @transform_26, window_bounds = array<i64: 2, 1, 32>}, {pipeline_mode = #tpu.pipeline_mode<synchronous>, transform_indices = @transform_27, window_bounds = array<i64: 2, 1, 32>}, {pipeline_mode = #tpu.pipeline_mode<synchronous>, transform_indices = @transform_28, window_bounds = array<i64: 2, 1, 32>}, {pipeline_mode = #tpu.pipeline_mode<synchronous>, transform_indices = @transform_29, window_bounds = array<i64: 2, 32, 64>}, {pipeline_mode = #tpu.pipeline_mode<synchronous>, transform_indices = @transform_30, window_bounds = array<i64: 2, 1, 64>}, {pipeline_mode = #tpu.pipeline_mode<synchronous>, transform_indices = @transform_31, window_bounds = array<i64: 2, 64, 32>}, {pipeline_mode = #tpu.pipeline_mode<synchronous>, transform_indices = @transform_32, window_bounds = array<i64: 2, 1, 32>}, {transform_indices = @transform_33, window_bounds = array<i64: 1, 8, 32>}]} {
    %c0 = arith.constant 0 : index
    %c0_0 = arith.constant 0 : index
    %c0_1 = arith.constant 0 : index
    %0 = vector.load %arg1[%c0, %c0_0, %c0_1] : memref<1x8x32xf32, #tpu.memory_space<vmem>>, vector<1x8x32xf32>
    %1 = vector.shape_cast %0 : vector<1x8x32xf32> to vector<8x32xf32>
    %c0_2 = arith.constant 0 : index
    %c0_3 = arith.constant 0 : index
    %c0_4 = arith.constant 0 : index
    %2 = vector.load %arg2[%c0_2, %c0_3, %c0_4] : memref<1x8x32xf32, #tpu.memory_space<vmem>>, vector<1x8x32xf32>
    %3 = vector.shape_cast %2 : vector<1x8x32xf32> to vector<8x32xf32>
    %c0_5 = arith.constant 0 : index
    %c0_6 = arith.constant 0 : index
    %4 = vector.load %arg3[%c0_5, %c0_6] : memref<8x32xf32, #tpu.memory_space<vmem>>, vector<8x32xf32>
    %c0_i32 = arith.constant 0 : i32
    %c2_i32 = arith.constant 2 : i32
    %5 = arith.addi %c0_i32, %c2_i32 : i32
    %c1_i32 = arith.constant 1 : i32
    %6 = scf.for %arg35 = %c0_i32 to %5 step %c1_i32 iter_args(%arg36 = %1) -> (vector<8x32xf32>)  : i32 {
      %13 = arith.addf %arg36, %3 : vector<8x32xf32>
      %14 = arith.index_cast %arg35 : i32 to index
      %c0_15 = arith.constant 0 : index
      %c0_16 = arith.constant 0 : index
      %15 = vector.load %arg4[%14, %c0_15, %c0_16] : memref<2x32x96xbf16, #tpu.memory_space<vmem>>, vector<1x32x96xbf16>
      %16 = vector.shape_cast %15 : vector<1x32x96xbf16> to vector<32x96xbf16>
      %17 = arith.index_cast %arg35 : i32 to index
      %c0_17 = arith.constant 0 : index
      %c0_18 = arith.constant 0 : index
      %18 = vector.load %arg5[%17, %c0_17, %c0_18] : memref<2x1x96xf32, #tpu.memory_space<vmem>>, vector<1x1x96xf32>
      %19 = vector.shape_cast %18 : vector<1x1x96xf32> to vector<1x96xf32>
      %20 = arith.index_cast %arg35 : i32 to index
      %c0_19 = arith.constant 0 : index
      %c0_20 = arith.constant 0 : index
      %21 = vector.load %arg6[%20, %c0_19, %c0_20] : memref<2x32x32xbf16, #tpu.memory_space<vmem>>, vector<1x32x32xbf16>
      %22 = vector.shape_cast %21 : vector<1x32x32xbf16> to vector<32x32xbf16>
      %23 = arith.index_cast %arg35 : i32 to index
      %c0_21 = arith.constant 0 : index
      %c0_22 = arith.constant 0 : index
      %24 = vector.load %arg7[%23, %c0_21, %c0_22] : memref<2x1x32xf32, #tpu.memory_space<vmem>>, vector<1x1x32xf32>
      %25 = vector.shape_cast %24 : vector<1x1x32xf32> to vector<1x32xf32>
      %26 = arith.truncf %13 : vector<8x32xf32> to vector<8x32xbf16>
      %27 = arith.truncf %arg36 : vector<8x32xf32> to vector<8x32xbf16>
      %28 = vector.extract_strided_slice %16 {offsets = [0, 0], sizes = [32, 64], strides = [1, 1]} : vector<32x96xbf16> to vector<32x64xbf16>
      %cst_23 = arith.constant dense<0.000000e+00> : vector<8x64xf32>
      %29 = tpu.matmul %26, %28, %cst_23 {dimension_numbers = #tpu.dot_dimension_numbers<[1], [0], [0], [1], [0, 0, 1, 1], [], []>} : vector<8x32xbf16>, vector<32x64xbf16>, vector<8x64xf32> -> vector<8x64xf32>
      %30 = vector.extract_strided_slice %19 {offsets = [0, 0], sizes = [1, 64], strides = [1, 1]} : vector<1x96xf32> to vector<1x64xf32>
      %31 = vector.broadcast %30 : vector<1x64xf32> to vector<8x64xf32>
      %32 = arith.addf %29, %31 : vector<8x64xf32>
      %33 = vector.extract_strided_slice %32 {offsets = [0, 0], sizes = [8, 32], strides = [1, 1]} : vector<8x64xf32> to vector<8x32xf32>
      %34 = vector.extract_strided_slice %32 {offsets = [0, 32], sizes = [8, 32], strides = [1, 1]} : vector<8x64xf32> to vector<8x32xf32>
      %35 = vector.extract_strided_slice %16 {offsets = [0, 64], sizes = [32, 32], strides = [1, 1]} : vector<32x96xbf16> to vector<32x32xbf16>
      %cst_24 = arith.constant dense<0.000000e+00> : vector<8x32xf32>
      %36 = tpu.matmul %27, %35, %cst_24 {dimension_numbers = #tpu.dot_dimension_numbers<[1], [0], [0], [1], [0, 0, 1, 1], [], []>} : vector<8x32xbf16>, vector<32x32xbf16>, vector<8x32xf32> -> vector<8x32xf32>
      %37 = vector.extract_strided_slice %19 {offsets = [0, 64], sizes = [1, 32], strides = [1, 1]} : vector<1x96xf32> to vector<1x32xf32>
      %38 = vector.broadcast %37 : vector<1x32xf32> to vector<8x32xf32>
      %39 = arith.addf %36, %38 : vector<8x32xf32>
      %40 = vector.extract_strided_slice %33 {offsets = [0, 0], sizes = [8, 8], strides = [1, 1]} : vector<8x32xf32> to vector<8x8xf32>
      %41 = vector.extract_strided_slice %33 {offsets = [0, 8], sizes = [8, 8], strides = [1, 1]} : vector<8x32xf32> to vector<8x8xf32>
      %42 = vector.extract_strided_slice %33 {offsets = [0, 16], sizes = [8, 8], strides = [1, 1]} : vector<8x32xf32> to vector<8x8xf32>
      %43 = vector.extract_strided_slice %33 {offsets = [0, 24], sizes = [8, 8], strides = [1, 1]} : vector<8x32xf32> to vector<8x8xf32>
      %44 = vector.shape_cast %40 : vector<8x8xf32> to vector<1x8x8xf32>
      %45 = vector.shape_cast %41 : vector<8x8xf32> to vector<1x8x8xf32>
      %46 = vector.shape_cast %42 : vector<8x8xf32> to vector<1x8x8xf32>
      %47 = vector.shape_cast %43 : vector<8x8xf32> to vector<1x8x8xf32>
      %48 = tpu.concatenate %44, %45, %46, %47 in 0 : vector<1x8x8xf32>, vector<1x8x8xf32>, vector<1x8x8xf32>, vector<1x8x8xf32> -> vector<4x8x8xf32>
      %49 = arith.truncf %48 : vector<4x8x8xf32> to vector<4x8x8xbf16>
      %50 = vector.extract_strided_slice %34 {offsets = [0, 0], sizes = [8, 8], strides = [1, 1]} : vector<8x32xf32> to vector<8x8xf32>
      %51 = vector.extract_strided_slice %34 {offsets = [0, 8], sizes = [8, 8], strides = [1, 1]} : vector<8x32xf32> to vector<8x8xf32>
      %52 = vector.extract_strided_slice %34 {offsets = [0, 16], sizes = [8, 8], strides = [1, 1]} : vector<8x32xf32> to vector<8x8xf32>
      %53 = vector.extract_strided_slice %34 {offsets = [0, 24], sizes = [8, 8], strides = [1, 1]} : vector<8x32xf32> to vector<8x8xf32>
      %54 = vector.shape_cast %50 : vector<8x8xf32> to vector<1x8x8xf32>
      %55 = vector.shape_cast %51 : vector<8x8xf32> to vector<1x8x8xf32>
      %56 = vector.shape_cast %52 : vector<8x8xf32> to vector<1x8x8xf32>
      %57 = vector.shape_cast %53 : vector<8x8xf32> to vector<1x8x8xf32>
      %58 = tpu.concatenate %54, %55, %56, %57 in 0 : vector<1x8x8xf32>, vector<1x8x8xf32>, vector<1x8x8xf32>, vector<1x8x8xf32> -> vector<4x8x8xf32>
      %59 = arith.truncf %58 : vector<4x8x8xf32> to vector<4x8x8xbf16>
      %60 = vector.extract_strided_slice %39 {offsets = [0, 0], sizes = [8, 8], strides = [1, 1]} : vector<8x32xf32> to vector<8x8xf32>
      %61 = vector.extract_strided_slice %39 {offsets = [0, 8], sizes = [8, 8], strides = [1, 1]} : vector<8x32xf32> to vector<8x8xf32>
      %62 = vector.extract_strided_slice %39 {offsets = [0, 16], sizes = [8, 8], strides = [1, 1]} : vector<8x32xf32> to vector<8x8xf32>
      %63 = vector.extract_strided_slice %39 {offsets = [0, 24], sizes = [8, 8], strides = [1, 1]} : vector<8x32xf32> to vector<8x8xf32>
      %64 = vector.shape_cast %60 : vector<8x8xf32> to vector<1x8x8xf32>
      %65 = vector.shape_cast %61 : vector<8x8xf32> to vector<1x8x8xf32>
      %66 = vector.shape_cast %62 : vector<8x8xf32> to vector<1x8x8xf32>
      %67 = vector.shape_cast %63 : vector<8x8xf32> to vector<1x8x8xf32>
      %68 = tpu.concatenate %64, %65, %66, %67 in 0 : vector<1x8x8xf32>, vector<1x8x8xf32>, vector<1x8x8xf32>, vector<1x8x8xf32> -> vector<4x8x8xf32>
      %69 = arith.truncf %68 : vector<4x8x8xf32> to vector<4x8x8xbf16>
      %cst_25 = arith.constant dense<0.000000e+00> : vector<4x8x8xf32>
      %70 = tpu.matmul %49, %59, %cst_25 {dimension_numbers = #tpu.dot_dimension_numbers<[2], [2], [1], [1], [0, 0, 0, 1, 1, 1], [0], [0]>} : vector<4x8x8xbf16>, vector<4x8x8xbf16>, vector<4x8x8xf32> -> vector<4x8x8xf32>
      %cst_26 = arith.constant dense<0xFF800000> : vector<4x8xf32>
      %71 = vector.multi_reduction <maximumf>, %70, %cst_26 [2] : vector<4x8x8xf32> to vector<4x8xf32>
      %72 = vector.shape_cast %71 : vector<4x8xf32> to vector<4x8x1xf32>
      %73 = vector.broadcast %72 : vector<4x8x1xf32> to vector<4x8x8xf32>
      %74 = arith.subf %70, %73 : vector<4x8x8xf32>
      %75 = math.exp %74 : vector<4x8x8xf32>
      %cst_27 = arith.constant dense<0.000000e+00> : vector<4x8xf32>
      %76 = vector.multi_reduction <add>, %75, %cst_27 [2] : vector<4x8x8xf32> to vector<4x8xf32>
      %77 = vector.shape_cast %76 : vector<4x8xf32> to vector<4x8x1xf32>
      %78 = tpu.reciprocal %77 {approx = true} : vector<4x8x1xf32> -> vector<4x8x1xf32>
      %79 = vector.broadcast %78 : vector<4x8x1xf32> to vector<4x8x8xf32>
      %80 = arith.mulf %75, %79 : vector<4x8x8xf32>
      %81 = arith.truncf %80 : vector<4x8x8xf32> to vector<4x8x8xbf16>
      %cst_28 = arith.constant dense<0.000000e+00> : vector<4x8x8xf32>
      %82 = tpu.matmul %81, %69, %cst_28 {dimension_numbers = #tpu.dot_dimension_numbers<[2], [1], [1], [2], [0, 0, 0, 1, 1, 2], [0], [0]>} : vector<4x8x8xbf16>, vector<4x8x8xbf16>, vector<4x8x8xf32> -> vector<4x8x8xf32>
      %83 = vector.extract_strided_slice %82 {offsets = [0, 0, 0], sizes = [1, 8, 8], strides = [1, 1, 1]} : vector<4x8x8xf32> to vector<1x8x8xf32>
      %84 = vector.shape_cast %83 : vector<1x8x8xf32> to vector<8x8xf32>
      %85 = vector.extract_strided_slice %82 {offsets = [1, 0, 0], sizes = [1, 8, 8], strides = [1, 1, 1]} : vector<4x8x8xf32> to vector<1x8x8xf32>
      %86 = vector.shape_cast %85 : vector<1x8x8xf32> to vector<8x8xf32>
      %87 = vector.extract_strided_slice %82 {offsets = [2, 0, 0], sizes = [1, 8, 8], strides = [1, 1, 1]} : vector<4x8x8xf32> to vector<1x8x8xf32>
      %88 = vector.shape_cast %87 : vector<1x8x8xf32> to vector<8x8xf32>
      %89 = vector.extract_strided_slice %82 {offsets = [3, 0, 0], sizes = [1, 8, 8], strides = [1, 1, 1]} : vector<4x8x8xf32> to vector<1x8x8xf32>
      %90 = vector.shape_cast %89 : vector<1x8x8xf32> to vector<8x8xf32>
      %91 = tpu.concatenate %84, %86, %88, %90 in 1 : vector<8x8xf32>, vector<8x8xf32>, vector<8x8xf32>, vector<8x8xf32> -> vector<8x32xf32>
      %92 = arith.truncf %91 : vector<8x32xf32> to vector<8x32xbf16>
      %cst_29 = arith.constant dense<0.000000e+00> : vector<8x32xf32>
      %93 = tpu.matmul %92, %22, %cst_29 {dimension_numbers = #tpu.dot_dimension_numbers<[1], [0], [0], [1], [0, 0, 1, 1], [], []>} : vector<8x32xbf16>, vector<32x32xbf16>, vector<8x32xf32> -> vector<8x32xf32>
      %94 = vector.broadcast %25 : vector<1x32xf32> to vector<8x32xf32>
      %95 = arith.addf %93, %94 : vector<8x32xf32>
      %96 = arith.index_cast %arg35 : i32 to index
      %c0_30 = arith.constant 0 : index
      %c0_31 = arith.constant 0 : index
      %97 = vector.load %arg8[%96, %c0_30, %c0_31] : memref<2x1x32xf32, #tpu.memory_space<vmem>>, vector<1x1x32xf32>
      %98 = vector.shape_cast %97 : vector<1x1x32xf32> to vector<1x32xf32>
      %99 = arith.index_cast %arg35 : i32 to index
      %c0_32 = arith.constant 0 : index
      %c0_33 = arith.constant 0 : index
      %100 = vector.load %arg9[%99, %c0_32, %c0_33] : memref<2x1x32xf32, #tpu.memory_space<vmem>>, vector<1x1x32xf32>
      %101 = vector.shape_cast %100 : vector<1x1x32xf32> to vector<1x32xf32>
      %102 = arith.addf %arg36, %95 : vector<8x32xf32>
      %cst_34 = arith.constant dense<0.000000e+00> : vector<8xf32>
      %103 = vector.multi_reduction <add>, %102, %cst_34 [1] : vector<8x32xf32> to vector<8xf32>
      %104 = vector.shape_cast %103 : vector<8xf32> to vector<8x1xf32>
      %cst_35 = arith.constant 3.200000e+01 : f32
      %105 = vector.broadcast %cst_35 : f32 to vector<8x1xf32>
      %106 = arith.divf %104, %105 : vector<8x1xf32>
      %107 = vector.broadcast %106 : vector<8x1xf32> to vector<8x32xf32>
      %108 = arith.subf %102, %107 : vector<8x32xf32>
      %109 = arith.mulf %108, %108 : vector<8x32xf32>
      %cst_36 = arith.constant dense<0.000000e+00> : vector<8xf32>
      %110 = vector.multi_reduction <add>, %109, %cst_36 [1] : vector<8x32xf32> to vector<8xf32>
      %111 = vector.shape_cast %110 : vector<8xf32> to vector<8x1xf32>
      %cst_37 = arith.constant 3.200000e+01 : f32
      %112 = vector.broadcast %cst_37 : f32 to vector<8x1xf32>
      %113 = arith.divf %111, %112 : vector<8x1xf32>
      %114 = vector.broadcast %106 : vector<8x1xf32> to vector<8x32xf32>
      %115 = arith.subf %102, %114 : vector<8x32xf32>
      %cst_38 = arith.constant 9.99999974E-6 : f32
      %116 = vector.broadcast %cst_38 : f32 to vector<8x1xf32>
      %117 = arith.addf %113, %116 : vector<8x1xf32>
      %118 = math.rsqrt %117 : vector<8x1xf32>
      %119 = vector.broadcast %118 : vector<8x1xf32> to vector<8x32xf32>
      %120 = arith.mulf %115, %119 : vector<8x32xf32>
      %121 = vector.broadcast %98 : vector<1x32xf32> to vector<8x32xf32>
      %122 = arith.mulf %120, %121 : vector<8x32xf32>
      %123 = vector.broadcast %101 : vector<1x32xf32> to vector<8x32xf32>
      %124 = arith.addf %122, %123 : vector<8x32xf32>
      %125 = arith.index_cast %arg35 : i32 to index
      %c0_39 = arith.constant 0 : index
      %c0_40 = arith.constant 0 : index
      %126 = vector.load %arg10[%125, %c0_39, %c0_40] : memref<2x32x64xbf16, #tpu.memory_space<vmem>>, vector<1x32x64xbf16>
      %127 = vector.shape_cast %126 : vector<1x32x64xbf16> to vector<32x64xbf16>
      %128 = arith.index_cast %arg35 : i32 to index
      %c0_41 = arith.constant 0 : index
      %c0_42 = arith.constant 0 : index
      %129 = vector.load %arg11[%128, %c0_41, %c0_42] : memref<2x1x64xf32, #tpu.memory_space<vmem>>, vector<1x1x64xf32>
      %130 = vector.shape_cast %129 : vector<1x1x64xf32> to vector<1x64xf32>
      %131 = arith.index_cast %arg35 : i32 to index
      %c0_43 = arith.constant 0 : index
      %c0_44 = arith.constant 0 : index
      %132 = vector.load %arg12[%131, %c0_43, %c0_44] : memref<2x64x32xbf16, #tpu.memory_space<vmem>>, vector<1x64x32xbf16>
      %133 = vector.shape_cast %132 : vector<1x64x32xbf16> to vector<64x32xbf16>
      %134 = arith.index_cast %arg35 : i32 to index
      %c0_45 = arith.constant 0 : index
      %c0_46 = arith.constant 0 : index
      %135 = vector.load %arg13[%134, %c0_45, %c0_46] : memref<2x1x32xf32, #tpu.memory_space<vmem>>, vector<1x1x32xf32>
      %136 = vector.shape_cast %135 : vector<1x1x32xf32> to vector<1x32xf32>
      %137 = arith.truncf %124 : vector<8x32xf32> to vector<8x32xbf16>
      %cst_47 = arith.constant dense<0.000000e+00> : vector<8x64xf32>
      %138 = tpu.matmul %137, %127, %cst_47 {dimension_numbers = #tpu.dot_dimension_numbers<[1], [0], [0], [1], [0, 0, 1, 1], [], []>} : vector<8x32xbf16>, vector<32x64xbf16>, vector<8x64xf32> -> vector<8x64xf32>
      %139 = vector.broadcast %130 : vector<1x64xf32> to vector<8x64xf32>
      %140 = arith.addf %138, %139 : vector<8x64xf32>
      %cst_48 = arith.constant 0.000000e+00 : f32
      %141 = vector.broadcast %cst_48 : f32 to vector<8x64xf32>
      %142 = arith.maximumf %140, %141 : vector<8x64xf32>
      %143 = arith.truncf %142 : vector<8x64xf32> to vector<8x64xbf16>
      %cst_49 = arith.constant dense<0.000000e+00> : vector<8x32xf32>
      %144 = tpu.matmul %143, %133, %cst_49 {dimension_numbers = #tpu.dot_dimension_numbers<[1], [0], [0], [1], [0, 0, 1, 1], [], []>} : vector<8x64xbf16>, vector<64x32xbf16>, vector<8x32xf32> -> vector<8x32xf32>
      %145 = vector.broadcast %136 : vector<1x32xf32> to vector<8x32xf32>
      %146 = arith.addf %144, %145 : vector<8x32xf32>
      %147 = arith.index_cast %arg35 : i32 to index
      %c0_50 = arith.constant 0 : index
      %c0_51 = arith.constant 0 : index
      %148 = vector.load %arg14[%147, %c0_50, %c0_51] : memref<2x1x32xf32, #tpu.memory_space<vmem>>, vector<1x1x32xf32>
      %149 = vector.shape_cast %148 : vector<1x1x32xf32> to vector<1x32xf32>
      %150 = arith.index_cast %arg35 : i32 to index
      %c0_52 = arith.constant 0 : index
      %c0_53 = arith.constant 0 : index
      %151 = vector.load %arg15[%150, %c0_52, %c0_53] : memref<2x1x32xf32, #tpu.memory_space<vmem>>, vector<1x1x32xf32>
      %152 = vector.shape_cast %151 : vector<1x1x32xf32> to vector<1x32xf32>
      %153 = arith.addf %124, %146 : vector<8x32xf32>
      %cst_54 = arith.constant dense<0.000000e+00> : vector<8xf32>
      %154 = vector.multi_reduction <add>, %153, %cst_54 [1] : vector<8x32xf32> to vector<8xf32>
      %155 = vector.shape_cast %154 : vector<8xf32> to vector<8x1xf32>
      %cst_55 = arith.constant 3.200000e+01 : f32
      %156 = vector.broadcast %cst_55 : f32 to vector<8x1xf32>
      %157 = arith.divf %155, %156 : vector<8x1xf32>
      %158 = vector.broadcast %157 : vector<8x1xf32> to vector<8x32xf32>
      %159 = arith.subf %153, %158 : vector<8x32xf32>
      %160 = arith.mulf %159, %159 : vector<8x32xf32>
      %cst_56 = arith.constant dense<0.000000e+00> : vector<8xf32>
      %161 = vector.multi_reduction <add>, %160, %cst_56 [1] : vector<8x32xf32> to vector<8xf32>
      %162 = vector.shape_cast %161 : vector<8xf32> to vector<8x1xf32>
      %cst_57 = arith.constant 3.200000e+01 : f32
      %163 = vector.broadcast %cst_57 : f32 to vector<8x1xf32>
      %164 = arith.divf %162, %163 : vector<8x1xf32>
      %165 = vector.broadcast %157 : vector<8x1xf32> to vector<8x32xf32>
      %166 = arith.subf %153, %165 : vector<8x32xf32>
      %cst_58 = arith.constant 9.99999974E-6 : f32
      %167 = vector.broadcast %cst_58 : f32 to vector<8x1xf32>
      %168 = arith.addf %164, %167 : vector<8x1xf32>
      %169 = math.rsqrt %168 : vector<8x1xf32>
      %170 = vector.broadcast %169 : vector<8x1xf32> to vector<8x32xf32>
      %171 = arith.mulf %166, %170 : vector<8x32xf32>
      %172 = vector.broadcast %149 : vector<1x32xf32> to vector<8x32xf32>
      %173 = arith.mulf %171, %172 : vector<8x32xf32>
      %174 = vector.broadcast %152 : vector<1x32xf32> to vector<8x32xf32>
      %175 = arith.addf %173, %174 : vector<8x32xf32>
      scf.yield %175 : vector<8x32xf32>
    }
    %c2_i32_7 = arith.constant 2 : i32
    %7 = arith.addf %6, %3 : vector<8x32xf32>
    %cst = arith.constant 0.000000e+00 : f32
    %8 = vector.broadcast %cst : f32 to vector<8x32xf32>
    %c0_i32_8 = arith.constant 0 : i32
    %c2_i32_9 = arith.constant 2 : i32
    %9 = arith.addi %c0_i32_8, %c2_i32_9 : i32
    %c1_i32_10 = arith.constant 1 : i32
    %10 = scf.for %arg35 = %c0_i32_8 to %9 step %c1_i32_10 iter_args(%arg36 = %8) -> (vector<8x32xf32>)  : i32 {
      %13 = arith.addf %arg36, %4 : vector<8x32xf32>
      %14 = arith.index_cast %arg35 : i32 to index
      %c0_15 = arith.constant 0 : index
      %c0_16 = arith.constant 0 : index
      %15 = vector.load %arg16[%14, %c0_15, %c0_16] : memref<2x32x96xbf16, #tpu.memory_space<vmem>>, vector<1x32x96xbf16>
      %16 = vector.shape_cast %15 : vector<1x32x96xbf16> to vector<32x96xbf16>
      %17 = arith.index_cast %arg35 : i32 to index
      %c0_17 = arith.constant 0 : index
      %c0_18 = arith.constant 0 : index
      %18 = vector.load %arg17[%17, %c0_17, %c0_18] : memref<2x1x96xf32, #tpu.memory_space<vmem>>, vector<1x1x96xf32>
      %19 = vector.shape_cast %18 : vector<1x1x96xf32> to vector<1x96xf32>
      %20 = arith.index_cast %arg35 : i32 to index
      %c0_19 = arith.constant 0 : index
      %c0_20 = arith.constant 0 : index
      %21 = vector.load %arg18[%20, %c0_19, %c0_20] : memref<2x32x32xbf16, #tpu.memory_space<vmem>>, vector<1x32x32xbf16>
      %22 = vector.shape_cast %21 : vector<1x32x32xbf16> to vector<32x32xbf16>
      %23 = arith.index_cast %arg35 : i32 to index
      %c0_21 = arith.constant 0 : index
      %c0_22 = arith.constant 0 : index
      %24 = vector.load %arg19[%23, %c0_21, %c0_22] : memref<2x1x32xf32, #tpu.memory_space<vmem>>, vector<1x1x32xf32>
      %25 = vector.shape_cast %24 : vector<1x1x32xf32> to vector<1x32xf32>
      %26 = arith.truncf %13 : vector<8x32xf32> to vector<8x32xbf16>
      %27 = arith.truncf %arg36 : vector<8x32xf32> to vector<8x32xbf16>
      %28 = vector.extract_strided_slice %16 {offsets = [0, 0], sizes = [32, 64], strides = [1, 1]} : vector<32x96xbf16> to vector<32x64xbf16>
      %cst_23 = arith.constant dense<0.000000e+00> : vector<8x64xf32>
      %29 = tpu.matmul %26, %28, %cst_23 {dimension_numbers = #tpu.dot_dimension_numbers<[1], [0], [0], [1], [0, 0, 1, 1], [], []>} : vector<8x32xbf16>, vector<32x64xbf16>, vector<8x64xf32> -> vector<8x64xf32>
      %30 = vector.extract_strided_slice %19 {offsets = [0, 0], sizes = [1, 64], strides = [1, 1]} : vector<1x96xf32> to vector<1x64xf32>
      %31 = vector.broadcast %30 : vector<1x64xf32> to vector<8x64xf32>
      %32 = arith.addf %29, %31 : vector<8x64xf32>
      %33 = vector.extract_strided_slice %32 {offsets = [0, 0], sizes = [8, 32], strides = [1, 1]} : vector<8x64xf32> to vector<8x32xf32>
      %34 = vector.extract_strided_slice %32 {offsets = [0, 32], sizes = [8, 32], strides = [1, 1]} : vector<8x64xf32> to vector<8x32xf32>
      %35 = vector.extract_strided_slice %16 {offsets = [0, 64], sizes = [32, 32], strides = [1, 1]} : vector<32x96xbf16> to vector<32x32xbf16>
      %cst_24 = arith.constant dense<0.000000e+00> : vector<8x32xf32>
      %36 = tpu.matmul %27, %35, %cst_24 {dimension_numbers = #tpu.dot_dimension_numbers<[1], [0], [0], [1], [0, 0, 1, 1], [], []>} : vector<8x32xbf16>, vector<32x32xbf16>, vector<8x32xf32> -> vector<8x32xf32>
      %37 = vector.extract_strided_slice %19 {offsets = [0, 64], sizes = [1, 32], strides = [1, 1]} : vector<1x96xf32> to vector<1x32xf32>
      %38 = vector.broadcast %37 : vector<1x32xf32> to vector<8x32xf32>
      %39 = arith.addf %36, %38 : vector<8x32xf32>
      %40 = vector.extract_strided_slice %33 {offsets = [0, 0], sizes = [8, 8], strides = [1, 1]} : vector<8x32xf32> to vector<8x8xf32>
      %41 = vector.extract_strided_slice %33 {offsets = [0, 8], sizes = [8, 8], strides = [1, 1]} : vector<8x32xf32> to vector<8x8xf32>
      %42 = vector.extract_strided_slice %33 {offsets = [0, 16], sizes = [8, 8], strides = [1, 1]} : vector<8x32xf32> to vector<8x8xf32>
      %43 = vector.extract_strided_slice %33 {offsets = [0, 24], sizes = [8, 8], strides = [1, 1]} : vector<8x32xf32> to vector<8x8xf32>
      %44 = vector.shape_cast %40 : vector<8x8xf32> to vector<1x8x8xf32>
      %45 = vector.shape_cast %41 : vector<8x8xf32> to vector<1x8x8xf32>
      %46 = vector.shape_cast %42 : vector<8x8xf32> to vector<1x8x8xf32>
      %47 = vector.shape_cast %43 : vector<8x8xf32> to vector<1x8x8xf32>
      %48 = tpu.concatenate %44, %45, %46, %47 in 0 : vector<1x8x8xf32>, vector<1x8x8xf32>, vector<1x8x8xf32>, vector<1x8x8xf32> -> vector<4x8x8xf32>
      %49 = arith.truncf %48 : vector<4x8x8xf32> to vector<4x8x8xbf16>
      %50 = vector.extract_strided_slice %34 {offsets = [0, 0], sizes = [8, 8], strides = [1, 1]} : vector<8x32xf32> to vector<8x8xf32>
      %51 = vector.extract_strided_slice %34 {offsets = [0, 8], sizes = [8, 8], strides = [1, 1]} : vector<8x32xf32> to vector<8x8xf32>
      %52 = vector.extract_strided_slice %34 {offsets = [0, 16], sizes = [8, 8], strides = [1, 1]} : vector<8x32xf32> to vector<8x8xf32>
      %53 = vector.extract_strided_slice %34 {offsets = [0, 24], sizes = [8, 8], strides = [1, 1]} : vector<8x32xf32> to vector<8x8xf32>
      %54 = vector.shape_cast %50 : vector<8x8xf32> to vector<1x8x8xf32>
      %55 = vector.shape_cast %51 : vector<8x8xf32> to vector<1x8x8xf32>
      %56 = vector.shape_cast %52 : vector<8x8xf32> to vector<1x8x8xf32>
      %57 = vector.shape_cast %53 : vector<8x8xf32> to vector<1x8x8xf32>
      %58 = tpu.concatenate %54, %55, %56, %57 in 0 : vector<1x8x8xf32>, vector<1x8x8xf32>, vector<1x8x8xf32>, vector<1x8x8xf32> -> vector<4x8x8xf32>
      %59 = arith.truncf %58 : vector<4x8x8xf32> to vector<4x8x8xbf16>
      %60 = vector.extract_strided_slice %39 {offsets = [0, 0], sizes = [8, 8], strides = [1, 1]} : vector<8x32xf32> to vector<8x8xf32>
      %61 = vector.extract_strided_slice %39 {offsets = [0, 8], sizes = [8, 8], strides = [1, 1]} : vector<8x32xf32> to vector<8x8xf32>
      %62 = vector.extract_strided_slice %39 {offsets = [0, 16], sizes = [8, 8], strides = [1, 1]} : vector<8x32xf32> to vector<8x8xf32>
      %63 = vector.extract_strided_slice %39 {offsets = [0, 24], sizes = [8, 8], strides = [1, 1]} : vector<8x32xf32> to vector<8x8xf32>
      %64 = vector.shape_cast %60 : vector<8x8xf32> to vector<1x8x8xf32>
      %65 = vector.shape_cast %61 : vector<8x8xf32> to vector<1x8x8xf32>
      %66 = vector.shape_cast %62 : vector<8x8xf32> to vector<1x8x8xf32>
      %67 = vector.shape_cast %63 : vector<8x8xf32> to vector<1x8x8xf32>
      %68 = tpu.concatenate %64, %65, %66, %67 in 0 : vector<1x8x8xf32>, vector<1x8x8xf32>, vector<1x8x8xf32>, vector<1x8x8xf32> -> vector<4x8x8xf32>
      %69 = arith.truncf %68 : vector<4x8x8xf32> to vector<4x8x8xbf16>
      %cst_25 = arith.constant dense<0.000000e+00> : vector<4x8x8xf32>
      %70 = tpu.matmul %49, %59, %cst_25 {dimension_numbers = #tpu.dot_dimension_numbers<[2], [2], [1], [1], [0, 0, 0, 1, 1, 1], [0], [0]>} : vector<4x8x8xbf16>, vector<4x8x8xbf16>, vector<4x8x8xf32> -> vector<4x8x8xf32>
      %cst_26 = arith.constant dense<0xFF800000> : vector<4x8xf32>
      %71 = vector.multi_reduction <maximumf>, %70, %cst_26 [2] : vector<4x8x8xf32> to vector<4x8xf32>
      %72 = vector.shape_cast %71 : vector<4x8xf32> to vector<4x8x1xf32>
      %73 = vector.broadcast %72 : vector<4x8x1xf32> to vector<4x8x8xf32>
      %74 = arith.subf %70, %73 : vector<4x8x8xf32>
      %75 = math.exp %74 : vector<4x8x8xf32>
      %cst_27 = arith.constant dense<0.000000e+00> : vector<4x8xf32>
      %76 = vector.multi_reduction <add>, %75, %cst_27 [2] : vector<4x8x8xf32> to vector<4x8xf32>
      %77 = vector.shape_cast %76 : vector<4x8xf32> to vector<4x8x1xf32>
      %78 = tpu.reciprocal %77 {approx = true} : vector<4x8x1xf32> -> vector<4x8x1xf32>
      %79 = vector.broadcast %78 : vector<4x8x1xf32> to vector<4x8x8xf32>
      %80 = arith.mulf %75, %79 : vector<4x8x8xf32>
      %81 = arith.truncf %80 : vector<4x8x8xf32> to vector<4x8x8xbf16>
      %cst_28 = arith.constant dense<0.000000e+00> : vector<4x8x8xf32>
      %82 = tpu.matmul %81, %69, %cst_28 {dimension_numbers = #tpu.dot_dimension_numbers<[2], [1], [1], [2], [0, 0, 0, 1, 1, 2], [0], [0]>} : vector<4x8x8xbf16>, vector<4x8x8xbf16>, vector<4x8x8xf32> -> vector<4x8x8xf32>
      %83 = vector.extract_strided_slice %82 {offsets = [0, 0, 0], sizes = [1, 8, 8], strides = [1, 1, 1]} : vector<4x8x8xf32> to vector<1x8x8xf32>
      %84 = vector.shape_cast %83 : vector<1x8x8xf32> to vector<8x8xf32>
      %85 = vector.extract_strided_slice %82 {offsets = [1, 0, 0], sizes = [1, 8, 8], strides = [1, 1, 1]} : vector<4x8x8xf32> to vector<1x8x8xf32>
      %86 = vector.shape_cast %85 : vector<1x8x8xf32> to vector<8x8xf32>
      %87 = vector.extract_strided_slice %82 {offsets = [2, 0, 0], sizes = [1, 8, 8], strides = [1, 1, 1]} : vector<4x8x8xf32> to vector<1x8x8xf32>
      %88 = vector.shape_cast %87 : vector<1x8x8xf32> to vector<8x8xf32>
      %89 = vector.extract_strided_slice %82 {offsets = [3, 0, 0], sizes = [1, 8, 8], strides = [1, 1, 1]} : vector<4x8x8xf32> to vector<1x8x8xf32>
      %90 = vector.shape_cast %89 : vector<1x8x8xf32> to vector<8x8xf32>
      %91 = tpu.concatenate %84, %86, %88, %90 in 1 : vector<8x8xf32>, vector<8x8xf32>, vector<8x8xf32>, vector<8x8xf32> -> vector<8x32xf32>
      %92 = arith.truncf %91 : vector<8x32xf32> to vector<8x32xbf16>
      %cst_29 = arith.constant dense<0.000000e+00> : vector<8x32xf32>
      %93 = tpu.matmul %92, %22, %cst_29 {dimension_numbers = #tpu.dot_dimension_numbers<[1], [0], [0], [1], [0, 0, 1, 1], [], []>} : vector<8x32xbf16>, vector<32x32xbf16>, vector<8x32xf32> -> vector<8x32xf32>
      %94 = vector.broadcast %25 : vector<1x32xf32> to vector<8x32xf32>
      %95 = arith.addf %93, %94 : vector<8x32xf32>
      %96 = arith.index_cast %arg35 : i32 to index
      %c0_30 = arith.constant 0 : index
      %c0_31 = arith.constant 0 : index
      %97 = vector.load %arg24[%96, %c0_30, %c0_31] : memref<2x1x32xf32, #tpu.memory_space<vmem>>, vector<1x1x32xf32>
      %98 = vector.shape_cast %97 : vector<1x1x32xf32> to vector<1x32xf32>
      %99 = arith.index_cast %arg35 : i32 to index
      %c0_32 = arith.constant 0 : index
      %c0_33 = arith.constant 0 : index
      %100 = vector.load %arg25[%99, %c0_32, %c0_33] : memref<2x1x32xf32, #tpu.memory_space<vmem>>, vector<1x1x32xf32>
      %101 = vector.shape_cast %100 : vector<1x1x32xf32> to vector<1x32xf32>
      %102 = arith.addf %arg36, %95 : vector<8x32xf32>
      %cst_34 = arith.constant dense<0.000000e+00> : vector<8xf32>
      %103 = vector.multi_reduction <add>, %102, %cst_34 [1] : vector<8x32xf32> to vector<8xf32>
      %104 = vector.shape_cast %103 : vector<8xf32> to vector<8x1xf32>
      %cst_35 = arith.constant 3.200000e+01 : f32
      %105 = vector.broadcast %cst_35 : f32 to vector<8x1xf32>
      %106 = arith.divf %104, %105 : vector<8x1xf32>
      %107 = vector.broadcast %106 : vector<8x1xf32> to vector<8x32xf32>
      %108 = arith.subf %102, %107 : vector<8x32xf32>
      %109 = arith.mulf %108, %108 : vector<8x32xf32>
      %cst_36 = arith.constant dense<0.000000e+00> : vector<8xf32>
      %110 = vector.multi_reduction <add>, %109, %cst_36 [1] : vector<8x32xf32> to vector<8xf32>
      %111 = vector.shape_cast %110 : vector<8xf32> to vector<8x1xf32>
      %cst_37 = arith.constant 3.200000e+01 : f32
      %112 = vector.broadcast %cst_37 : f32 to vector<8x1xf32>
      %113 = arith.divf %111, %112 : vector<8x1xf32>
      %114 = vector.broadcast %106 : vector<8x1xf32> to vector<8x32xf32>
      %115 = arith.subf %102, %114 : vector<8x32xf32>
      %cst_38 = arith.constant 9.99999974E-6 : f32
      %116 = vector.broadcast %cst_38 : f32 to vector<8x1xf32>
      %117 = arith.addf %113, %116 : vector<8x1xf32>
      %118 = math.rsqrt %117 : vector<8x1xf32>
      %119 = vector.broadcast %118 : vector<8x1xf32> to vector<8x32xf32>
      %120 = arith.mulf %115, %119 : vector<8x32xf32>
      %121 = vector.broadcast %98 : vector<1x32xf32> to vector<8x32xf32>
      %122 = arith.mulf %120, %121 : vector<8x32xf32>
      %123 = vector.broadcast %101 : vector<1x32xf32> to vector<8x32xf32>
      %124 = arith.addf %122, %123 : vector<8x32xf32>
      %125 = arith.addf %124, %4 : vector<8x32xf32>
      %126 = arith.index_cast %arg35 : i32 to index
      %c0_39 = arith.constant 0 : index
      %c0_40 = arith.constant 0 : index
      %127 = vector.load %arg20[%126, %c0_39, %c0_40] : memref<2x32x96xbf16, #tpu.memory_space<vmem>>, vector<1x32x96xbf16>
      %128 = vector.shape_cast %127 : vector<1x32x96xbf16> to vector<32x96xbf16>
      %129 = arith.index_cast %arg35 : i32 to index
      %c0_41 = arith.constant 0 : index
      %c0_42 = arith.constant 0 : index
      %130 = vector.load %arg21[%129, %c0_41, %c0_42] : memref<2x1x96xf32, #tpu.memory_space<vmem>>, vector<1x1x96xf32>
      %131 = vector.shape_cast %130 : vector<1x1x96xf32> to vector<1x96xf32>
      %132 = arith.index_cast %arg35 : i32 to index
      %c0_43 = arith.constant 0 : index
      %c0_44 = arith.constant 0 : index
      %133 = vector.load %arg22[%132, %c0_43, %c0_44] : memref<2x32x32xbf16, #tpu.memory_space<vmem>>, vector<1x32x32xbf16>
      %134 = vector.shape_cast %133 : vector<1x32x32xbf16> to vector<32x32xbf16>
      %135 = arith.index_cast %arg35 : i32 to index
      %c0_45 = arith.constant 0 : index
      %c0_46 = arith.constant 0 : index
      %136 = vector.load %arg23[%135, %c0_45, %c0_46] : memref<2x1x32xf32, #tpu.memory_space<vmem>>, vector<1x1x32xf32>
      %137 = vector.shape_cast %136 : vector<1x1x32xf32> to vector<1x32xf32>
      %138 = arith.truncf %125 : vector<8x32xf32> to vector<8x32xbf16>
      %139 = arith.truncf %6 : vector<8x32xf32> to vector<8x32xbf16>
      %140 = arith.truncf %7 : vector<8x32xf32> to vector<8x32xbf16>
      %141 = vector.extract_strided_slice %128 {offsets = [0, 0], sizes = [32, 32], strides = [1, 1]} : vector<32x96xbf16> to vector<32x32xbf16>
      %cst_47 = arith.constant dense<0.000000e+00> : vector<8x32xf32>
      %142 = tpu.matmul %138, %141, %cst_47 {dimension_numbers = #tpu.dot_dimension_numbers<[1], [0], [0], [1], [0, 0, 1, 1], [], []>} : vector<8x32xbf16>, vector<32x32xbf16>, vector<8x32xf32> -> vector<8x32xf32>
      %143 = vector.extract_strided_slice %131 {offsets = [0, 0], sizes = [1, 32], strides = [1, 1]} : vector<1x96xf32> to vector<1x32xf32>
      %144 = vector.broadcast %143 : vector<1x32xf32> to vector<8x32xf32>
      %145 = arith.addf %142, %144 : vector<8x32xf32>
      %146 = vector.extract_strided_slice %128 {offsets = [0, 32], sizes = [32, 32], strides = [1, 1]} : vector<32x96xbf16> to vector<32x32xbf16>
      %cst_48 = arith.constant dense<0.000000e+00> : vector<8x32xf32>
      %147 = tpu.matmul %140, %146, %cst_48 {dimension_numbers = #tpu.dot_dimension_numbers<[1], [0], [0], [1], [0, 0, 1, 1], [], []>} : vector<8x32xbf16>, vector<32x32xbf16>, vector<8x32xf32> -> vector<8x32xf32>
      %148 = vector.extract_strided_slice %131 {offsets = [0, 32], sizes = [1, 32], strides = [1, 1]} : vector<1x96xf32> to vector<1x32xf32>
      %149 = vector.broadcast %148 : vector<1x32xf32> to vector<8x32xf32>
      %150 = arith.addf %147, %149 : vector<8x32xf32>
      %151 = vector.extract_strided_slice %128 {offsets = [0, 64], sizes = [32, 32], strides = [1, 1]} : vector<32x96xbf16> to vector<32x32xbf16>
      %cst_49 = arith.constant dense<0.000000e+00> : vector<8x32xf32>
      %152 = tpu.matmul %139, %151, %cst_49 {dimension_numbers = #tpu.dot_dimension_numbers<[1], [0], [0], [1], [0, 0, 1, 1], [], []>} : vector<8x32xbf16>, vector<32x32xbf16>, vector<8x32xf32> -> vector<8x32xf32>
      %153 = vector.extract_strided_slice %131 {offsets = [0, 64], sizes = [1, 32], strides = [1, 1]} : vector<1x96xf32> to vector<1x32xf32>
      %154 = vector.broadcast %153 : vector<1x32xf32> to vector<8x32xf32>
      %155 = arith.addf %152, %154 : vector<8x32xf32>
      %156 = vector.extract_strided_slice %145 {offsets = [0, 0], sizes = [8, 8], strides = [1, 1]} : vector<8x32xf32> to vector<8x8xf32>
      %157 = vector.extract_strided_slice %145 {offsets = [0, 8], sizes = [8, 8], strides = [1, 1]} : vector<8x32xf32> to vector<8x8xf32>
      %158 = vector.extract_strided_slice %145 {offsets = [0, 16], sizes = [8, 8], strides = [1, 1]} : vector<8x32xf32> to vector<8x8xf32>
      %159 = vector.extract_strided_slice %145 {offsets = [0, 24], sizes = [8, 8], strides = [1, 1]} : vector<8x32xf32> to vector<8x8xf32>
      %160 = vector.shape_cast %156 : vector<8x8xf32> to vector<1x8x8xf32>
      %161 = vector.shape_cast %157 : vector<8x8xf32> to vector<1x8x8xf32>
      %162 = vector.shape_cast %158 : vector<8x8xf32> to vector<1x8x8xf32>
      %163 = vector.shape_cast %159 : vector<8x8xf32> to vector<1x8x8xf32>
      %164 = tpu.concatenate %160, %161, %162, %163 in 0 : vector<1x8x8xf32>, vector<1x8x8xf32>, vector<1x8x8xf32>, vector<1x8x8xf32> -> vector<4x8x8xf32>
      %165 = arith.truncf %164 : vector<4x8x8xf32> to vector<4x8x8xbf16>
      %166 = vector.extract_strided_slice %150 {offsets = [0, 0], sizes = [8, 8], strides = [1, 1]} : vector<8x32xf32> to vector<8x8xf32>
      %167 = vector.extract_strided_slice %150 {offsets = [0, 8], sizes = [8, 8], strides = [1, 1]} : vector<8x32xf32> to vector<8x8xf32>
      %168 = vector.extract_strided_slice %150 {offsets = [0, 16], sizes = [8, 8], strides = [1, 1]} : vector<8x32xf32> to vector<8x8xf32>
      %169 = vector.extract_strided_slice %150 {offsets = [0, 24], sizes = [8, 8], strides = [1, 1]} : vector<8x32xf32> to vector<8x8xf32>
      %170 = vector.shape_cast %166 : vector<8x8xf32> to vector<1x8x8xf32>
      %171 = vector.shape_cast %167 : vector<8x8xf32> to vector<1x8x8xf32>
      %172 = vector.shape_cast %168 : vector<8x8xf32> to vector<1x8x8xf32>
      %173 = vector.shape_cast %169 : vector<8x8xf32> to vector<1x8x8xf32>
      %174 = tpu.concatenate %170, %171, %172, %173 in 0 : vector<1x8x8xf32>, vector<1x8x8xf32>, vector<1x8x8xf32>, vector<1x8x8xf32> -> vector<4x8x8xf32>
      %175 = arith.truncf %174 : vector<4x8x8xf32> to vector<4x8x8xbf16>
      %176 = vector.extract_strided_slice %155 {offsets = [0, 0], sizes = [8, 8], strides = [1, 1]} : vector<8x32xf32> to vector<8x8xf32>
      %177 = vector.extract_strided_slice %155 {offsets = [0, 8], sizes = [8, 8], strides = [1, 1]} : vector<8x32xf32> to vector<8x8xf32>
      %178 = vector.extract_strided_slice %155 {offsets = [0, 16], sizes = [8, 8], strides = [1, 1]} : vector<8x32xf32> to vector<8x8xf32>
      %179 = vector.extract_strided_slice %155 {offsets = [0, 24], sizes = [8, 8], strides = [1, 1]} : vector<8x32xf32> to vector<8x8xf32>
      %180 = vector.shape_cast %176 : vector<8x8xf32> to vector<1x8x8xf32>
      %181 = vector.shape_cast %177 : vector<8x8xf32> to vector<1x8x8xf32>
      %182 = vector.shape_cast %178 : vector<8x8xf32> to vector<1x8x8xf32>
      %183 = vector.shape_cast %179 : vector<8x8xf32> to vector<1x8x8xf32>
      %184 = tpu.concatenate %180, %181, %182, %183 in 0 : vector<1x8x8xf32>, vector<1x8x8xf32>, vector<1x8x8xf32>, vector<1x8x8xf32> -> vector<4x8x8xf32>
      %185 = arith.truncf %184 : vector<4x8x8xf32> to vector<4x8x8xbf16>
      %cst_50 = arith.constant dense<0.000000e+00> : vector<4x8x8xf32>
      %186 = tpu.matmul %165, %175, %cst_50 {dimension_numbers = #tpu.dot_dimension_numbers<[2], [2], [1], [1], [0, 0, 0, 1, 1, 1], [0], [0]>} : vector<4x8x8xbf16>, vector<4x8x8xbf16>, vector<4x8x8xf32> -> vector<4x8x8xf32>
      %cst_51 = arith.constant dense<0xFF800000> : vector<4x8xf32>
      %187 = vector.multi_reduction <maximumf>, %186, %cst_51 [2] : vector<4x8x8xf32> to vector<4x8xf32>
      %188 = vector.shape_cast %187 : vector<4x8xf32> to vector<4x8x1xf32>
      %189 = vector.broadcast %188 : vector<4x8x1xf32> to vector<4x8x8xf32>
      %190 = arith.subf %186, %189 : vector<4x8x8xf32>
      %191 = math.exp %190 : vector<4x8x8xf32>
      %cst_52 = arith.constant dense<0.000000e+00> : vector<4x8xf32>
      %192 = vector.multi_reduction <add>, %191, %cst_52 [2] : vector<4x8x8xf32> to vector<4x8xf32>
      %193 = vector.shape_cast %192 : vector<4x8xf32> to vector<4x8x1xf32>
      %194 = tpu.reciprocal %193 {approx = true} : vector<4x8x1xf32> -> vector<4x8x1xf32>
      %195 = vector.broadcast %194 : vector<4x8x1xf32> to vector<4x8x8xf32>
      %196 = arith.mulf %191, %195 : vector<4x8x8xf32>
      %197 = arith.truncf %196 : vector<4x8x8xf32> to vector<4x8x8xbf16>
      %cst_53 = arith.constant dense<0.000000e+00> : vector<4x8x8xf32>
      %198 = tpu.matmul %197, %185, %cst_53 {dimension_numbers = #tpu.dot_dimension_numbers<[2], [1], [1], [2], [0, 0, 0, 1, 1, 2], [0], [0]>} : vector<4x8x8xbf16>, vector<4x8x8xbf16>, vector<4x8x8xf32> -> vector<4x8x8xf32>
      %199 = vector.extract_strided_slice %198 {offsets = [0, 0, 0], sizes = [1, 8, 8], strides = [1, 1, 1]} : vector<4x8x8xf32> to vector<1x8x8xf32>
      %200 = vector.shape_cast %199 : vector<1x8x8xf32> to vector<8x8xf32>
      %201 = vector.extract_strided_slice %198 {offsets = [1, 0, 0], sizes = [1, 8, 8], strides = [1, 1, 1]} : vector<4x8x8xf32> to vector<1x8x8xf32>
      %202 = vector.shape_cast %201 : vector<1x8x8xf32> to vector<8x8xf32>
      %203 = vector.extract_strided_slice %198 {offsets = [2, 0, 0], sizes = [1, 8, 8], strides = [1, 1, 1]} : vector<4x8x8xf32> to vector<1x8x8xf32>
      %204 = vector.shape_cast %203 : vector<1x8x8xf32> to vector<8x8xf32>
      %205 = vector.extract_strided_slice %198 {offsets = [3, 0, 0], sizes = [1, 8, 8], strides = [1, 1, 1]} : vector<4x8x8xf32> to vector<1x8x8xf32>
      %206 = vector.shape_cast %205 : vector<1x8x8xf32> to vector<8x8xf32>
      %207 = tpu.concatenate %200, %202, %204, %206 in 1 : vector<8x8xf32>, vector<8x8xf32>, vector<8x8xf32>, vector<8x8xf32> -> vector<8x32xf32>
      %208 = arith.truncf %207 : vector<8x32xf32> to vector<8x32xbf16>
      %cst_54 = arith.constant dense<0.000000e+00> : vector<8x32xf32>
      %209 = tpu.matmul %208, %134, %cst_54 {dimension_numbers = #tpu.dot_dimension_numbers<[1], [0], [0], [1], [0, 0, 1, 1], [], []>} : vector<8x32xbf16>, vector<32x32xbf16>, vector<8x32xf32> -> vector<8x32xf32>
      %210 = vector.broadcast %137 : vector<1x32xf32> to vector<8x32xf32>
      %211 = arith.addf %209, %210 : vector<8x32xf32>
      %212 = arith.index_cast %arg35 : i32 to index
      %c0_55 = arith.constant 0 : index
      %c0_56 = arith.constant 0 : index
      %213 = vector.load %arg26[%212, %c0_55, %c0_56] : memref<2x1x32xf32, #tpu.memory_space<vmem>>, vector<1x1x32xf32>
      %214 = vector.shape_cast %213 : vector<1x1x32xf32> to vector<1x32xf32>
      %215 = arith.index_cast %arg35 : i32 to index
      %c0_57 = arith.constant 0 : index
      %c0_58 = arith.constant 0 : index
      %216 = vector.load %arg27[%215, %c0_57, %c0_58] : memref<2x1x32xf32, #tpu.memory_space<vmem>>, vector<1x1x32xf32>
      %217 = vector.shape_cast %216 : vector<1x1x32xf32> to vector<1x32xf32>
      %218 = arith.addf %124, %211 : vector<8x32xf32>
      %cst_59 = arith.constant dense<0.000000e+00> : vector<8xf32>
      %219 = vector.multi_reduction <add>, %218, %cst_59 [1] : vector<8x32xf32> to vector<8xf32>
      %220 = vector.shape_cast %219 : vector<8xf32> to vector<8x1xf32>
      %cst_60 = arith.constant 3.200000e+01 : f32
      %221 = vector.broadcast %cst_60 : f32 to vector<8x1xf32>
      %222 = arith.divf %220, %221 : vector<8x1xf32>
      %223 = vector.broadcast %222 : vector<8x1xf32> to vector<8x32xf32>
      %224 = arith.subf %218, %223 : vector<8x32xf32>
      %225 = arith.mulf %224, %224 : vector<8x32xf32>
      %cst_61 = arith.constant dense<0.000000e+00> : vector<8xf32>
      %226 = vector.multi_reduction <add>, %225, %cst_61 [1] : vector<8x32xf32> to vector<8xf32>
      %227 = vector.shape_cast %226 : vector<8xf32> to vector<8x1xf32>
      %cst_62 = arith.constant 3.200000e+01 : f32
      %228 = vector.broadcast %cst_62 : f32 to vector<8x1xf32>
      %229 = arith.divf %227, %228 : vector<8x1xf32>
      %230 = vector.broadcast %222 : vector<8x1xf32> to vector<8x32xf32>
      %231 = arith.subf %218, %230 : vector<8x32xf32>
      %cst_63 = arith.constant 9.99999974E-6 : f32
      %232 = vector.broadcast %cst_63 : f32 to vector<8x1xf32>
      %233 = arith.addf %229, %232 : vector<8x1xf32>
      %234 = math.rsqrt %233 : vector<8x1xf32>
      %235 = vector.broadcast %234 : vector<8x1xf32> to vector<8x32xf32>
      %236 = arith.mulf %231, %235 : vector<8x32xf32>
      %237 = vector.broadcast %214 : vector<1x32xf32> to vector<8x32xf32>
      %238 = arith.mulf %236, %237 : vector<8x32xf32>
      %239 = vector.broadcast %217 : vector<1x32xf32> to vector<8x32xf32>
      %240 = arith.addf %238, %239 : vector<8x32xf32>
      %241 = arith.index_cast %arg35 : i32 to index
      %c0_64 = arith.constant 0 : index
      %c0_65 = arith.constant 0 : index
      %242 = vector.load %arg30[%241, %c0_64, %c0_65] : memref<2x32x64xbf16, #tpu.memory_space<vmem>>, vector<1x32x64xbf16>
      %243 = vector.shape_cast %242 : vector<1x32x64xbf16> to vector<32x64xbf16>
      %244 = arith.index_cast %arg35 : i32 to index
      %c0_66 = arith.constant 0 : index
      %c0_67 = arith.constant 0 : index
      %245 = vector.load %arg31[%244, %c0_66, %c0_67] : memref<2x1x64xf32, #tpu.memory_space<vmem>>, vector<1x1x64xf32>
      %246 = vector.shape_cast %245 : vector<1x1x64xf32> to vector<1x64xf32>
      %247 = arith.index_cast %arg35 : i32 to index
      %c0_68 = arith.constant 0 : index
      %c0_69 = arith.constant 0 : index
      %248 = vector.load %arg32[%247, %c0_68, %c0_69] : memref<2x64x32xbf16, #tpu.memory_space<vmem>>, vector<1x64x32xbf16>
      %249 = vector.shape_cast %248 : vector<1x64x32xbf16> to vector<64x32xbf16>
      %250 = arith.index_cast %arg35 : i32 to index
      %c0_70 = arith.constant 0 : index
      %c0_71 = arith.constant 0 : index
      %251 = vector.load %arg33[%250, %c0_70, %c0_71] : memref<2x1x32xf32, #tpu.memory_space<vmem>>, vector<1x1x32xf32>
      %252 = vector.shape_cast %251 : vector<1x1x32xf32> to vector<1x32xf32>
      %253 = arith.truncf %240 : vector<8x32xf32> to vector<8x32xbf16>
      %cst_72 = arith.constant dense<0.000000e+00> : vector<8x64xf32>
      %254 = tpu.matmul %253, %243, %cst_72 {dimension_numbers = #tpu.dot_dimension_numbers<[1], [0], [0], [1], [0, 0, 1, 1], [], []>} : vector<8x32xbf16>, vector<32x64xbf16>, vector<8x64xf32> -> vector<8x64xf32>
      %255 = vector.broadcast %246 : vector<1x64xf32> to vector<8x64xf32>
      %256 = arith.addf %254, %255 : vector<8x64xf32>
      %cst_73 = arith.constant 0.000000e+00 : f32
      %257 = vector.broadcast %cst_73 : f32 to vector<8x64xf32>
      %258 = arith.maximumf %256, %257 : vector<8x64xf32>
      %259 = arith.truncf %258 : vector<8x64xf32> to vector<8x64xbf16>
      %cst_74 = arith.constant dense<0.000000e+00> : vector<8x32xf32>
      %260 = tpu.matmul %259, %249, %cst_74 {dimension_numbers = #tpu.dot_dimension_numbers<[1], [0], [0], [1], [0, 0, 1, 1], [], []>} : vector<8x64xbf16>, vector<64x32xbf16>, vector<8x32xf32> -> vector<8x32xf32>
      %261 = vector.broadcast %252 : vector<1x32xf32> to vector<8x32xf32>
      %262 = arith.addf %260, %261 : vector<8x32xf32>
      %263 = arith.index_cast %arg35 : i32 to index
      %c0_75 = arith.constant 0 : index
      %c0_76 = arith.constant 0 : index
      %264 = vector.load %arg28[%263, %c0_75, %c0_76] : memref<2x1x32xf32, #tpu.memory_space<vmem>>, vector<1x1x32xf32>
      %265 = vector.shape_cast %264 : vector<1x1x32xf32> to vector<1x32xf32>
      %266 = arith.index_cast %arg35 : i32 to index
      %c0_77 = arith.constant 0 : index
      %c0_78 = arith.constant 0 : index
      %267 = vector.load %arg29[%266, %c0_77, %c0_78] : memref<2x1x32xf32, #tpu.memory_space<vmem>>, vector<1x1x32xf32>
      %268 = vector.shape_cast %267 : vector<1x1x32xf32> to vector<1x32xf32>
      %269 = arith.addf %240, %262 : vector<8x32xf32>
      %cst_79 = arith.constant dense<0.000000e+00> : vector<8xf32>
      %270 = vector.multi_reduction <add>, %269, %cst_79 [1] : vector<8x32xf32> to vector<8xf32>
      %271 = vector.shape_cast %270 : vector<8xf32> to vector<8x1xf32>
      %cst_80 = arith.constant 3.200000e+01 : f32
      %272 = vector.broadcast %cst_80 : f32 to vector<8x1xf32>
      %273 = arith.divf %271, %272 : vector<8x1xf32>
      %274 = vector.broadcast %273 : vector<8x1xf32> to vector<8x32xf32>
      %275 = arith.subf %269, %274 : vector<8x32xf32>
      %276 = arith.mulf %275, %275 : vector<8x32xf32>
      %cst_81 = arith.constant dense<0.000000e+00> : vector<8xf32>
      %277 = vector.multi_reduction <add>, %276, %cst_81 [1] : vector<8x32xf32> to vector<8xf32>
      %278 = vector.shape_cast %277 : vector<8xf32> to vector<8x1xf32>
      %cst_82 = arith.constant 3.200000e+01 : f32
      %279 = vector.broadcast %cst_82 : f32 to vector<8x1xf32>
      %280 = arith.divf %278, %279 : vector<8x1xf32>
      %281 = vector.broadcast %273 : vector<8x1xf32> to vector<8x32xf32>
      %282 = arith.subf %269, %281 : vector<8x32xf32>
      %cst_83 = arith.constant 9.99999974E-6 : f32
      %283 = vector.broadcast %cst_83 : f32 to vector<8x1xf32>
      %284 = arith.addf %280, %283 : vector<8x1xf32>
      %285 = math.rsqrt %284 : vector<8x1xf32>
      %286 = vector.broadcast %285 : vector<8x1xf32> to vector<8x32xf32>
      %287 = arith.mulf %282, %286 : vector<8x32xf32>
      %288 = vector.broadcast %265 : vector<1x32xf32> to vector<8x32xf32>
      %289 = arith.mulf %287, %288 : vector<8x32xf32>
      %290 = vector.broadcast %268 : vector<1x32xf32> to vector<8x32xf32>
      %291 = arith.addf %289, %290 : vector<8x32xf32>
      scf.yield %291 : vector<8x32xf32>
    }
    %c2_i32_11 = arith.constant 2 : i32
    %11 = vector.shape_cast %10 : vector<8x32xf32> to vector<1x8x32xf32>
    %c0_12 = arith.constant 0 : index
    %c0_13 = arith.constant 0 : index
    %c0_14 = arith.constant 0 : index
    %12 = vector.load %arg34[%c0_12, %c0_13, %c0_14] : memref<1x8x32xf32, #tpu.memory_space<vmem>>, vector<1x8x32xf32>
    tpu.vector_store %arg34[%c0_12, %c0_13, %c0_14], %11 {strides = array<i32>} : memref<1x8x32xf32, #tpu.memory_space<vmem>>, vector<1x8x32xf32>,
    return
  }
  func.func @transform_0(%arg0: i32) -> (i32, i32, i32) {
    %c0_i32 = arith.constant 0 : i32
    %c0_i32_0 = arith.constant 0 : i32
    %c0_i32_1 = arith.constant 0 : i32
    return %arg0, %c0_i32, %c0_i32_0 : i32, i32, i32
  }
  func.func @transform_1(%arg0: i32) -> (i32, i32, i32) {
    %c0_i32 = arith.constant 0 : i32
    %c0_i32_0 = arith.constant 0 : i32
    %c0_i32_1 = arith.constant 0 : i32
    return %arg0, %c0_i32, %c0_i32_0 : i32, i32, i32
  }
  func.func @transform_2(%arg0: i32) -> (i32, i32) {
    %c0_i32 = arith.constant 0 : i32
    %c0_i32_0 = arith.constant 0 : i32
    %c0_i32_1 = arith.constant 0 : i32
    return %c0_i32, %c0_i32_0 : i32, i32
  }
  func.func @transform_3(%arg0: i32) -> (i32, i32, i32) {
    %c0_i32 = arith.constant 0 : i32
    %c0_i32_0 = arith.constant 0 : i32
    %c0_i32_1 = arith.constant 0 : i32
    %c0_i32_2 = arith.constant 0 : i32
    return %c0_i32, %c0_i32_0, %c0_i32_1 : i32, i32, i32
  }
  func.func @transform_4(%arg0: i32) -> (i32, i32, i32) {
    %c0_i32 = arith.constant 0 : i32
    %c0_i32_0 = arith.constant 0 : i32
    %c0_i32_1 = arith.constant 0 : i32
    %c0_i32_2 = arith.constant 0 : i32
    return %c0_i32, %c0_i32_0, %c0_i32_1 : i32, i32, i32
  }
  func.func @transform_5(%arg0: i32) -> (i32, i32, i32) {
    %c0_i32 = arith.constant 0 : i32
    %c0_i32_0 = arith.constant 0 : i32
    %c0_i32_1 = arith.constant 0 : i32
    %c0_i32_2 = arith.constant 0 : i32
    return %c0_i32, %c0_i32_0, %c0_i32_1 : i32, i32, i32
  }
  func.func @transform_6(%arg0: i32) -> (i32, i32, i32) {
    %c0_i32 = arith.constant 0 : i32
    %c0_i32_0 = arith.constant 0 : i32
    %c0_i32_1 = arith.constant 0 : i32
    %c0_i32_2 = arith.constant 0 : i32
    return %c0_i32, %c0_i32_0, %c0_i32_1 : i32, i32, i32
  }
  func.func @transform_7(%arg0: i32) -> (i32, i32, i32) {
    %c0_i32 = arith.constant 0 : i32
    %c0_i32_0 = arith.constant 0 : i32
    %c0_i32_1 = arith.constant 0 : i32
    %c0_i32_2 = arith.constant 0 : i32
    return %c0_i32, %c0_i32_0, %c0_i32_1 : i32, i32, i32
  }
  func.func @transform_8(%arg0: i32) -> (i32, i32, i32) {
    %c0_i32 = arith.constant 0 : i32
    %c0_i32_0 = arith.constant 0 : i32
    %c0_i32_1 = arith.constant 0 : i32
    %c0_i32_2 = arith.constant 0 : i32
    return %c0_i32, %c0_i32_0, %c0_i32_1 : i32, i32, i32
  }
  func.func @transform_9(%arg0: i32) -> (i32, i32, i32) {
    %c0_i32 = arith.constant 0 : i32
    %c0_i32_0 = arith.constant 0 : i32
    %c0_i32_1 = arith.constant 0 : i32
    %c0_i32_2 = arith.constant 0 : i32
    return %c0_i32, %c0_i32_0, %c0_i32_1 : i32, i32, i32
  }
  func.func @transform_10(%arg0: i32) -> (i32, i32, i32) {
    %c0_i32 = arith.constant 0 : i32
    %c0_i32_0 = arith.constant 0 : i32
    %c0_i32_1 = arith.constant 0 : i32
    %c0_i32_2 = arith.constant 0 : i32
    return %c0_i32, %c0_i32_0, %c0_i32_1 : i32, i32, i32
  }
  func.func @transform_11(%arg0: i32) -> (i32, i32, i32) {
    %c0_i32 = arith.constant 0 : i32
    %c0_i32_0 = arith.constant 0 : i32
    %c0_i32_1 = arith.constant 0 : i32
    %c0_i32_2 = arith.constant 0 : i32
    return %c0_i32, %c0_i32_0, %c0_i32_1 : i32, i32, i32
  }
  func.func @transform_12(%arg0: i32) -> (i32, i32, i32) {
    %c0_i32 = arith.constant 0 : i32
    %c0_i32_0 = arith.constant 0 : i32
    %c0_i32_1 = arith.constant 0 : i32
    %c0_i32_2 = arith.constant 0 : i32
    return %c0_i32, %c0_i32_0, %c0_i32_1 : i32, i32, i32
  }
  func.func @transform_13(%arg0: i32) -> (i32, i32, i32) {
    %c0_i32 = arith.constant 0 : i32
    %c0_i32_0 = arith.constant 0 : i32
    %c0_i32_1 = arith.constant 0 : i32
    %c0_i32_2 = arith.constant 0 : i32
    return %c0_i32, %c0_i32_0, %c0_i32_1 : i32, i32, i32
  }
  func.func @transform_14(%arg0: i32) -> (i32, i32, i32) {
    %c0_i32 = arith.constant 0 : i32
    %c0_i32_0 = arith.constant 0 : i32
    %c0_i32_1 = arith.constant 0 : i32
    %c0_i32_2 = arith.constant 0 : i32
    return %c0_i32, %c0_i32_0, %c0_i32_1 : i32, i32, i32
  }
  func.func @transform_15(%arg0: i32) -> (i32, i32, i32) {
    %c0_i32 = arith.constant 0 : i32
    %c0_i32_0 = arith.constant 0 : i32
    %c0_i32_1 = arith.constant 0 : i32
    %c0_i32_2 = arith.constant 0 : i32
    return %c0_i32, %c0_i32_0, %c0_i32_1 : i32, i32, i32
  }
  func.func @transform_16(%arg0: i32) -> (i32, i32, i32) {
    %c0_i32 = arith.constant 0 : i32
    %c0_i32_0 = arith.constant 0 : i32
    %c0_i32_1 = arith.constant 0 : i32
    %c0_i32_2 = arith.constant 0 : i32
    return %c0_i32, %c0_i32_0, %c0_i32_1 : i32, i32, i32
  }
  func.func @transform_17(%arg0: i32) -> (i32, i32, i32) {
    %c0_i32 = arith.constant 0 : i32
    %c0_i32_0 = arith.constant 0 : i32
    %c0_i32_1 = arith.constant 0 : i32
    %c0_i32_2 = arith.constant 0 : i32
    return %c0_i32, %c0_i32_0, %c0_i32_1 : i32, i32, i32
  }
  func.func @transform_18(%arg0: i32) -> (i32, i32, i32) {
    %c0_i32 = arith.constant 0 : i32
    %c0_i32_0 = arith.constant 0 : i32
    %c0_i32_1 = arith.constant 0 : i32
    %c0_i32_2 = arith.constant 0 : i32
    return %c0_i32, %c0_i32_0, %c0_i32_1 : i32, i32, i32
  }
  func.func @transform_19(%arg0: i32) -> (i32, i32, i32) {
    %c0_i32 = arith.constant 0 : i32
    %c0_i32_0 = arith.constant 0 : i32
    %c0_i32_1 = arith.constant 0 : i32
    %c0_i32_2 = arith.constant 0 : i32
    return %c0_i32, %c0_i32_0, %c0_i32_1 : i32, i32, i32
  }
  func.func @transform_20(%arg0: i32) -> (i32, i32, i32) {
    %c0_i32 = arith.constant 0 : i32
    %c0_i32_0 = arith.constant 0 : i32
    %c0_i32_1 = arith.constant 0 : i32
    %c0_i32_2 = arith.constant 0 : i32
    return %c0_i32, %c0_i32_0, %c0_i32_1 : i32, i32, i32
  }
  func.func @transform_21(%arg0: i32) -> (i32, i32, i32) {
    %c0_i32 = arith.constant 0 : i32
    %c0_i32_0 = arith.constant 0 : i32
    %c0_i32_1 = arith.constant 0 : i32
    %c0_i32_2 = arith.constant 0 : i32
    return %c0_i32, %c0_i32_0, %c0_i32_1 : i32, i32, i32
  }
  func.func @transform_22(%arg0: i32) -> (i32, i32, i32) {
    %c0_i32 = arith.constant 0 : i32
    %c0_i32_0 = arith.constant 0 : i32
    %c0_i32_1 = arith.constant 0 : i32
    %c0_i32_2 = arith.constant 0 : i32
    return %c0_i32, %c0_i32_0, %c0_i32_1 : i32, i32, i32
  }
  func.func @transform_23(%arg0: i32) -> (i32, i32, i32) {
    %c0_i32 = arith.constant 0 : i32
    %c0_i32_0 = arith.constant 0 : i32
    %c0_i32_1 = arith.constant 0 : i32
    %c0_i32_2 = arith.constant 0 : i32
    return %c0_i32, %c0_i32_0, %c0_i32_1 : i32, i32, i32
  }
  func.func @transform_24(%arg0: i32) -> (i32, i32, i32) {
    %c0_i32 = arith.constant 0 : i32
    %c0_i32_0 = arith.constant 0 : i32
    %c0_i32_1 = arith.constant 0 : i32
    %c0_i32_2 = arith.constant 0 : i32
    return %c0_i32, %c0_i32_0, %c0_i32_1 : i32, i32, i32
  }
  func.func @transform_25(%arg0: i32) -> (i32, i32, i32) {
    %c0_i32 = arith.constant 0 : i32
    %c0_i32_0 = arith.constant 0 : i32
    %c0_i32_1 = arith.constant 0 : i32
    %c0_i32_2 = arith.constant 0 : i32
    return %c0_i32, %c0_i32_0, %c0_i32_1 : i32, i32, i32
  }
  func.func @transform_26(%arg0: i32) -> (i32, i32, i32) {
    %c0_i32 = arith.constant 0 : i32
    %c0_i32_0 = arith.constant 0 : i32
    %c0_i32_1 = arith.constant 0 : i32
    %c0_i32_2 = arith.constant 0 : i32
    return %c0_i32, %c0_i32_0, %c0_i32_1 : i32, i32, i32
  }
  func.func @transform_27(%arg0: i32) -> (i32, i32, i32) {
    %c0_i32 = arith.constant 0 : i32
    %c0_i32_0 = arith.constant 0 : i32
    %c0_i32_1 = arith.constant 0 : i32
    %c0_i32_2 = arith.constant 0 : i32
    return %c0_i32, %c0_i32_0, %c0_i32_1 : i32, i32, i32
  }
  func.func @transform_28(%arg0: i32) -> (i32, i32, i32) {
    %c0_i32 = arith.constant 0 : i32
    %c0_i32_0 = arith.constant 0 : i32
    %c0_i32_1 = arith.constant 0 : i32
    %c0_i32_2 = arith.constant 0 : i32
    return %c0_i32, %c0_i32_0, %c0_i32_1 : i32, i32, i32
  }
  func.func @transform_29(%arg0: i32) -> (i32, i32, i32) {
    %c0_i32 = arith.constant 0 : i32
    %c0_i32_0 = arith.constant 0 : i32
    %c0_i32_1 = arith.constant 0 : i32
    %c0_i32_2 = arith.constant 0 : i32
    return %c0_i32, %c0_i32_0, %c0_i32_1 : i32, i32, i32
  }
  func.func @transform_30(%arg0: i32) -> (i32, i32, i32) {
    %c0_i32 = arith.constant 0 : i32
    %c0_i32_0 = arith.constant 0 : i32
    %c0_i32_1 = arith.constant 0 : i32
    %c0_i32_2 = arith.constant 0 : i32
    return %c0_i32, %c0_i32_0, %c0_i32_1 : i32, i32, i32
  }
  func.func @transform_31(%arg0: i32) -> (i32, i32, i32) {
    %c0_i32 = arith.constant 0 : i32
    %c0_i32_0 = arith.constant 0 : i32
    %c0_i32_1 = arith.constant 0 : i32
    %c0_i32_2 = arith.constant 0 : i32
    return %c0_i32, %c0_i32_0, %c0_i32_1 : i32, i32, i32
  }
  func.func @transform_32(%arg0: i32) -> (i32, i32, i32) {
    %c0_i32 = arith.constant 0 : i32
    %c0_i32_0 = arith.constant 0 : i32
    %c0_i32_1 = arith.constant 0 : i32
    %c0_i32_2 = arith.constant 0 : i32
    return %c0_i32, %c0_i32_0, %c0_i32_1 : i32, i32, i32
  }
  func.func @transform_33(%arg0: i32) -> (i32, i32, i32) {
    %c0_i32 = arith.constant 0 : i32
    %c0_i32_0 = arith.constant 0 : i32
    %c0_i32_1 = arith.constant 0 : i32
    return %arg0, %c0_i32, %c0_i32_0 : i32, i32, i32
  }
}

</mosaic_0001>

<bundles_post_ra>
// kernel: transformer_forward.1
= control target key start
LH: loop header
LB: loop body
LE: loop exit
PB: predicated region body
PF: predicated region fallthrough
CT: control target
= control target key end

     0   :  { %s4821_s6 = smov 1   ;;  %s4822_s10 = smov 2   ;;  %s5852_s0 = inlined_call_operand.smem [shape: u32[34], index: -1, kind: input, shape index: {}] }
   0x1   :  { %s4906_s5 = sld [smem:[%s5852_s0]]   ;;  %s4823_s14 = smov 3  }
   0x2   :  { %s4911_s9 = sld [smem:[%s5852_s0 + %s4821_s6]]   ;;  %s4824_s18 = smov 4  }
   0x3   :  { %s4916_s13 = sld [smem:[%s5852_s0 + %s4822_s10]]   ;;  %s4825_s22 = smov 5  }
   0x4   :  { %s4921_s17 = sld [smem:[%s5852_s0 + %s4823_s14]]   ;;  %s4826_s26 = smov 6  }
   0x5   :  { %s4926_s21 = sld [smem:[%s5852_s0 + %s4824_s18]]   ;;  %s4827_s30 = smov 7  }
   0x6   :  { %s4931_s25 = sld [smem:[%s5852_s0 + %s4825_s22]]   ;;  %s4828_s4 = smov 8  }
   0x7   :  { %5890 = sst [smem:[#allocation55_spill]] %s4906_s5  ;;  %s4829_s10 = smov 9  }
   0x8   :  { %5891 = sst [smem:[#allocation56_spill]] %s4911_s9  ;;  %s4830_s15 = smov 10  }
   0x9   :  { %5892 = sst [smem:[#allocation57_spill]] %s4916_s13  ;;  %s4831_s20 = smov 11  }
   0xa   :  { %5893 = sst [smem:[#allocation58_spill]] %s4921_s17  ;;  %s4833_s1 = smov 13  }
   0xb   :  { %5894 = sst [smem:[#allocation59_spill]] %s4926_s21  ;;  %s4834_s7 = smov 14  }
   0xc   :  { %5895 = sst [smem:[#allocation60_spill]] %s4931_s25  ;;  %s4836_s22 = smov 16  }
   0xd   :  { %s4936_s29 = sld [smem:[%s5852_s0 + %s4826_s26]]   ;;  %s4832_s26 = smov 12  }
   0xe   :  { %s4941_s3 = sld [smem:[%s5852_s0 + %s4827_s30]]   ;;  %s4837_s28 = smov 17  }
   0xf   :  { %s4946_s8 = sld [smem:[%s5852_s0 + %s4828_s4]]  }
  0x10   :  { %s4951_s14 = sld [smem:[%s5852_s0 + %s4829_s10]]  }
  0x11   :  { %s4956_s19 = sld [smem:[%s5852_s0 + %s4830_s15]]   ;;  %s4835_s15 = smov 15  }
  0x12   :  { %s4961_s24 = sld [smem:[%s5852_s0 + %s4831_s20]]  }
  0x13   :  { %s4966_s30 = sld [smem:[%s5852_s0 + %s4832_s26]]  }
  0x14   :  { %5896 = sst [smem:[#allocation61_spill]] %s4941_s3 }
  0x15   :  { %5897 = sst [smem:[#allocation62_spill]] %s4946_s8 }
  0x16   :  { %5898 = sst [smem:[#allocation63_spill]] %s4951_s14 }
  0x17   :  { %s4971_s6 = sld [smem:[%s5852_s0 + %s4833_s1]]  }
  0x18   :  { %5899 = sst [smem:[#allocation64_spill]] %s4961_s24 }
  0x19   :  { %s4976_s12 = sld [smem:[%s5852_s0 + %s4834_s7]]   ;;  %s4838_s7 = smov 18  }
  0x1a   :  { %s4981_s20 = sld [smem:[%s5852_s0 + %s4835_s15]]   ;;  %s4839_s15 = smov 19  }
  0x1b   :  { %s4986_s27 = sld [smem:[%s5852_s0 + %s4836_s22]]   ;;  %s4840_s22 = smov 20  }
  0x1c   :  { %s4991_s4 = sld [smem:[%s5852_s0 + %s4837_s28]]   ;;  %s4841_s28 = smov 21  }
  0x1d   :  { %5900 = sst [smem:[#allocation65_spill]] %s4971_s6 }
  0x1e   :  { %s4996_s24 = sld [smem:[%s5852_s0 + %s4838_s7]]   ;;  %s4842_s7 = smov 22  }
  0x1f   :  { %5901 = sst [smem:[#allocation66_spill]] %s4976_s12 }
  0x20   :  { %5902 = sst [smem:[#allocation67_spill]] %s4981_s20 }
  0x21   :  { %s5001_s20 = sld [smem:[%s5852_s0 + %s4839_s15]]   ;;  %s4843_s15 = smov 23  }
  0x22   :  { %5903 = sst [smem:[#allocation68_spill]] %s4991_s4 }
  0x23   :  { %s5006_s14 = sld [smem:[%s5852_s0 + %s4840_s22]]   ;;  %s4844_s22 = smov 24  }
  0x24   :  { %5904 = sst [smem:[#allocation69_spill]] %s4996_s24 }
  0x25   :  { %s5011_s4 = sld [smem:[%s5852_s0 + %s4841_s28]]   ;;  %s4845_s28 = smov 25  }
  0x26   :  { %s5016_s25 = sld [smem:[%s5852_s0 + %s4842_s7]]   ;;  %s4846_s7 = smov 26  }
  0x27   :  { %s5021_s17 = sld [smem:[%s5852_s0 + %s4843_s15]]   ;;  %s4847_s15 = smov 27  }
  0x28   :  { %s5026_s13 = sld [smem:[%s5852_s0 + %s4844_s22]]   ;;  %s4848_s22 = smov 28  }
  0x29   :  { %5905 = sst [smem:[#allocation70_spill]] %s5006_s14 }
  0x2a   :  { %s5031_s5 = sld [smem:[%s5852_s0 + %s4845_s28]]   ;;  %s4849_s28 = smov 29  }
  0x2b   :  { %5906 = sst [smem:[#allocation71_spill]] %s5011_s4 }
  0x2c   :  { %5907 = sst [smem:[#allocation72_spill]] %s5016_s25 }
  0x2d   :  { %s5036_s9 = sld [smem:[%s5852_s0 + %s4846_s7]]   ;;  %s4850_s7 = smov 30  }
  0x2e   :  { %5908 = sst [smem:[#allocation73_spill]] %s5026_s13 }
  0x2f   :  { %s5041_s25 = sld [smem:[%s5852_s0 + %s4847_s15]]   ;;  %s4851_s15 = smov 31  }
  0x30   :  { %5909 = sst [smem:[#allocation74_spill]] %s5031_s5 }
  0x31   :  { %s5046_s13 = sld [smem:[%s5852_s0 + %s4848_s22]]   ;;  %s4852_s22 = smov 32  }
  0x32   :  { %s5051_s14 = sld [smem:[%s5852_s0 + %s4849_s28]]   ;;  %s4853_s28 = smov 33  }
  0x33   :  { %5910 = sst [smem:[#allocation75_spill]] %s5036_s9 }
  0x34   :  { %s5056_s9 = sld [smem:[%s5852_s0 + %s4850_s7]]  }
  0x35   :  { %s5061_s24 = sld [smem:[%s5852_s0 + %s4851_s15]]  }
  0x36   :  { %s5071_s12 = sld [smem:[%s5852_s0 + %s4853_s28]]  }
  0x37   :  { %5911 = sst [smem:[#allocation76_spill]] %s5046_s13 }
  0x38   :  { %s5066_s13 = sld [smem:[%s5852_s0 + %s4852_s22]]  }
  0x3b   :  { %5912 = sst [smem:[#allocation77_spill]] %s5061_s24 }
  0x3c   :  { %5913 = sst [smem:[#allocation78_spill]] %s5071_s12 }
  0x3d   :  { %72 = vsyncpa [#allocation3], 0 }
  0x3e   :  { %74 = vsyncpa [#allocation3 + $0x1], 0 }
  0x3f   :  { %75 = vsyncpa [#allocation6], 0 }
  0x40   :  { %76 = vsyncpa [#allocation9], 0 }
  0x41   :  { %77 = vsyncpa [#allocation12], 0 }
  0x42   :  { %78 = vsyncpa [#allocation15], 0 }
  0x43   :  { %79 = vsyncpa [#allocation18], 0 }
  0x44   :  { %80 = vsyncpa [#allocation21], 0 }
  0x45   :  { %81 = vsyncpa [#allocation24], 0 }
  0x46   :  { %82 = vsyncpa [#allocation27], 0 }
  0x47   :  { %83 = vsyncpa [#allocation30], 0 }
  0x48   :  { %84 = vsyncpa [#allocation33], 0 }
  0x49   :  { %85 = vsyncpa [#allocation36], 0 }
  0x4a   :  { %86 = vsyncpa [#allocation39], 0 }
  0x4b   :  { %87 = vsyncpa [#allocation4], 0 }
  0x4c   :  { %89 = vsyncpa [#allocation4 + $0x1], 0  ;;  %s5073_s7 = smov 0   ;;  %s5075_s0 = smov 0  }
  0x4d   :  { %s5077_s10 = smov 0   ;;  %s5079_s11 = smov 0  }
  0x4e LB: > { %s5914_s8 = sld [smem:[#allocation62_spill]]  ;;  %s5094_s15 = sadd.s32 4294967295, %s4803_s11   ;;  %s4795_s0 = sphi %s5075_s0, %s5995_s0   ;;  %s4791_s7 = sphi %s5073_s7, %s5993_s7   ;;  %s4803_s11 = sphi %s5079_s11, %s5992_s11   ;;  %s4799_s10 = sphi %s5077_s10, %s5996_s10  }
  0x4f   : > { %s5915_s6 = sld [smem:[#allocation65_spill]]  ;;  %s3385_s16 = sadd.s32 4294967294, %s4803_s11  }
  0x50   : > { %s5916_s5 = sld [smem:[#allocation74_spill]]  ;;  %s5098_s18 = sadd.s32 1, %s4803_s11  }
  0x51   : > { %s5917_s4 = sld [smem:[#allocation71_spill]]  ;;  %s128_s22 = sadd.s32 1, %s4799_s10 }
  0x52   : > { %s5918_s3 = sld [smem:[#allocation61_spill]]  ;;  %s125_s23 = ssub.s32 %s4803_s11, %s5098_s18 }
  0x53   : > { %s5919_s21 = sld [smem:[#allocation59_spill]]  ;;  %p135_p0 = scmp.ne.s32.totalorder %s4799_s10, %s4795_s0 }
  0x54   : > { %5920 = sst [smem:[#allocation79_spill]] %s4791_s7  ;;  %p126_p1 = scmp.eq.s32.totalorder %s125_s23, 0 }
  0x55   : > { %5921 = sst [smem:[#allocation80_spill]] %s4795_s0  ;;  %p136_p2 = scmp.eq.s32.totalorder %s4803_s11, 0 }
  0x56   : > { %5922 = sst [smem:[#allocation81_spill]] %s5098_s18  ;;  %p141_p3 = scmp.ne.s32.totalorder %s4795_s0, %s4791_s7 }
  0x57   : > { %p5886_p4 = scmp.eq.s32.totalorder %s5094_s15, 0  ;;  %p5112_p5 = por %p136_p2, %p135_p0 }
  0x58   : > { %s5110_s26 = scalar_select %p126_p1, %s4799_s10, %s128_s22  }
  0x59   : > { %p5118_p6 = por %p5886_p4, %p141_p3  ;;  %p816_p7 = scmp.eq.s32.totalorder %s5094_s15, 1 }
  0x5a   : > { %5923 = sst [smem:[#allocation82_spill]] %s5110_s26  ;;  %p822_p8 = scmp.eq.s32.totalorder %s3385_s16, 1 }
  0x5b   : > { %s5925_s1 = scalar_select %p5118_p6, 1, 0 }
  0x5c   : > { %p3386_p9 = scmp.ge.s32.totalorder %s4803_s11, 1  ;;  %p829_p10 = scmp.lt.s32.totalorder %s4803_s11, 3 }
  0x5d   : > { %5926 = sst [smem:[#allocation83_spill]] %s5925_s1  ;;  %p5125_p11 = por %p816_p7, %p135_p0 }
  0x5e   : > { %p5129_p12 = por %p822_p8, %p141_p3  ;;  %p5133_p13 = pnand %p3386_p9, %p829_p10 }
  0x5f   : > { %s5927_s2 = scalar_select %p5125_p11, 1, 0 }
  0x60   : > { %s5929_s22 = scalar_select %p5129_p12, 1, 0 }
  0x61   : > { %5928 = sst [smem:[#allocation84_spill]] %s5927_s2  ;;  %833 = sbr.rel (%p5133_p13) target bundleno = 402 (0x192), region = 12 }
  0x62   : > { %5930 = sst [smem:[#allocation85_spill]] %s5929_s22  ;;  %s846_s16 = sshll.u32 (!%p5133_p13), %s5919_s21, 4  ;;  %s847_s16 = int_to_ptr.hbm [resolvable:$true] %s846_s16 }
  0x63   : > { %s4854_s26 = smov (!%p5133_p13), [#allocation5]   ;;  %s3999_s7 = sshra.s32 (!%p5133_p13), %s847_s16, 4  ;;  %s4000_s7 = int_to_ptr.hbm [resolvable:$true] %s3999_s7 }
  0x64   : > { %s848_s18 = sshll.u32 (!%p5133_p13), %s4854_s26, 4  ;;  %s4001_s2 = scalar_lea.hbm (!%p5133_p13), %s4000_s7, 2  ;;  %s849_s18 = int_to_ptr.vmem [resolvable:$true] %s848_s18 }
  0x65   : > { %p4002_p0 = scmp.ne.s32.totalorder (!%p5133_p13), %s4000_s7, %s4001_s2  ;;  %s4005_s22 = scalar_lea.hbm (!%p5133_p13), %s5919_s21, 2 }
  0x66   : > { %p4006_p3 = scmp.lt.s32.totalorder %s4000_s7, %s5919_s21  ;;  %p4007_p7 = scmp.lt.s32.totalorder %s4005_s22, %s4001_s2 }
  0x67   : > { %p4003_p1 = pnand %p4002_p0, %p5886_p4 }
  0x68   : > { %p4008_p8 = por %p4007_p7, %p4006_p3 }
  0x69   : > { %p4004_p2 = pneg %p4003_p1 }
  0x6b   : > { %p4009_p9 = pnand %p4008_p8, %p4004_p2 }
  0x6d   : > { %4012 = shalt.err (!%p4009_p9)
}
  0x6e   : > { %s5873_s12 = smov 16   ;;  %s5876_s26 = smov 1  }
  0x6f   : > { %3627 = dma.hbm_to_vmem [thread:$0]  (%p5886_p4), %s847_s16, 32, %s849_s18, [#allocation6], %s5873_s12, %s5873_s12, %s5876_s26  }
  0x70   : > { %s877_s24 = sshll.u32 %s5918_s3, 4  ;;  %s4857_s7 = smov [#allocation8]   ;;  %s878_s24 = int_to_ptr.hbm [resolvable:$true] %s877_s24 }
  0x71   : > { %s879_s2 = sshll.u32 %s4857_s7, 4  ;;  %s908_s22 = sshll.u32 %s4956_s19, 4  ;;  %s880_s2 = int_to_ptr.vmem [resolvable:$true] %s879_s2  ;;  %s909_s22 = int_to_ptr.hbm [resolvable:$true] %s908_s22 }
  0x72   : > { %s4027_s21 = sshra.s32 %s878_s24, 4  ;;  %s4033_s0 = scalar_lea.hbm %s5918_s3, 2  ;;  %s4028_s21 = int_to_ptr.hbm [resolvable:$true] %s4027_s21 }
  0x73   : > { %s4029_s1 = scalar_lea.hbm %s4028_s21, 2  ;;  %p4034_p2 = scmp.lt.s32.totalorder %s4028_s21, %s5918_s3 }
  0x74   : > { %p4030_p10 = scmp.ne.s32.totalorder %s4028_s21, %s4029_s1  ;;  %p4035_p3 = scmp.lt.s32.totalorder %s4033_s0, %s4029_s1 }
  0x76   : > { %p4031_p0 = pnand %p4030_p10, %p5886_p4  ;;  %p4036_p7 = por %p4035_p3, %p4034_p2 }
  0x78   : > { %p4032_p1 = pneg %p4031_p0 }
  0x7a   : > { %p4037_p8 = pnand %p4036_p7, %p4032_p1 }
  0x7c   : > { %4040 = shalt.err (!%p4037_p8)
}
  0x7d   : > { %3631 = dma.hbm_to_vmem [thread:$0]  (%p5886_p4), %s878_s24, 32, %s880_s2, [#allocation9], %s5873_s12, %s5873_s12, %s5876_s26  }
  0x7e   : > { %s4858_s18 = smov [#allocation11]   ;;  %s939_s7 = sshll.u32 %s5915_s6, 4  ;;  %s5161_s7 = int_to_ptr.hbm [resolvable:$true] %s939_s7 }
  0x7f   : > { %s910_s16 = sshll.u32 %s4858_s18, 4  ;;  %s4055_s21 = sshra.s32 %s909_s22, 4  ;;  %s911_s16 = int_to_ptr.vmem [resolvable:$true] %s910_s16  ;;  %s4056_s21 = int_to_ptr.hbm [resolvable:$true] %s4055_s21 }
  0x80   : > { %s4057_s0 = scalar_lea.hbm %s4056_s21, 2  ;;  %s4061_s1 = scalar_lea.hbm %s4956_s19, 2 }
  0x81   : > { %p4058_p9 = scmp.ne.s32.totalorder %s4056_s21, %s4057_s0  ;;  %p4062_p1 = scmp.lt.s32.totalorder %s4056_s21, %s4956_s19 }
  0x82   : > { %p4063_p2 = scmp.lt.s32.totalorder %s4061_s1, %s4057_s0 }
  0x83   : > { %p4059_p10 = pnand %p4058_p9, %p5886_p4 }
  0x84   : > { %p4064_p3 = por %p4063_p2, %p4062_p1 }
  0x85   : > { %p4060_p0 = pneg %p4059_p10 }
  0x87   : > { %p4065_p7 = pnand %p4064_p3, %p4060_p0 }
  0x89   : > { %4068 = shalt.err (!%p4065_p7)
}
  0x8a   : > { %3635 = dma.hbm_to_vmem [thread:$0]  (%p5886_p4), %s909_s22, 32, %s911_s16, [#allocation12], %s5873_s12, %s5873_s12, %s5876_s26  }
  0x8b   : > { %s970_s24 = sshll.u32 %s4986_s27, 4  ;;  %s4859_s2 = smov [#allocation14]   ;;  %s5173_s24 = int_to_ptr.hbm [resolvable:$true] %s970_s24 }
  0x8c   : > { %s941_s18 = sshll.u32 %s4859_s2, 4  ;;  %s4083_s21 = sshra.s32 %s5161_s7, 4  ;;  %s942_s18 = int_to_ptr.vmem [resolvable:$true] %s941_s18  ;;  %s4084_s21 = int_to_ptr.hbm [resolvable:$true] %s4083_s21 }
  0x8d   : > { %s4085_s0 = scalar_lea.hbm %s4084_s21, 2  ;;  %s4089_s1 = scalar_lea.hbm %s5915_s6, 2 }
  0x8e   : > { %p4086_p8 = scmp.ne.s32.totalorder %s4084_s21, %s4085_s0  ;;  %p4090_p0 = scmp.lt.s32.totalorder %s4084_s21, %s5915_s6 }
  0x8f   : > { %p4091_p1 = scmp.lt.s32.totalorder %s4089_s1, %s4085_s0 }
  0x90   : > { %p4087_p9 = pnand %p4086_p8, %p5886_p4 }
  0x91   : > { %p4092_p2 = por %p4091_p1, %p4090_p0 }
  0x92   : > { %p4088_p10 = pneg %p4087_p9 }
  0x94   : > { %p4093_p3 = pnand %p4092_p2, %p4088_p10 }
  0x96   : > { %4096 = shalt.err (!%p4093_p3)
}
  0x97   : > { %3639 = dma.hbm_to_vmem [thread:$0]  (%p5886_p4), %s5161_s7, 32, %s942_s18, [#allocation15], %s5873_s12, %s5873_s12, %s5876_s26  }
  0x98   : > { %s4860_s22 = smov [#allocation17]   ;;  %s1001_s2 = sshll.u32 %s5001_s20, 4  ;;  %s5187_s2 = int_to_ptr.hbm [resolvable:$true] %s1001_s2 }
  0x99   : > { %s972_s16 = sshll.u32 %s4860_s22, 4  ;;  %s4111_s21 = sshra.s32 %s5173_s24, 4  ;;  %s973_s16 = int_to_ptr.vmem [resolvable:$true] %s972_s16  ;;  %s4112_s21 = int_to_ptr.hbm [resolvable:$true] %s4111_s21 }
  0x9a   : > { %s4113_s0 = scalar_lea.hbm %s4112_s21, 2  ;;  %s4117_s1 = scalar_lea.hbm %s4986_s27, 2 }
  0x9b   : > { %p4114_p7 = scmp.ne.s32.totalorder %s4112_s21, %s4113_s0  ;;  %p4118_p10 = scmp.lt.s32.totalorder %s4112_s21, %s4986_s27 }
  0x9c   : > { %p4119_p0 = scmp.lt.s32.totalorder %s4117_s1, %s4113_s0 }
  0x9d   : > { %p4115_p8 = pnand %p4114_p7, %p5886_p4 }
  0x9e   : > { %p4120_p1 = por %p4119_p0, %p4118_p10 }
  0x9f   : > { %p4116_p9 = pneg %p4115_p8 }
  0xa1   : > { %p4121_p2 = pnand %p4120_p1, %p4116_p9 }
  0xa3   : > { %4124 = shalt.err (!%p4121_p2)
}
  0xa4   : > { %3643 = dma.hbm_to_vmem [thread:$0]  (%p5886_p4), %s5173_s24, 32, %s973_s16, [#allocation18], %s5873_s12, %s5873_s12, %s5876_s26  }
  0xa5   : > { %s4861_s7 = smov [#allocation20]   ;;  %s1029_s22 = sshll.u32 %s5917_s4, 4  ;;  %s1030_s22 = int_to_ptr.hbm [resolvable:$true] %s1029_s22 }
  0xa6   : > { %s1003_s18 = sshll.u32 %s4861_s7, 4  ;;  %s4139_s21 = sshra.s32 %s5187_s2, 4  ;;  %s1004_s18 = int_to_ptr.vmem [resolvable:$true] %s1003_s18  ;;  %s4140_s21 = int_to_ptr.hbm [resolvable:$true] %s4139_s21 }
  0xa7   : > { %s4141_s0 = scalar_lea.hbm %s4140_s21, 32  ;;  %s4145_s1 = scalar_lea.hbm %s5001_s20, 32 }
  0xa8   : > { %p4142_p3 = scmp.ne.s32.totalorder %s4140_s21, %s4141_s0  ;;  %p4146_p9 = scmp.lt.s32.totalorder %s4140_s21, %s5001_s20 }
  0xa9   : > { %p4147_p10 = scmp.lt.s32.totalorder %s4145_s1, %s4141_s0 }
  0xaa   : > { %p4143_p7 = pnand %p4142_p3, %p5886_p4 }
  0xab   : > { %p4148_p0 = por %p4147_p10, %p4146_p9 }
  0xac   : > { %p4144_p8 = pneg %p4143_p7 }
  0xae   : > { %p4149_p1 = pnand %p4148_p0, %p4144_p8 }
  0xb0   : > { %4152 = shalt.err (!%p4149_p1)
}
  0xb1   : > { %s5875_s3 = smov 64   ;;  %s4863_s24 = smov 4  }
  0xb2   : > { %3647 = dma.hbm_to_vmem [thread:$0]  (%p5886_p4), %s5187_s2, 512, %s1004_s18, [#allocation21], %s5875_s3, %s5875_s3, %s4863_s24  }
  0xb3   : > { %s4864_s16 = smov [#allocation23]   ;;  %s1057_s21 = sshll.u32 %s5021_s17, 4  ;;  %s5213_s21 = int_to_ptr.hbm [resolvable:$true] %s1057_s21 }
  0xb4   : > { %s1031_s7 = sshll.u32 %s4864_s16, 4  ;;  %s4167_s0 = sshra.s32 %s1030_s22, 4  ;;  %s1032_s7 = int_to_ptr.vmem [resolvable:$true] %s1031_s7  ;;  %s4168_s0 = int_to_ptr.hbm [resolvable:$true] %s4167_s0 }
  0xb5   : > { %s4169_s1 = scalar_lea.hbm %s4168_s0, 32  ;;  %s4173_s12 = scalar_lea.hbm %s5917_s4, 32 }
  0xb6   : > { %p4170_p2 = scmp.ne.s32.totalorder %s4168_s0, %s4169_s1  ;;  %p4174_p8 = scmp.lt.s32.totalorder %s4168_s0, %s5917_s4 }
  0xb7   : > { %p4175_p9 = scmp.lt.s32.totalorder %s4173_s12, %s4169_s1 }
  0xb8   : > { %p4171_p3 = pnand %p4170_p2, %p5886_p4 }
  0xb9   : > { %p4176_p10 = por %p4175_p9, %p4174_p8 }
  0xba   : > { %p4172_p7 = pneg %p4171_p3 }
  0xbc   : > { %p4177_p0 = pnand %p4176_p10, %p4172_p7 }
  0xbe   : > { %4180 = shalt.err (!%p4177_p0)
}
  0xbf   : > { %3651 = dma.hbm_to_vmem [thread:$0]  (%p5886_p4), %s1030_s22, 512, %s1032_s7, [#allocation24], %s5875_s3, %s5875_s3, %s4863_s24  }
  0xc0   : > { %s1085_s2 = sshll.u32 %s5916_s5, 4  ;;  %s4865_s18 = smov [#allocation26]   ;;  %s5225_s2 = int_to_ptr.hbm [resolvable:$true] %s1085_s2 }
  0xc1   : > { %s1059_s16 = sshll.u32 %s4865_s18, 4  ;;  %s4195_s12 = sshra.s32 %s5213_s21, 4  ;;  %s1060_s16 = int_to_ptr.vmem [resolvable:$true] %s1059_s16  ;;  %s4196_s12 = int_to_ptr.hbm [resolvable:$true] %s4195_s12 }
  0xc2   : > { %s4197_s0 = scalar_lea.hbm %s4196_s12, 2  ;;  %s4201_s1 = scalar_lea.hbm %s5021_s17, 2 }
  0xc3   : > { %p4198_p1 = scmp.ne.s32.totalorder %s4196_s12, %s4197_s0  ;;  %p4202_p7 = scmp.lt.s32.totalorder %s4196_s12, %s5021_s17 }
  0xc4   : > { %p4203_p8 = scmp.lt.s32.totalorder %s4201_s1, %s4197_s0 }
  0xc5   : > { %p4199_p2 = pnand %p4198_p1, %p5886_p4 }
  0xc6   : > { %p4204_p9 = por %p4203_p8, %p4202_p7 }
  0xc7   : > { %p4200_p3 = pneg %p4199_p2 }
  0xc9   : > { %p4205_p10 = pnand %p4204_p9, %p4200_p3 }
  0xcb   : > { %4208 = shalt.err (!%p4205_p10)
}
  0xcc   : > { %s5932_s22 = smov 16   ;;  %s4866_s7 = smov [#allocation29]  }
  0xcd   : > { %3655 = dma.hbm_to_vmem [thread:$0]  (%p5886_p4), %s5213_s21, 32, %s1060_s16, [#allocation27], %s5932_s22, %s5932_s22, %s5876_s26  }
  0xce   : > { %s1087_s18 = sshll.u32 %s4866_s7, 4  ;;  %s1113_s3 = sshll.u32 %s5041_s25, 4  ;;  %s1088_s18 = int_to_ptr.vmem [resolvable:$true] %s1087_s18  ;;  %s5239_s3 = int_to_ptr.hbm [resolvable:$true] %s1113_s3 }
  0xcf   : > { %s4223_s12 = sshra.s32 %s5225_s2, 4  ;;  %s4229_s1 = scalar_lea.hbm %s5916_s5, 2  ;;  %s4224_s12 = int_to_ptr.hbm [resolvable:$true] %s4223_s12 }
  0xd0   : > { %s4225_s0 = scalar_lea.hbm %s4224_s12, 2  ;;  %p4230_p3 = scmp.lt.s32.totalorder %s4224_s12, %s5916_s5 }
  0xd1   : > { %p4226_p0 = scmp.ne.s32.totalorder %s4224_s12, %s4225_s0  ;;  %p4231_p7 = scmp.lt.s32.totalorder %s4229_s1, %s4225_s0 }
  0xd3   : > { %p4227_p1 = pnand %p4226_p0, %p5886_p4  ;;  %p4232_p8 = por %p4231_p7, %p4230_p3 }
  0xd5   : > { %p4228_p2 = pneg %p4227_p1 }
  0xd7   : > { %p4233_p9 = pnand %p4232_p8, %p4228_p2 }
  0xd9   : > { %4236 = shalt.err (!%p4233_p9)
}
  0xda   : > { %3659 = dma.hbm_to_vmem [thread:$0]  (%p5886_p4), %s5225_s2, 32, %s1088_s18, [#allocation30], %s5932_s22, %s5932_s22, %s5876_s26  }
  0xdb   : > { %s1141_s21 = sshll.u32 %s5051_s14, 4  ;;  %s4867_s16 = smov [#allocation32]   ;;  %s5253_s21 = int_to_ptr.hbm [resolvable:$true] %s1141_s21 }
  0xdc   : > { %s1115_s7 = sshll.u32 %s4867_s16, 4  ;;  %s4251_s12 = sshra.s32 %s5239_s3, 4  ;;  %s1116_s7 = int_to_ptr.vmem [resolvable:$true] %s1115_s7  ;;  %s4252_s12 = int_to_ptr.hbm [resolvable:$true] %s4251_s12 }
  0xdd   : > { %s4253_s0 = scalar_lea.hbm %s4252_s12, 2  ;;  %s4257_s1 = scalar_lea.hbm %s5041_s25, 2 }
  0xde   : > { %p4254_p10 = scmp.ne.s32.totalorder %s4252_s12, %s4253_s0  ;;  %p4258_p2 = scmp.lt.s32.totalorder %s4252_s12, %s5041_s25 }
  0xdf   : > { %p4259_p3 = scmp.lt.s32.totalorder %s4257_s1, %s4253_s0 }
  0xe0   : > { %p4255_p0 = pnand %p4254_p10, %p5886_p4 }
  0xe1   : > { %p4260_p7 = por %p4259_p3, %p4258_p2 }
  0xe2   : > { %p4256_p1 = pneg %p4255_p0 }
  0xe4   : > { %p4261_p8 = pnand %p4260_p7, %p4256_p1 }
  0xe6   : > { %4264 = shalt.err (!%p4261_p8)
}
  0xe7   : > { %3663 = dma.hbm_to_vmem [thread:$0]  (%p5886_p4), %s5239_s3, 32, %s1116_s7, [#allocation33], %s5932_s22, %s5932_s22, %s5876_s26  }
  0xe8   : > { %s4868_s2 = smov [#allocation35]   ;;  %s863_s16 = sshll.u32 %s4936_s29, 4  ;;  %s5267_s16 = int_to_ptr.hbm [resolvable:$true] %s863_s16 }
  0xe9   : > { %s1143_s18 = sshll.u32 %s4868_s2, 4  ;;  %s4279_s12 = sshra.s32 %s5253_s21, 4  ;;  %s1144_s18 = int_to_ptr.vmem [resolvable:$true] %s1143_s18  ;;  %s4280_s12 = int_to_ptr.hbm [resolvable:$true] %s4279_s12 }
  0xea   : > { %s4281_s0 = scalar_lea.hbm %s4280_s12, 32  ;;  %s4285_s1 = scalar_lea.hbm %s5051_s14, 32 }
  0xeb   : > { %p4282_p9 = scmp.ne.s32.totalorder %s4280_s12, %s4281_s0  ;;  %p4286_p1 = scmp.lt.s32.totalorder %s4280_s12, %s5051_s14 }
  0xec   : > { %p4287_p2 = scmp.lt.s32.totalorder %s4285_s1, %s4281_s0 }
  0xed   : > { %p4283_p10 = pnand %p4282_p9, %p5886_p4 }
  0xee   : > { %p4288_p3 = por %p4287_p2, %p4286_p1 }
  0xef   : > { %p4284_p0 = pneg %p4283_p10 }
  0xf1   : > { %p4289_p7 = pnand %p4288_p3, %p4284_p0 }
  0xf3   : > { %4292 = shalt.err (!%p4289_p7)
}
  0xf4   : > { %s5933_s3 = smov 64   ;;  %s891_s7 = sshll.u32 %s5914_s8, 4  ;;  %s5281_s7 = int_to_ptr.hbm [resolvable:$true] %s891_s7 }
  0xf5   : > { %3667 = dma.hbm_to_vmem [thread:$0]  (%p5886_p4), %s5253_s21, 512, %s1144_s18, [#allocation36], %s5933_s3, %s5933_s3, %s4863_s24  }
  0xf6   : > { %s4869_s2 = smov [#allocation7]   ;;  %s4307_s12 = sshra.s32 %s5267_s16, 4  ;;  %s4308_s12 = int_to_ptr.hbm [resolvable:$true] %s4307_s12 }
  0xf7   : > { %s865_s26 = sshll.u32 %s4869_s2, 4  ;;  %s4309_s0 = scalar_lea.hbm %s4308_s12, 2  ;;  %s866_s26 = int_to_ptr.vmem [resolvable:$true] %s865_s26 }
  0xf8   : > { %p4310_p8 = scmp.ne.s32.totalorder %s4308_s12, %s4309_s0  ;;  %s4313_s1 = scalar_lea.hbm %s4936_s29, 2 }
  0xf9   : > { %p4314_p0 = scmp.lt.s32.totalorder %s4308_s12, %s4936_s29  ;;  %p4315_p1 = scmp.lt.s32.totalorder %s4313_s1, %s4309_s0 }
  0xfa   : > { %p4311_p9 = pnand %p4310_p8, %p5886_p4 }
  0xfb   : > { %p4316_p2 = por %p4315_p1, %p4314_p0 }
  0xfc   : > { %p4312_p10 = pneg %p4311_p9 }
  0xfe   : > { %p4317_p3 = pnand %p4316_p2, %p4312_p10 }
 0x100   : > { %4320 = shalt.err (!%p4317_p3)
}
 0x101   : > { %s5934_s24 = smov 1   ;;  %s4870_s21 = smov [#allocation10]  }
 0x102   : > { %3629 = dma.hbm_to_vmem [thread:$0]  (%p5886_p4), %s5267_s16, 32, %s866_s26, [#allocation6], %s5932_s22, %s5932_s22, %s5934_s24  }
 0x103   : > { %s893_s18 = sshll.u32 %s4870_s21, 4  ;;  %s925_s3 = sshll.u32 %s4966_s30, 4  ;;  %s894_s18 = int_to_ptr.vmem [resolvable:$true] %s893_s18  ;;  %s5295_s3 = int_to_ptr.hbm [resolvable:$true] %s925_s3 }
 0x104   : > { %s4335_s2 = sshra.s32 %s5281_s7, 4  ;;  %s4341_s0 = scalar_lea.hbm %s5914_s8, 2  ;;  %s4336_s2 = int_to_ptr.hbm [resolvable:$true] %s4335_s2 }
 0x105   : > { %s4337_s12 = scalar_lea.hbm %s4336_s2, 2  ;;  %p4342_p10 = scmp.lt.s32.totalorder %s4336_s2, %s5914_s8 }
 0x106   : > { %p4338_p7 = scmp.ne.s32.totalorder %s4336_s2, %s4337_s12  ;;  %p4343_p0 = scmp.lt.s32.totalorder %s4341_s0, %s4337_s12 }
 0x108   : > { %p4339_p8 = pnand %p4338_p7, %p5886_p4  ;;  %p4344_p1 = por %p4343_p0, %p4342_p10 }
 0x10a   : > { %p4340_p9 = pneg %p4339_p8 }
 0x10c   : > { %p4345_p2 = pnand %p4344_p1, %p4340_p9 }
 0x10e   : > { %4348 = shalt.err (!%p4345_p2)
}
 0x10f   : > { %s5935_s26 = sld [smem:[#allocation66_spill]]  ;;  %s4871_s1 = smov [#allocation13]  }
 0x110   : > { %3633 = dma.hbm_to_vmem [thread:$0]  (%p5886_p4), %s5281_s7, 32, %s894_s18, [#allocation9], %s5932_s22, %s5932_s22, %s5934_s24  }
 0x111   : > { %s927_s21 = sshll.u32 %s4871_s1, 4  ;;  %s4363_s2 = sshra.s32 %s5295_s3, 4  ;;  %s928_s21 = int_to_ptr.vmem [resolvable:$true] %s927_s21  ;;  %s4364_s2 = int_to_ptr.hbm [resolvable:$true] %s4363_s2 }
 0x112   : > { %s4365_s12 = scalar_lea.hbm %s4364_s2, 2  ;;  %s4369_s0 = scalar_lea.hbm %s4966_s30, 2 }
 0x113   : > { %p4366_p3 = scmp.ne.s32.totalorder %s4364_s2, %s4365_s12  ;;  %p4370_p9 = scmp.lt.s32.totalorder %s4364_s2, %s4966_s30 }
 0x114   : > { %p4371_p10 = scmp.lt.s32.totalorder %s4369_s0, %s4365_s12 }
 0x115   : > { %s953_s16 = sshll.u32 %s5935_s26, 4  ;;  %p4367_p7 = pnand %p4366_p3, %p5886_p4  ;;  %s5309_s16 = int_to_ptr.hbm [resolvable:$true] %s953_s16 }
 0x116   : > { %p4372_p0 = por %p4371_p10, %p4370_p9 }
 0x117   : > { %p4368_p8 = pneg %p4367_p7 }
 0x119   : > { %p4373_p1 = pnand %p4372_p0, %p4368_p8 }
 0x11b   : > { %4376 = shalt.err (!%p4373_p1)
}
 0x11c   : > { %s5936_s7 = sld [smem:[#allocation69_spill]]  ;;  %s4872_s1 = smov [#allocation16]  }
 0x11d   : > { %3637 = dma.hbm_to_vmem [thread:$0]  (%p5886_p4), %s5295_s3, 32, %s928_s21, [#allocation12], %s5932_s22, %s5932_s22, %s5934_s24  }
 0x11e   : > { %s955_s4 = sshll.u32 %s4872_s1, 4  ;;  %s4391_s2 = sshra.s32 %s5309_s16, 4  ;;  %s956_s4 = int_to_ptr.vmem [resolvable:$true] %s955_s4  ;;  %s4392_s2 = int_to_ptr.hbm [resolvable:$true] %s4391_s2 }
 0x11f   : > { %s4393_s12 = scalar_lea.hbm %s4392_s2, 2  ;;  %s4397_s0 = scalar_lea.hbm %s5935_s26, 2 }
 0x120   : > { %p4394_p2 = scmp.ne.s32.totalorder %s4392_s2, %s4393_s12  ;;  %p4398_p8 = scmp.lt.s32.totalorder %s4392_s2, %s5935_s26 }
 0x121   : > { %p4399_p9 = scmp.lt.s32.totalorder %s4397_s0, %s4393_s12 }
 0x122   : > { %s5937_s18 = smov %s5936_s7  ;;  %s987_s5 = sshll.u32 %s5936_s7, 4  ;;  %s5323_s5 = int_to_ptr.hbm [resolvable:$true] %s987_s5 }
 0x123   : > { %p4395_p3 = pnand %p4394_p2, %p5886_p4  ;;  %p4400_p10 = por %p4399_p9, %p4398_p8 }
 0x125   : > { %p4396_p7 = pneg %p4395_p3 }
 0x127   : > { %p4401_p0 = pnand %p4400_p10, %p4396_p7 }
 0x129   : > { %4404 = shalt.err (!%p4401_p0)
}
 0x12a   : > { %s5938_s3 = sld [smem:[#allocation70_spill]]  ;;  %s4873_s7 = smov [#allocation19]  }
 0x12b   : > { %3641 = dma.hbm_to_vmem [thread:$0]  (%p5886_p4), %s5309_s16, 32, %s956_s4, [#allocation15], %s5932_s22, %s5932_s22, %s5934_s24  }
 0x12c   : > { %s989_s1 = sshll.u32 %s4873_s7, 4  ;;  %s4419_s2 = sshra.s32 %s5323_s5, 4  ;;  %s990_s1 = int_to_ptr.vmem [resolvable:$true] %s989_s1  ;;  %s4420_s2 = int_to_ptr.hbm [resolvable:$true] %s4419_s2 }
 0x12d   : > { %s4421_s12 = scalar_lea.hbm %s4420_s2, 2  ;;  %s4425_s0 = scalar_lea.hbm %s5937_s18, 2 }
 0x12e   : > { %p4422_p1 = scmp.ne.s32.totalorder %s4420_s2, %s4421_s12  ;;  %p4426_p7 = scmp.lt.s32.totalorder %s4420_s2, %s5937_s18 }
 0x12f   : > { %p4427_p8 = scmp.lt.s32.totalorder %s4425_s0, %s4421_s12 }
 0x130   : > { %s1015_s21 = sshll.u32 %s5938_s3, 4  ;;  %p4423_p2 = pnand %p4422_p1, %p5886_p4  ;;  %s5337_s21 = int_to_ptr.hbm [resolvable:$true] %s1015_s21 }
 0x131   : > { %p4428_p9 = por %p4427_p8, %p4426_p7 }
 0x132   : > { %p4424_p3 = pneg %p4423_p2 }
 0x134   : > { %p4429_p10 = pnand %p4428_p9, %p4424_p3 }
 0x136   : > { %4432 = shalt.err (!%p4429_p10)
}
 0x137   : > { %s5939_s4 = sld [smem:[#allocation72_spill]]  ;;  %s4874_s16 = smov [#allocation22]  }
 0x138   : > { %3645 = dma.hbm_to_vmem [thread:$0]  (%p5886_p4), %s5323_s5, 32, %s990_s1, [#allocation18], %s5932_s22, %s5932_s22, %s5934_s24  }
 0x139   : > { %s1017_s7 = sshll.u32 %s4874_s16, 4  ;;  %s4447_s2 = sshra.s32 %s5337_s21, 4  ;;  %s1018_s7 = int_to_ptr.vmem [resolvable:$true] %s1017_s7  ;;  %s4448_s2 = int_to_ptr.hbm [resolvable:$true] %s4447_s2 }
 0x13a   : > { %s4449_s12 = scalar_lea.hbm %s4448_s2, 2  ;;  %s4453_s0 = scalar_lea.hbm %s5938_s3, 2 }
 0x13b   : > { %p4450_p0 = scmp.ne.s32.totalorder %s4448_s2, %s4449_s12  ;;  %p4454_p3 = scmp.lt.s32.totalorder %s4448_s2, %s5938_s3 }
 0x13c   : > { %p4455_p7 = scmp.lt.s32.totalorder %s4453_s0, %s4449_s12 }
 0x13d   : > { %s1043_s6 = sshll.u32 %s5939_s4, 4  ;;  %p4451_p1 = pnand %p4450_p0, %p5886_p4  ;;  %s5351_s6 = int_to_ptr.hbm [resolvable:$true] %s1043_s6 }
 0x13e   : > { %p4456_p8 = por %p4455_p7, %p4454_p3 }
 0x13f   : > { %p4452_p2 = pneg %p4451_p1 }
 0x141   : > { %p4457_p9 = pnand %p4456_p8, %p4452_p2 }
 0x143   : > { %4460 = shalt.err (!%p4457_p9)
}
 0x144   : > { %s5940_s5 = sld [smem:[#allocation73_spill]]  ;;  %s4875_s16 = smov [#allocation25]  }
 0x145   : > { %3649 = dma.hbm_to_vmem [thread:$0]  (%p5886_p4), %s5337_s21, 32, %s1018_s7, [#allocation21], %s5932_s22, %s5932_s22, %s5934_s24  }
 0x146   : > { %s1045_s8 = sshll.u32 %s4875_s16, 4  ;;  %s4475_s2 = sshra.s32 %s5351_s6, 4  ;;  %s1046_s8 = int_to_ptr.vmem [resolvable:$true] %s1045_s8  ;;  %s4476_s2 = int_to_ptr.hbm [resolvable:$true] %s4475_s2 }
 0x147   : > { %s4477_s12 = scalar_lea.hbm %s4476_s2, 2  ;;  %s4481_s0 = scalar_lea.hbm %s5939_s4, 2 }
 0x148   : > { %p4478_p10 = scmp.ne.s32.totalorder %s4476_s2, %s4477_s12  ;;  %p4482_p2 = scmp.lt.s32.totalorder %s4476_s2, %s5939_s4 }
 0x149   : > { %p4483_p3 = scmp.lt.s32.totalorder %s4481_s0, %s4477_s12 }
 0x14a   : > { %s1071_s1 = sshll.u32 %s5940_s5, 4  ;;  %p4479_p0 = pnand %p4478_p10, %p5886_p4  ;;  %s5365_s1 = int_to_ptr.hbm [resolvable:$true] %s1071_s1 }
 0x14b   : > { %p4484_p7 = por %p4483_p3, %p4482_p2 }
 0x14c   : > { %p4480_p1 = pneg %p4479_p0 }
 0x14e   : > { %p4485_p8 = pnand %p4484_p7, %p4480_p1 }
 0x150   : > { %4488 = shalt.err (!%p4485_p8)
}
 0x151   : > { %s5941_s21 = sld [smem:[#allocation75_spill]]  ;;  %s4876_s7 = smov [#allocation28]  }
 0x152   : > { %3653 = dma.hbm_to_vmem [thread:$0]  (%p5886_p4), %s5351_s6, 32, %s1046_s8, [#allocation24], %s5932_s22, %s5932_s22, %s5934_s24  }
 0x153   : > { %s1073_s16 = sshll.u32 %s4876_s7, 4  ;;  %s4503_s2 = sshra.s32 %s5365_s1, 4  ;;  %s1074_s16 = int_to_ptr.vmem [resolvable:$true] %s1073_s16  ;;  %s4504_s2 = int_to_ptr.hbm [resolvable:$true] %s4503_s2 }
 0x154   : > { %s4505_s12 = scalar_lea.hbm %s4504_s2, 2  ;;  %s4509_s0 = scalar_lea.hbm %s5940_s5, 2 }
 0x155   : > { %p4506_p9 = scmp.ne.s32.totalorder %s4504_s2, %s4505_s12  ;;  %p4510_p1 = scmp.lt.s32.totalorder %s4504_s2, %s5940_s5 }
 0x156   : > { %p4511_p2 = scmp.lt.s32.totalorder %s4509_s0, %s4505_s12 }
 0x157   : > { %s1099_s3 = sshll.u32 %s5941_s21, 4  ;;  %p4507_p10 = pnand %p4506_p9, %p5886_p4  ;;  %s5379_s3 = int_to_ptr.hbm [resolvable:$true] %s1099_s3 }
 0x158   : > { %p4512_p3 = por %p4511_p2, %p4510_p1 }
 0x159   : > { %p4508_p0 = pneg %p4507_p10 }
 0x15b   : > { %p4513_p7 = pnand %p4512_p3, %p4508_p0 }
 0x15d   : > { %4516 = shalt.err (!%p4513_p7)
}
 0x15e   : > { %s5942_s8 = sld [smem:[#allocation76_spill]]  ;;  %s4877_s7 = smov [#allocation31]  }
 0x15f   : > { %3657 = dma.hbm_to_vmem [thread:$0]  (%p5886_p4), %s5365_s1, 32, %s1074_s16, [#allocation27], %s5932_s22, %s5932_s22, %s5934_s24  }
 0x160   : > { %s1101_s4 = sshll.u32 %s4877_s7, 4  ;;  %s4531_s2 = sshra.s32 %s5379_s3, 4  ;;  %s1102_s4 = int_to_ptr.vmem [resolvable:$true] %s1101_s4  ;;  %s4532_s2 = int_to_ptr.hbm [resolvable:$true] %s4531_s2 }
 0x161   : > { %s4533_s12 = scalar_lea.hbm %s4532_s2, 2  ;;  %s4537_s0 = scalar_lea.hbm %s5941_s21, 2 }
 0x162   : > { %p4534_p8 = scmp.ne.s32.totalorder %s4532_s2, %s4533_s12  ;;  %p4538_p0 = scmp.lt.s32.totalorder %s4532_s2, %s5941_s21 }
 0x163   : > { %p4539_p1 = scmp.lt.s32.totalorder %s4537_s0, %s4533_s12 }
 0x164   : > { %s1127_s6 = sshll.u32 %s5942_s8, 4  ;;  %p4535_p9 = pnand %p4534_p8, %p5886_p4  ;;  %s5393_s6 = int_to_ptr.hbm [resolvable:$true] %s1127_s6 }
 0x165   : > { %p4540_p2 = por %p4539_p1, %p4538_p0 }
 0x166   : > { %p4536_p10 = pneg %p4535_p9 }
 0x168   : > { %p4541_p3 = pnand %p4540_p2, %p4536_p10 }
 0x16a   : > { %4544 = shalt.err (!%p4541_p3)
}
 0x16b   : > { %3661 = dma.hbm_to_vmem [thread:$0]  (%p5886_p4), %s5379_s3, 32, %s1102_s4, [#allocation30], %s5932_s22, %s5932_s22, %s5934_s24  }
 0x16c   : > { %s4878_s1 = smov [#allocation34]   ;;  %s1155_s7 = sshll.u32 %s5056_s9, 4  ;;  %s5407_s7 = int_to_ptr.hbm [resolvable:$true] %s1155_s7 }
 0x16d   : > { %s1129_s16 = sshll.u32 %s4878_s1, 4  ;;  %s4559_s2 = sshra.s32 %s5393_s6, 4  ;;  %s1130_s16 = int_to_ptr.vmem [resolvable:$true] %s1129_s16  ;;  %s4560_s2 = int_to_ptr.hbm [resolvable:$true] %s4559_s2 }
 0x16e   : > { %s4561_s12 = scalar_lea.hbm %s4560_s2, 2  ;;  %s4565_s0 = scalar_lea.hbm %s5942_s8, 2 }
 0x16f   : > { %p4562_p7 = scmp.ne.s32.totalorder %s4560_s2, %s4561_s12  ;;  %p4566_p10 = scmp.lt.s32.totalorder %s4560_s2, %s5942_s8 }
 0x170   : > { %p4567_p0 = scmp.lt.s32.totalorder %s4565_s0, %s4561_s12 }
 0x171   : > { %p4563_p8 = pnand %p4562_p7, %p5886_p4 }
 0x172   : > { %p4568_p1 = por %p4567_p0, %p4566_p10 }
 0x173   : > { %p4564_p9 = pneg %p4563_p8 }
 0x175   : > { %p4569_p2 = pnand %p4568_p1, %p4564_p9 }
 0x177   : > { %4572 = shalt.err (!%p4569_p2)
}
 0x178   : > { %3665 = dma.hbm_to_vmem [thread:$0]  (%p5886_p4), %s5393_s6, 32, %s1130_s16, [#allocation33], %s5932_s22, %s5932_s22, %s5934_s24  }
 0x179   : > { %s1172_s3 = sshll.u32 %s5066_s13, 4  ;;  %s4879_s4 = smov [#allocation37]   ;;  %s5421_s3 = int_to_ptr.hbm [resolvable:$true] %s1172_s3 }
 0x17a   : > { %s1157_s1 = sshll.u32 %s4879_s4, 4  ;;  %s4587_s2 = sshra.s32 %s5407_s7, 4  ;;  %s1158_s1 = int_to_ptr.vmem [resolvable:$true] %s1157_s1  ;;  %s4588_s2 = int_to_ptr.hbm [resolvable:$true] %s4587_s2 }
 0x17b   : > { %s4589_s12 = scalar_lea.hbm %s4588_s2, 2  ;;  %s4593_s0 = scalar_lea.hbm %s5056_s9, 2 }
 0x17c   : > { %p4590_p3 = scmp.ne.s32.totalorder %s4588_s2, %s4589_s12  ;;  %p4594_p9 = scmp.lt.s32.totalorder %s4588_s2, %s5056_s9 }
 0x17d   : > { %p4595_p10 = scmp.lt.s32.totalorder %s4593_s0, %s4589_s12 }
 0x17e   : > { %p4591_p7 = pnand %p4590_p3, %p5886_p4 }
 0x17f   : > { %p4596_p0 = por %p4595_p10, %p4594_p9 }
 0x180   : > { %p4592_p8 = pneg %p4591_p7 }
 0x182   : > { %p4597_p1 = pnand %p4596_p0, %p4592_p8 }
 0x184   : > { %4600 = shalt.err (!%p4597_p1)
}
 0x185   : > { %3669 = dma.hbm_to_vmem [thread:$0]  (%p5886_p4), %s5407_s7, 32, %s1158_s1, [#allocation36], %s5932_s22, %s5932_s22, %s5934_s24  }
 0x186   : > { %s4880_s6 = smov [#allocation38]   ;;  %s4615_s4 = sshra.s32 %s5421_s3, 4  ;;  %s4616_s4 = int_to_ptr.hbm [resolvable:$true] %s4615_s4 }
 0x187   : > { %s1174_s16 = sshll.u32 %s4880_s6, 4  ;;  %s4617_s2 = scalar_lea.hbm %s4616_s4, 2  ;;  %s1175_s16 = int_to_ptr.vmem [resolvable:$true] %s1174_s16 }
 0x188   : > { %p4618_p2 = scmp.ne.s32.totalorder %s4616_s4, %s4617_s2  ;;  %s4621_s12 = scalar_lea.hbm %s5066_s13, 2 }
 0x189   : > { %p4622_p8 = scmp.lt.s32.totalorder %s4616_s4, %s5066_s13  ;;  %p4623_p9 = scmp.lt.s32.totalorder %s4621_s12, %s4617_s2 }
 0x18a   : > { %p4619_p3 = pnand %p4618_p2, %p5886_p4 }
 0x18b   : > { %p4624_p10 = por %p4623_p9, %p4622_p8 }
 0x18c   : > { %p4620_p7 = pneg %p4619_p3 }
 0x18e   : > { %p4625_p0 = pnand %p4624_p10, %p4620_p7 }
 0x190   : > { %4628 = shalt.err (!%p4625_p0)
}
 0x191   : > { %3671 = dma.hbm_to_vmem [thread:$0]  (%p5886_p4), %s5421_s3, 32, %s1175_s16, [#allocation39], %s5932_s22, %s5932_s22, %s5934_s24  }
 0x192 PF: > { %s5943_s7 = sld [smem:[#allocation56_spill]]  ;;  %s1195_s0 = sand.u32 1, %s4799_s10  }
 0x193   : > { %s3412_s6 = sshll.u32 %s4803_s11, 3  ;;  %p3753_p2 = scmp.lt.s32.totalorder %s4803_s11, 2 }
 0x194   : > { %s3411_s4 = sshll.u32 %s1195_s0, 3  ;;  %s1196_s24 = scalar_lea.sflag [#allocation3], %s1195_s0 }
 0x195   : > { %s1199_s5 = scalar_lea.vmem [#allocation2], %s3411_s4  ;;  %p5452_p3 = pnand %p3753_p2, %p5112_p5 }
 0x196   : > { %s1207_s8 = sshll.u32 %s1199_s5, 4  ;;  %s1208_s8 = int_to_ptr.vmem [resolvable:$true] %s1207_s8 }
 0x197   : > { %p4647_p8 = pneg %p5452_p3 }
 0x198   : > { %s5944_s1 = smov %s5943_s7  ;;  %s1203_s2 = scalar_lea.hbm %s5943_s7, %s3412_s6 }
 0x199   : > { %s1205_s12 = sshll.u32 %s1203_s2, 4  ;;  %s4650_s7 = scalar_lea.hbm %s5944_s1, 16  ;;  %s1206_s12 = int_to_ptr.hbm [resolvable:$true] %s1205_s12 }
 0x19a   : > { %s4643_s3 = sshra.s32 %s1206_s12, 4  ;;  %s4644_s3 = int_to_ptr.hbm [resolvable:$true] %s4643_s3 }
 0x19b   : > { %s4645_s16 = scalar_lea.hbm %s4644_s3, 8  ;;  %p4651_p0 = scmp.lt.s32.totalorder %s4644_s3, %s5944_s1 }
 0x19c   : > { %p4646_p7 = scmp.ne.s32.totalorder %s4644_s3, %s4645_s16  ;;  %p4652_p1 = scmp.lt.s32.totalorder %s4650_s7, %s4645_s16 }
 0x19e   : > { %p4648_p9 = pnand %p4647_p8, %p4646_p7  ;;  %p4653_p4 = por %p4652_p1, %p4651_p0 }
 0x1a0   : > { %p4649_p10 = pneg %p4648_p9 }
 0x1a2   : > { %p4654_p12 = pnand %p4653_p4, %p4649_p10 }
 0x1a4   : > { %4657 = shalt.err (!%p4654_p12)
}
 0x1a5   : > { %3725 = dma.hbm_to_vmem [thread:$0]  (!%p5452_p3), %s1206_s12, 128, %s1208_s8, %s1196_s24  }
 0x1a6   : > { %1216 = sbr.rel (%p5133_p13) target bundleno = 5734 (0x1666), region = 152  ;;  %s5946_s28 = sld [smem:[#allocation80_spill]] (!%p5133_p13) }
 0x1ac   : > { %s5465_s0 = sand.u32 1, %s5946_s28  }
 0x1ad   : > { %s3414_s6 = sshll.u32 %s5465_s0, 3  ;;  %s1219_s4 = scalar_lea.sflag [#allocation3], %s5465_s0 }
 0x1ae   : > { %s5471_s2 = scalar_lea.vmem [#allocation2], %s3414_s6 }
 0x1af   : > { %4734 = dma.done.wait (%p5118_p6), %s1219_s4, 128  }
 0x1b0   : > { %4736 = vsyncadd (%p5118_p6), %s1219_s4, 4294967168  ;;  %p5948_p4 = scmp.eq.s32.totalorder %s5094_s15, 0 }
 0x1b2   : > { %4738 = dma.done.wait (%p5948_p4), [#allocation6], 64   ;;  %p5949_p5 = pmov %p5948_p4 }
 0x1b3   : > { %p5950_p12 = pmov %p5948_p4 }
 0x1b4   : > { %4740 = vsyncadd (%p5949_p5), [#allocation6], 4294967232 }
 0x1b5   : > { %4742 = dma.done.wait (%p5950_p12), [#allocation9], 64   ;;  %p5951_p13 = pmov %p5948_p4 }
 0x1b6   : > { %p5952_p1 = pmov %p5948_p4 }
 0x1b7   : > { %4744 = vsyncadd (%p5951_p13), [#allocation9], 4294967232 }
 0x1b8   : > { %4746 = dma.done.wait (%p5952_p1), [#allocation12], 64   ;;  %p5953_p2 = pmov %p5952_p1 }
 0x1b9   : > { %p5954_p6 = pmov %p5952_p1 }
 0x1ba   : > { %4748 = vsyncadd (%p5953_p2), [#allocation12], 4294967232 }
 0x1bb   : > { %4750 = dma.done.wait (%p5954_p6), [#allocation15], 64   ;;  %p5955_p3 = pmov %p5952_p1 }
 0x1bc   : > { %p5956_p7 = pmov %p5952_p1 }
 0x1bd   : > { %4752 = vsyncadd (%p5955_p3), [#allocation15], 4294967232 }
 0x1be   : > { %4754 = dma.done.wait (%p5956_p7), [#allocation18], 64   ;;  %p5957_p8 = pmov %p5952_p1 }
 0x1bf   : > { %p5958_p9 = pmov %p5952_p1 }
 0x1c0   : > { %4756 = vsyncadd (%p5957_p8), [#allocation18], 4294967232 }
 0x1c1   : > { %4758 = dma.done.wait (%p5958_p9), [#allocation21], 544   ;;  %p5959_p10 = pmov %p5952_p1 }
 0x1c2   : > { %p5960_p0 = pmov %p5952_p1 }
 0x1c3   : > { %4760 = vsyncadd (%p5959_p10), [#allocation21], 4294966752 }
 0x1c4   : > { %4762 = dma.done.wait (%p5960_p0), [#allocation24], 544   ;;  %p5961_p4 = pmov %p5960_p0 }
 0x1c5   : > { %p5962_p5 = pmov %p5960_p0 }
 0x1c6   : > { %4764 = vsyncadd (%p5961_p4), [#allocation24], 4294966752 }
 0x1c7   : > { %4766 = dma.done.wait (%p5962_p5), [#allocation27], 64   ;;  %p5963_p12 = pmov %p5960_p0 }
 0x1c8   : > { %p5964_p13 = pmov %p5960_p0 }
 0x1c9   : > { %4768 = vsyncadd (%p5963_p12), [#allocation27], 4294967232 }
 0x1ca   : > { %4770 = dma.done.wait (%p5964_p13), [#allocation30], 64   ;;  %p5965_p1 = pmov %p5960_p0 }
 0x1cb   : > { %p5966_p2 = pmov %p5960_p0 }
 0x1cc   : > { %4772 = vsyncadd (%p5965_p1), [#allocation30], 4294967232 }
 0x1cd   : > { %4774 = dma.done.wait (%p5966_p2), [#allocation33], 64   ;;  %p5967_p6 = pmov %p5960_p0 }
 0x1ce   : > { %p5968_p3 = pmov %p5960_p0 }
 0x1cf   : > { %4776 = vsyncadd (%p5967_p6), [#allocation33], 4294967232 }
 0x1d0   : > { %4778 = dma.done.wait (%p5968_p3), [#allocation36], 544   ;;  %p5969_p7 = pmov %p5960_p0 }
 0x1d1   : > { %p5970_p8 = pmov %p5960_p0 }
 0x1d2   : > { %4780 = vsyncadd (%p5969_p7), [#allocation36], 4294966752 }
 0x1d3   : > { %4782 = dma.done.wait (%p5970_p8), [#allocation39], 32   ;;  %p5971_p9 = pmov %p5960_p0 }
 0x1d4   : > { %s5972_s23 = sld [smem:[#allocation55_spill]]  ;;  %p1425_p10 = scmp.lt.s32.totalorder %s5094_s15, 1  ;;  %v5529_v1 = vld [vmem:[%s5471_s2] sm:$0xff] }
 0x1d5   : > { %4784 = vsyncadd (%p5971_p9), [#allocation39], 4294967264  ;;  %s5973_s8 = sld [smem:[#allocation57_spill]]  ;;  %s5536_s3 = scalar_lea.vmem [#allocation40], %s3414_s6 }
 0x1d6   : > { %s1426_s12 = scalar_select %p1425_p10, %s5094_s15, 1 }
 0x1d7   : > { %s5540_s16 = smov 0  }
 0x1d8   : > { %s3439_s22 = sshll.u32 %s1426_s12, 3 }
 0x1da   : > { %s1428_s24 = scalar_lea.vmem %s5972_s23, %s3439_s22 }
 0x1db   : > { %v1430_v0 = vld [vmem:[%s1428_s24] sm:$0xff]  }
 0x1dc   : > { %v5532_v2 = vld [vmem:[%s5973_s8] sm:$0xff] }
 0x1dd LB: >> { %s5974_s7 = sld [smem:[#allocation58_spill]]  ;;  %s5549_s28 = sshll.u32 %s4811_s16, 4  ;;  %v1440_v4 = vadd.f32 %v4807_v0, %v5529_v1  ;;  %vm1475_vm0 = vcmask 261120   ;;  %vm1550_vm1 = vcmask 64512   ;;  %v1459_v30 = vpack.c.bf16 %v4807_v0, %v4807_v0  ;;  %s4811_s16 = sphi %s5540_s16, %s1438_s16   ;;  %v4807_v0 = vphi %v1430_v0, %v5979_v0  }
 0x1de   : >> { %s1448_s6 = scalar_lea.vmem [#allocation5], %s4811_s16  ;;  %s4881_s4 = smov 104   ;;  %vm1693_vm2 = vcmask 1043456   ;;  %vm1780_vm3 = vcmask 130048   ;;  %vm1782_vm4 = vcmask 195584   ;;  %vm1940_vm9 = vcmask 523264  }
 0x1df   : >> { %v1458_v6 = vpack.c.bf16 %v1440_v4, %v1440_v4  ;;  %v5557_v7 = vld [vmem:[%s1448_s6] ss:$0 sm:$0xff]  ;;  %s4882_s2 = smov 120   ;;  %s4883_s23 = smov 112  }
 0x1e0   : >> { %s4884_s8 = smov 64   ;;  %s4885_s12 = smov 96  }
 0x1e1   : >> { %s5975_s22 = sld [smem:[#allocation60_spill]]  ;;  %s4886_s24 = smov 16  }
 0x1e2   : >> { %s4888_s6 = smov 24  }
 0x1e3   : >> { %s1443_s5 = scalar_lea.vmem %s5974_s7, %s5549_s28  ;;  %s1456_s7 = scalar_lea.vmem [#allocation7], %s4811_s16 }
 0x1e4   : >> { %v3594_v3 = vld [vmem:[%s1443_s5 + $0x8] sm:$0xff]  ;;  %v3593_v5 = vld [vmem:[%s1443_s5] sm:$0xff]  ;;  %s4887_s5 = smov 8  }
 0x1e5   : >> { %1485 = vmatpush.bf16.msra.mxu0 %v3594_v3 }
 0x1e9   : >> { %1486 = vmatpush.bf16.msra.mxu0 %v3593_v5 }
 0x1ec   : >> { %3451 = vmatmul.msk.bf16.vlgmr.msra.gmra.mxu0 %vm1475_vm0, %v1458_v6 }
 0x269   : >> { %v1488_v8 = vpop.f32.mrf.mxu0 }
 0x26a   : >> { %v1489_v9 = vadd.f32 %v5557_v7, %v1488_v8 }
 0x26c   : >> { %1524 = vrot.lane.b32.xlu1 %v1489_v9, %s4881_s4  ;;  %1518 = vrot.lane.b32.xlu0 %v1489_v9, %s4882_s2  ;;  %v1527_v23 = vpack.c.bf16 %v1489_v9, %v1489_v9 }
 0x26e   : >> { %v1546_v24 = vunpack.c.l.b16 %v1527_v23 }
 0x270   : >> { %v1547_v25 = vpack.c.b16 %v1546_v24, %v1546_v24 }
 0x271   : >> { %v1490_v10 = vpop.f32.mrf.mxu0 }
 0x274   : >> { %1521 = vrot.lane.b32.xlu0 %v1489_v9, %s4883_s23  ;;  %1494 = vrot.lane.b32.xlu1 %v3594_v3, %s4884_s8 }
 0x2de   : >> { %v1525_v11 = vpop.permute.xlu1 %1524  ;;  %v1519_v12 = vpop.permute.xlu0 %1518 }
 0x2df   : >> { %v1530_v13 = vpack.c.bf16 %v1525_v11, %v1525_v11  ;;  %v1528_v14 = vpack.c.bf16 %v1519_v12, %v1519_v12 }
 0x2e1   : >> { %v1619_v15 = vunpack.c.l.b16 %v1530_v13  ;;  %v1571_v16 = vunpack.c.l.b16 %v1528_v14 }
 0x2e3   : >> { %v1620_v17 = vpack.c.b16 %v1619_v15, %v1619_v15  ;;  %v1572_v18 = vpack.c.b16 %v1571_v16, %v1571_v16 }
 0x2e5   : >> { %1621 = vrot.lane.b32.xlu1 %v1620_v17, %s4885_s12  ;;  %1573 = vrot.lane.b32.xlu2 %v1572_v18, %s4885_s12 }
 0x2e6   : >> { %v1522_v19 = vpop.permute.xlu0 %1521  ;;  %v1495_v26 = vpop.permute.xlu1 %1494 }
 0x2e7   : >> { %v1529_v20 = vpack.c.bf16 %v1522_v19, %v1522_v19  ;;  %1510 = vmatpush.bf16.msra.mxu1 %v1495_v26 }
 0x2e9   : >> { %v1595_v21 = vunpack.c.l.b16 %v1529_v20 }
 0x2eb   : >> { %v1596_v22 = vpack.c.b16 %v1595_v21, %v1595_v21 }
 0x2ed   : >> { %1492 = vrot.lane.b32.xlu2 %v3593_v5, %s4884_s8  ;;  %1597 = vrot.lane.b32.xlu0 %v1596_v22, %s4885_s12 }
 0x2f5   : >> { %1548 = vrot.lane.b32.xlu2 %v1547_v25, %s4885_s12  ;;  %s5977_s12 = sld [smem:[#allocation64_spill]] }
 0x33f   : >> { %v1574_v27 = vpop.permute.xlu2 %1573 }
 0x340   : >> { %v1579_v28 = vsel %vm1550_vm1, %v1574_v27, 0 }
 0x341   : >> { %1588 = vmatpush.bf16.xpose.msra.mxu3 %v1579_v28 }
 0x347   : >> { %v1493_v29 = vpop.permute.xlu2 %1492 }
 0x348   : >> { %3454 = vmatmul.msk.bf16.vlgmr.msra.gmra.mxu3 %vm1550_vm1, %v1528_v14  ;;  %1511 = vmatpush.bf16.msra.mxu1 %v1493_v29 }
 0x34b   : >> { %3452 = vmatmul.msk.bf16.vlgmr.msra.gmra.mxu1 %vm1475_vm0, %v1459_v30 }
 0x34f   : >> { %v1549_v31 = vpop.permute.xlu2 %1548 }
 0x350   : >> { %v1555_v32 = vsel %vm1550_vm1, %v1549_v31, 0 }
 0x351   : >> { %1564 = vmatpush.bf16.xpose.msra.mxu2 %v1555_v32 }
 0x357   : >> { %v1622_v33 = vpop.permute.xlu1 %1621 }
 0x358   : >> { %3453 = vmatmul.msk.bf16.vlgmr.msra.gmra.mxu2 %vm1550_vm1, %v1527_v23  ;;  %v1627_v34 = vsel %vm1550_vm1, %v1622_v33, 0 }
 0x359   : >> { %1636 = vmatpush.bf16.xpose.msrb.mxu1 %v1627_v34 }
 0x35f   : >> { %v1598_v35 = vpop.permute.xlu0 %1597 }
 0x360   : >> { %3456 = vmatmul.msk.bf16.vlgmr.msrb.gmra.mxu1 %vm1550_vm1, %v1530_v13  ;;  %v1603_v36 = vsel %vm1550_vm1, %v1598_v35, 0 }
 0x361   : >> { %1612 = vmatpush.bf16.xpose.msrb.mxu0 %v1603_v36 }
 0x368   : >> { %3455 = vmatmul.msk.bf16.vlgmr.msrb.gmra.mxu0 %vm1550_vm1, %v1529_v20 }
 0x3c8   : >> { %v1513_v37 = vpop.f32.mrf.mxu1 }
 0x3cb   : >> { %v1590_v38 = vpop.f32.mrf.mxu3 }
 0x3cc   : >> { %v1645_v39 = vsel %vm1550_vm1, %v1590_v38, -inf }
 0x3cd   : >> { %1646 = vmax.xlane.f32.xlu0 %v1645_v39 }
 0x3d0   : >> { %v1515_v40 = vpop.f32.mrf.mxu1 }
 0x3d3   : >> { %v1592_v41 = vpop.f32.mrf.mxu3 }
 0x3db   : >> { %v1566_v42 = vpop.f32.mrf.mxu2 }
 0x3dc   : >> { %v1642_v43 = vsel %vm1550_vm1, %v1566_v42, -inf }
 0x3dd   : >> { %v1638_v44 = vpop.f32.mrf.mxu1  ;;  %1643 = vmax.xlane.f32.xlu0 %v1642_v43 }
 0x3de   : >> { %v1651_v45 = vsel %vm1550_vm1, %v1638_v44, -inf }
 0x3df   : >> { %1652 = vmax.xlane.f32.xlu2 %v1651_v45 }
 0x3e3   : >> { %v1568_v46 = vpop.f32.mrf.mxu2 }
 0x3e5   : >> { %v1614_v47 = vpop.f32.mrf.mxu0  ;;  %v1640_v48 = vpop.f32.mrf.mxu1 }
 0x3e6   : >> { %v1648_v49 = vsel %vm1550_vm1, %v1614_v47, -inf }
 0x3e7   : >> { %1649 = vmax.xlane.f32.xlu1 %v1648_v49 }
 0x3ed   : >> { %v1616_v50 = vpop.f32.mrf.mxu0 }
 0x3f7   : >> { %1498 = vrot.lane.b32.xlu2 %v5557_v7, %s4884_s8  ;;  %s5976_s8 = sld [smem:[#allocation63_spill]] }
 0x440   : >> { %v1647_v61 = vpop.xlane.xlu0 %1646 }
 0x441   : >> { %v1655_v63 = vsub.f32 %v1590_v38, %v1647_v61 }
 0x443   : >> { %v1660_v4 = vmul.f32 1.442695, %v1655_v63 }
 0x450   : >> { %v1644_v7 = vpop.xlane.xlu0 %1643 }
 0x451   : >> { %v1654_v9 = vsub.f32 %v1566_v42, %v1644_v7 }
 0x452   : >> { %v1653_v51 = vpop.xlane.xlu2 %1652 }
 0x453   : >> { %v1657_v56 = vsub.f32 %v1638_v44, %v1653_v51  ;;  %v1658_v11 = vmul.f32 1.442695, %v1654_v9 }
 0x455   : >> { %v1664_v60 = vmul.f32 1.442695, %v1657_v56  ;;  %v3920_v56 = vld [vmem:[%s1456_s7] ss:$0 sm:$0xff]  ;;  %s3601_s7 = sshll.u32 %s4811_s16, 5 }
 0x45a   : >> { %v1650_v52 = vpop.xlane.xlu1 %1649  ;;  %v1499_v53 = vpop.permute.xlu2 %1498 }
 0x45b   : >> { %v1656_v54 = vsub.f32 %v1614_v47, %v1650_v52  ;;  %v1514_v55 = vadd.f32 %v1513_v37, %v1499_v53 }
 0x45d   : >> { %v1662_v57 = vmul.f32 1.442695, %v1656_v54  ;;  %1535 = vrot.lane.b32.xlu2 %v1514_v55, %s4883_s23  ;;  %1532 = vrot.lane.b32.xlu0 %v1514_v55, %s4882_s2  ;;  %v1541_v58 = vpack.c.bf16 %v1514_v55, %v1514_v55  ;;  %s1816_s2 = scalar_lea.vmem [#allocation8], %s4811_s16  ;;  %s1818_s23 = scalar_lea.vmem [#allocation10], %s4811_s16 }
 0x45f   : >> { %3927 = vpow2.f32 %v1662_v57  ;;  %v1695_v59 = vsel %vm1693_vm2, %v1541_v58, 0 }
 0x460   : >> { %1704 = vmatpush.bf16.msrb.mxu2 %v1695_v59  ;;  %3929 = vpow2.f32 %v1664_v60 }
 0x461   : >> { %3931 = vpow2.f32 %v1660_v4 }
 0x462   : >> { %3933 = vpow2.f32 %v1658_v11 }
 0x465   : >> { %v3928_v62 = vpop.eup %3927 }
 0x466   : >> { %v1672_v3 = vsel %vm1550_vm1, %v3928_v62, 0.0  ;;  %v3930_v5 = vpop.eup %3929 }
 0x467   : >> { %1673 = vadd.xlane.f32.xlu1 %v1672_v3  ;;  %v1675_v6 = vsel %vm1550_vm1, %v3930_v5, 0.0  ;;  %v3932_v8 = vpop.eup %3931 }
 0x468   : >> { %v1669_v10 = vsel %vm1550_vm1, %v3932_v8, 0.0  ;;  %v3934_v12 = vpop.eup %3933 }
 0x469   : >> { %v1666_v13 = vsel %vm1550_vm1, %v3934_v12, 0.0 }
 0x46f   : >> { %1676 = vadd.xlane.f32.xlu1 %v1675_v6 }
 0x477   : >> { %1670 = vadd.xlane.f32.xlu1 %v1669_v10 }
 0x487   : >> { %1667 = vadd.xlane.f32.xlu0 %v1666_v13 }
 0x490   : >> { %1538 = vrot.lane.b32.xlu1 %v1514_v55, %s4881_s4  ;;  %s1451_s4 = scalar_lea.vmem %s5975_s22, %s5549_s28  ;;  %s1864_s22 = scalar_lea.vmem [#allocation11], %s4811_s16 }
 0x491   : >> { %v3597_v47 = vld [vmem:[%s1451_s4 + $0x8] sm:$0xff]  ;;  %v3596_v48 = vld [vmem:[%s1451_s4] sm:$0xff]  ;;  %s1959_s4 = scalar_lea.vmem [#allocation16], %s4811_s16 }
 0x492   : >> { %1809 = vmatpush.bf16.msra.mxu2 %v3597_v47 }
 0x496   : >> { %1810 = vmatpush.bf16.msra.mxu2 %v3596_v48 }
 0x4b7   : >> { %v1536_v14 = vpop.permute.xlu2 %1535 }
 0x4b8   : >> { %v1543_v15 = vpack.c.bf16 %v1536_v14, %v1536_v14 }
 0x4ba   : >> { %v1733_v16 = vsel %vm1693_vm2, %v1543_v15, 0 }
 0x4bb   : >> { %1742 = vmatpush.bf16.msra.mxu0 %v1733_v16 }
 0x4cf   : >> { %v1533_v17 = vpop.permute.xlu0 %1532 }
 0x4d0   : >> { %v1542_v18 = vpack.c.bf16 %v1533_v17, %v1533_v17 }
 0x4d2   : >> { %v1714_v19 = vsel %vm1693_vm2, %v1542_v18, 0 }
 0x4d3   : >> { %1723 = vmatpush.bf16.msrb.mxu3 %v1714_v19 }
 0x4da   : >> { %v1674_v20 = vpop.xlane.xlu1 %1673 }
 0x4db   : >> { %3935 = vrcp.f32 %v1674_v20 }
 0x4e1   : >> { %v3936_v21 = vpop.eup %3935 }
 0x4e2   : >> { %v1684_v22 = vmul.f32 %v3936_v21, %v3928_v62  ;;  %v1677_v23 = vpop.xlane.xlu1 %1676  ;;  %v4889_v62 = vmov 32.0  }
 0x4e4   : >> { %v1688_v24 = vpack.c.bf16 %v1684_v22, %v1684_v22 }
 0x4e6   : >> { %3459 = vmatmul.msk.bf16.vlgmr.msra.gmra.mxu0 %vm1550_vm1, %v1688_v24 }
 0x4ea   : >> { %v1671_v25 = vpop.xlane.xlu1 %1670 }
 0x4eb   : >> { %3937 = vrcp.f32 %v1671_v25  ;;  %v3921_v25 = vld [vmem:[%s1816_s2] ss:$0 sm:$0xff] }
 0x4ec   : >> { %3939 = vrcp.f32 %v1677_v23 }
 0x4f1   : >> { %v3938_v26 = vpop.eup %3937 }
 0x4f2   : >> { %v1683_v27 = vmul.f32 %v3938_v26, %v3932_v8  ;;  %v3940_v30 = vpop.eup %3939 }
 0x4f3   : >> { %v1685_v34 = vmul.f32 %v3940_v30, %v3930_v5 }
 0x4f4   : >> { %v1687_v28 = vpack.c.bf16 %v1683_v27, %v1683_v27  ;;  %v3922_v27 = vld [vmem:[%s1818_s23] ss:$0 sm:$0xff] }
 0x4f5   : >> { %v1689_v38 = vpack.c.bf16 %v1685_v34, %v1685_v34  ;;  %v3923_v34 = vld [vmem:[%s1864_s22] ss:$0 sm:$0xff] }
 0x4f6   : >> { %3458 = vmatmul.msk.bf16.vlgmr.msrb.gmra.mxu3 %vm1550_vm1, %v1687_v28 }
 0x4fa   : >> { %v1668_v29 = vpop.xlane.xlu0 %1667 }
 0x4fb   : >> { %3941 = vrcp.f32 %v1668_v29 }
 0x4fc   : >> { %3943 = vrcp.f32 %v4889_v62  ;;  %v3926_v62 = vld [vmem:[%s1959_s4] ss:$0 sm:$0xff] }
 0x501   : >> { %v3942_v31 = vpop.eup %3941 }
 0x502   : >> { %v1682_v32 = vmul.f32 %v3942_v31, %v3934_v12  ;;  %v1539_v33 = vpop.permute.xlu1 %1538  ;;  %v3944_v63 = vpop.eup %3943 }
 0x503   : >> { %v1544_v35 = vpack.c.bf16 %v1539_v33, %v1539_v33  ;;  %v1825_v3 = vmul.f32 32.0, %v3944_v63  ;;  %vm1829_vm5 = vweird.f32 %v3944_v63 }
 0x504   : >> { %v1686_v36 = vpack.c.bf16 %v1682_v32, %v1682_v32 }
 0x505   : >> { %v1752_v37 = vsel %vm1693_vm2, %v1544_v35, 0  ;;  %v1826_v4 = vsub.f32 1.0, %v1825_v3 }
 0x506   : >> { %3457 = vmatmul.msk.bf16.vlgmr.msrb.gmra.mxu2 %vm1550_vm1, %v1686_v36  ;;  %1761 = vmatpush.bf16.msra.mxu1 %v1752_v37 }
 0x507   : >> { %v1827_v5 = vmul.f32 %v3944_v63, %v1826_v4 }
 0x509   : >> { %3460 = vmatmul.msk.bf16.vlgmr.msra.gmra.mxu1 %vm1550_vm1, %v1689_v38  ;;  %v1828_v6 = vadd.f32 %v3944_v63, %v1827_v5 }
 0x50b   : >> { %v5608_v7 = vsel %vm1829_vm5, %v3944_v63, %v1828_v6 }
 0x563   : >> { %v1744_v39 = vpop.f32.mrf.mxu0 }
 0x564   : >> { %1772 = vrot.lane.b32.xlu2 %v1744_v39, %s4886_s24  ;;  %s1859_s24 = scalar_lea.vmem %s5976_s8, %s5549_s28  ;;  %s1877_s28 = scalar_lea.vmem [#allocation13], %s4811_s16 }
 0x565   : >> { %v3600_v12 = vld [vmem:[%s1859_s24 + $0x8] sm:$0xff]  ;;  %v3599_v13 = vld [vmem:[%s1859_s24] sm:$0xff] }
 0x566   : >> { %1904 = vmatpush.bf16.msra.mxu3 %v3600_v12 }
 0x56a   : >> { %1905 = vmatpush.bf16.msra.mxu3 %v3599_v13 }
 0x56b   : >> { %v1746_v40 = vpop.f32.mrf.mxu0 }
 0x56c   : >> { %v3924_v40 = vld [vmem:[%s1877_s28] ss:$0 sm:$0xff] }
 0x579   : >> { %v1725_v41 = vpop.f32.mrf.mxu3 }
 0x57a   : >> { %1768 = vrot.lane.b32.xlu2 %v1725_v41, %s4887_s5  ;;  %s1868_s5 = scalar_lea.vmem %s5977_s12, %s3601_s7 }
 0x57b   : >> { %v3605_v14 = vld [vmem:[%s1868_s5 + $0x18] sm:$0xff]  ;;  %v3604_v17 = vld [vmem:[%s1868_s5 + $0x10] sm:$0xff]  ;;  %v3603_v32 = vld [vmem:[%s1868_s5 + $0x8] sm:$0xff] }
 0x57c   : >> { %1948 = vmatpush.bf16.msrb.mxu0 %v3605_v14  ;;  %v3602_v33 = vld [vmem:[%s1868_s5] sm:$0xff] }
 0x580   : >> { %1949 = vmatpush.bf16.msrb.mxu0 %v3604_v17 }
 0x581   : >> { %v1727_v42 = vpop.f32.mrf.mxu3 }
 0x584   : >> { %1950 = vmatpush.bf16.msrb.mxu0 %v3603_v32 }
 0x586   : >> { %v1763_v43 = vpop.f32.mrf.mxu1 }
 0x587   : >> { %1776 = vrot.lane.b32.xlu2 %v1763_v43, %s4888_s6  ;;  %s1957_s6 = scalar_lea.vmem [#allocation14], %s4811_s16  ;;  %s1438_s16 = sadd.s32 1, %s4811_s16  }
 0x588   : >> { %1951 = vmatpush.bf16.msrb.mxu0 %v3602_v33  ;;  %p1435_p0 = scmp.ge.s32.totalorder %s1438_s16, 2  }
 0x589   : >> { %v1706_v44 = vpop.f32.mrf.mxu2  ;;  %v5645_v6 = vmov (%p1435_p0), 0.0   ;;  %s5647_s2 = smov (%p1435_p0), 0  }
 0x58e   : >> { %v1765_v45 = vpop.f32.mrf.mxu1 }
 0x591   : >> { %v1708_v46 = vpop.f32.mrf.mxu2 }
 0x5be   : >> { %v1773_v49 = vpop.permute.xlu2 %1772 }
 0x5d4   : >> { %v1769_v50 = vpop.permute.xlu2 %1768 }
 0x5d5   : >> { %v1779_v51 = vsel %vm1550_vm1, %v1706_v44, %v1769_v50 }
 0x5d6   : >> { %v1781_v53 = vsel %vm1780_vm3, %v1779_v51, %v1773_v49 }
 0x5e1   : >> { %v1777_v52 = vpop.permute.xlu2 %1776 }
 0x5e2   : >> { %v1783_v54 = vsel %vm1782_vm4, %v1781_v53, %v1777_v52 }
 0x5e3   : >> { %v1784_v55 = vpack.c.bf16 %v1783_v54, %v1783_v54 }
 0x5e5   : >> { %3469 = vmatmul.msk.bf16.vlgmr.msra.gmra.mxu2 %vm1475_vm0, %v1784_v55 }
 0x668   : >> { %v1812_v57 = vpop.f32.mrf.mxu2 }
 0x669   : >> { %v1813_v58 = vadd.f32 %v3920_v56, %v1812_v57 }
 0x66b   : >> { %v1820_v59 = vadd.f32 %v4807_v0, %v1813_v58 }
 0x66d   : >> { %v1821_v60 = vsel %vm1475_vm0, %v1820_v59, 0.0 }
 0x66e   : >> { %1822 = vadd.xlane.f32.xlu1 %v1821_v60  ;;  %v3925_v60 = vld [vmem:[%s1957_s6] ss:$0 sm:$0xff] }
 0x670   : >> { %v1814_v61 = vpop.f32.mrf.mxu2 }
 0x6e1   : >> { %v1823_v0 = vpop.xlane.xlu1 %1822 }
 0x6e2   : >> { %v1831_v8 = vmul.f32 %v5608_v7, %v1823_v0 }
 0x6e4   : >> { %v1832_v9 = vsub.f32 %v1820_v59, %v1831_v8 }
 0x6e6   : >> { %v1833_v10 = vmul.f32 %v1832_v9, %v1832_v9 }
 0x6e8   : >> { %v1834_v11 = vsel %vm1475_vm0, %v1833_v10, 0.0 }
 0x6e9   : >> { %1835 = vadd.xlane.f32.xlu2 %v1834_v11 }
 0x75c   : >> { %v1836_v15 = vpop.xlane.xlu2 %1835 }
 0x75d   : >> { %v1837_v16 = vmul.f32 %v1836_v15, %v5608_v7 }
 0x75f   : >> { %v1838_v18 = vadd.f32 1e-05, %v1837_v16 }
 0x761   : >> { %3945 = vrsqrt.f32 %v1838_v18  ;;  %vm1845_vm7 = vweird.f32 %v1838_v18 }
 0x767   : >> { %v3946_v19 = vpop.eup %3945 }
 0x768   : >> { %v1840_v20 = vmul.f32 %v3946_v19, %v1838_v18  ;;  %vm1846_vm6 = vweird.f32 %v3946_v19 }
 0x769   : >> { %vm1847_vm8 = vmor %vm1845_vm7, %vm1846_vm6 }
 0x76a   : >> { %v1841_v21 = vmul.f32 %v3946_v19, %v1840_v20 }
 0x76c   : >> { %v1842_v22 = vmul.f32 0.5, %v1841_v21 }
 0x76e   : >> { %v1843_v23 = vsub.f32 1.5, %v1842_v22 }
 0x770   : >> { %v1844_v24 = vmul.f32 %v3946_v19, %v1843_v23 }
 0x772   : >> { %v1848_v26 = vsel %vm1847_vm8, %v3946_v19, %v1844_v24 }
 0x773   : >> { %v1849_v28 = vmul.f32 %v1848_v26, %v1832_v9 }
 0x775   : >> { %v1853_v29 = vmul.f32 %v3921_v25, %v1849_v28 }
 0x777   : >> { %v1857_v30 = vadd.f32 %v3922_v27, %v1853_v29 }
 0x779   : >> { %v1879_v31 = vpack.c.bf16 %v1857_v30, %v1857_v30 }
 0x77b   : >> { %3481 = vmatmul.msk.bf16.vlgmr.msra.gmra.mxu3 %vm1475_vm0, %v1879_v31 }
 0x7fe   : >> { %v1907_v35 = vpop.f32.mrf.mxu3 }
 0x7ff   : >> { %v1908_v36 = vadd.f32 %v3923_v34, %v1907_v35 }
 0x801   : >> { %v1911_v37 = vmax.f32 %v1908_v36, 0.0 }
 0x803   : >> { %v1912_v38 = vpack.c.bf16 %v1911_v37, %v1911_v37 }
 0x805   : >> { %3498 = vmatmul.msk.bf16.vlgmr.msrb.gmra.mxu0 %vm1940_vm9, %v1912_v38 }
 0x806   : >> { %v1909_v39 = vpop.f32.mrf.mxu3 }
 0x882   : >> { %v1953_v41 = vpop.f32.mrf.mxu0 }
 0x883   : >> { %v1954_v42 = vadd.f32 %v3924_v40, %v1953_v41 }
 0x885   : >> { %v1961_v43 = vadd.f32 %v1954_v42, %v1857_v30 }
 0x887   : >> { %v1962_v44 = vsel %vm1475_vm0, %v1961_v43, 0.0 }
 0x888   : >> { %1963 = vadd.xlane.f32.xlu0 %v1962_v44 }
 0x88a   : >> { %v1955_v45 = vpop.f32.mrf.mxu0 }
 0x8fb   : >> { %v1964_v46 = vpop.xlane.xlu0 %1963 }
 0x8fc   : >> { %v1965_v47 = vmul.f32 %v1964_v46, %v5608_v7 }
 0x8fe   : >> { %v1966_v48 = vsub.f32 %v1961_v43, %v1965_v47 }
 0x900   : >> { %v1967_v49 = vmul.f32 %v1966_v48, %v1966_v48 }
 0x902   : >> { %v1968_v50 = vsel %vm1475_vm0, %v1967_v49, 0.0 }
 0x903   : >> { %1969 = vadd.xlane.f32.xlu0 %v1968_v50 }
 0x976   : >> { %v1970_v51 = vpop.xlane.xlu0 %1969 }
 0x977   : >> { %v1971_v52 = vmul.f32 %v1970_v51, %v5608_v7 }
 0x979   : >> { %v1972_v53 = vadd.f32 1e-05, %v1971_v52 }
 0x97b   : >> { %3947 = vrsqrt.f32 %v1972_v53  ;;  %vm1979_vm11 = vweird.f32 %v1972_v53 }
 0x981   : >> { %v3948_v54 = vpop.eup %3947 }
 0x982   : >> { %v1974_v55 = vmul.f32 %v3948_v54, %v1972_v53  ;;  %vm1980_vm10 = vweird.f32 %v3948_v54 }
 0x983   : >> { %vm1981_vm12 = vmor %vm1979_vm11, %vm1980_vm10 }
 0x984   : >> { %v1975_v56 = vmul.f32 %v3948_v54, %v1974_v55 }
 0x986   : >> { %v1976_v57 = vmul.f32 0.5, %v1975_v56 }
 0x988   : >> { %v1977_v58 = vsub.f32 1.5, %v1976_v57 }
 0x98a   : >> { %v1978_v59 = vmul.f32 %v3948_v54, %v1977_v58 }
 0x98c   : >> { %v1982_v61 = vsel %vm1981_vm12, %v3948_v54, %v1978_v59 }
 0x98d   : >> { %v1983_v63 = vmul.f32 %v1982_v61, %v1966_v48 }
 0x98f   : >> { %v1987_v3 = vmul.f32 %v3925_v60, %v1983_v63 }
 0x990   : > { %1437 = sbr.rel (!%p1435_p0) target bundleno = 477 (0x1dd), region = 369 }
 0x991   : >> { %v5633_v0 = vadd.f32 %v3926_v62, %v1987_v3  }
 0x993   : >> { %v5978_v4 = vmov %v5633_v0 }
 0x994   : >> { %v5979_v0 = vmov %v5978_v4  ;;  %v5643_v5 = vadd.f32 (%p1435_p0), %v5978_v4, %v5529_v1 }
 0x995 LB: >> { %s5980_s23 = sld [smem:[#allocation67_spill]]  ;;  %s5656_s16 = sshll.u32 %s4819_s2, 4  ;;  %v2000_v0 = vadd.f32 %v4815_v6, %v5532_v2  ;;  %v2019_v33 = vpack.c.bf16 %v4815_v6, %v4815_v6  ;;  %s4819_s2 = sphi %s5647_s2, %s1998_s2   ;;  %v4815_v6 = vphi %v5645_v6, %v5985_v6  }
 0x996   : >> { %s2008_s12 = scalar_lea.vmem [#allocation17], %s4819_s2  ;;  %s5887_s22 = smov 104  }
 0x997   : >> { %v2018_v9 = vpack.c.bf16 %v2000_v0, %v2000_v0  ;;  %v5664_v10 = vld [vmem:[%s2008_s12] ss:$0 sm:$0xff]  ;;  %s4891_s24 = smov 120   ;;  %s4892_s7 = smov 112  }
 0x998   : >> { %s4893_s5 = smov 64   ;;  %s4894_s28 = smov 96  }
 0x999   : >> { %s5981_s6 = sld [smem:[#allocation68_spill]]  ;;  %s4895_s4 = smov 16  }
 0x99a   : >> { %s5889_s12 = smov 24  }
 0x99b   : >> { %s2003_s8 = scalar_lea.vmem %s5980_s23, %s5656_s16  ;;  %s2016_s23 = scalar_lea.vmem [#allocation19], %s4819_s2 }
 0x99c   : >> { %v3608_v1 = vld [vmem:[%s2003_s8 + $0x8] sm:$0xff]  ;;  %v3607_v8 = vld [vmem:[%s2003_s8] sm:$0xff]  ;;  %s4896_s8 = smov 8  }
 0x99d   : >> { %2045 = vmatpush.bf16.msra.mxu0 %v3608_v1 }
 0x9a1   : >> { %2046 = vmatpush.bf16.msra.mxu0 %v3607_v8 }
 0x9a4   : >> { %3510 = vmatmul.msk.bf16.vlgmr.msra.gmra.mxu0 %vm1475_vm0, %v2018_v9 }
 0xa21   : >> { %v2048_v11 = vpop.f32.mrf.mxu0 }
 0xa22   : >> { %v2049_v12 = vadd.f32 %v5664_v10, %v2048_v11 }
 0xa24   : >> { %2084 = vrot.lane.b32.xlu1 %v2049_v12, %s5887_s22  ;;  %2078 = vrot.lane.b32.xlu0 %v2049_v12, %s4891_s24  ;;  %v2087_v26 = vpack.c.bf16 %v2049_v12, %v2049_v12 }
 0xa26   : >> { %v2106_v27 = vunpack.c.l.b16 %v2087_v26 }
 0xa28   : >> { %v2107_v28 = vpack.c.b16 %v2106_v27, %v2106_v27 }
 0xa29   : >> { %v2050_v13 = vpop.f32.mrf.mxu0 }
 0xa2c   : >> { %2081 = vrot.lane.b32.xlu0 %v2049_v12, %s4892_s7  ;;  %2054 = vrot.lane.b32.xlu1 %v3608_v1, %s4893_s5 }
 0xa96   : >> { %v2085_v14 = vpop.permute.xlu1 %2084  ;;  %v2079_v15 = vpop.permute.xlu0 %2078 }
 0xa97   : >> { %v2090_v16 = vpack.c.bf16 %v2085_v14, %v2085_v14  ;;  %v2088_v17 = vpack.c.bf16 %v2079_v15, %v2079_v15 }
 0xa99   : >> { %v2179_v18 = vunpack.c.l.b16 %v2090_v16  ;;  %v2131_v19 = vunpack.c.l.b16 %v2088_v17 }
 0xa9b   : >> { %v2180_v20 = vpack.c.b16 %v2179_v18, %v2179_v18  ;;  %v2132_v21 = vpack.c.b16 %v2131_v19, %v2131_v19 }
 0xa9d   : >> { %2181 = vrot.lane.b32.xlu1 %v2180_v20, %s4894_s28  ;;  %2133 = vrot.lane.b32.xlu2 %v2132_v21, %s4894_s28 }
 0xa9e   : >> { %v2082_v22 = vpop.permute.xlu0 %2081  ;;  %v2055_v29 = vpop.permute.xlu1 %2054 }
 0xa9f   : >> { %v2089_v23 = vpack.c.bf16 %v2082_v22, %v2082_v22  ;;  %2070 = vmatpush.bf16.msra.mxu1 %v2055_v29 }
 0xaa1   : >> { %v2155_v24 = vunpack.c.l.b16 %v2089_v23 }
 0xaa3   : >> { %v2156_v25 = vpack.c.b16 %v2155_v24, %v2155_v24 }
 0xaa5   : >> { %2052 = vrot.lane.b32.xlu2 %v3607_v8, %s4893_s5  ;;  %2157 = vrot.lane.b32.xlu0 %v2156_v25, %s4894_s28 }
 0xaad   : >> { %2108 = vrot.lane.b32.xlu2 %v2107_v28, %s4894_s28 }
 0xaf7   : >> { %v2134_v30 = vpop.permute.xlu2 %2133 }
 0xaf8   : >> { %v2139_v31 = vsel %vm1550_vm1, %v2134_v30, 0 }
 0xaf9   : >> { %2148 = vmatpush.bf16.xpose.msra.mxu3 %v2139_v31 }
 0xaff   : >> { %v2053_v32 = vpop.permute.xlu2 %2052 }
 0xb00   : >> { %3513 = vmatmul.msk.bf16.vlgmr.msra.gmra.mxu3 %vm1550_vm1, %v2088_v17  ;;  %2071 = vmatpush.bf16.msra.mxu1 %v2053_v32 }
 0xb03   : >> { %3511 = vmatmul.msk.bf16.vlgmr.msra.gmra.mxu1 %vm1475_vm0, %v2019_v33 }
 0xb07   : >> { %v2109_v34 = vpop.permute.xlu2 %2108 }
 0xb08   : >> { %v2115_v35 = vsel %vm1550_vm1, %v2109_v34, 0 }
 0xb09   : >> { %2124 = vmatpush.bf16.xpose.msra.mxu2 %v2115_v35 }
 0xb0f   : >> { %v2182_v36 = vpop.permute.xlu1 %2181 }
 0xb10   : >> { %3512 = vmatmul.msk.bf16.vlgmr.msra.gmra.mxu2 %vm1550_vm1, %v2087_v26  ;;  %v2187_v37 = vsel %vm1550_vm1, %v2182_v36, 0 }
 0xb11   : >> { %2196 = vmatpush.bf16.xpose.msrb.mxu1 %v2187_v37 }
 0xb17   : >> { %v2158_v38 = vpop.permute.xlu0 %2157 }
 0xb18   : >> { %3515 = vmatmul.msk.bf16.vlgmr.msrb.gmra.mxu1 %vm1550_vm1, %v2090_v16  ;;  %v2163_v39 = vsel %vm1550_vm1, %v2158_v38, 0 }
 0xb19   : >> { %2172 = vmatpush.bf16.xpose.msrb.mxu0 %v2163_v39 }
 0xb20   : >> { %3514 = vmatmul.msk.bf16.vlgmr.msrb.gmra.mxu0 %vm1550_vm1, %v2089_v23 }
 0xb80   : >> { %v2073_v40 = vpop.f32.mrf.mxu1 }
 0xb83   : >> { %v2150_v41 = vpop.f32.mrf.mxu3 }
 0xb84   : >> { %v2205_v42 = vsel %vm1550_vm1, %v2150_v41, -inf }
 0xb85   : >> { %2206 = vmax.xlane.f32.xlu0 %v2205_v42 }
 0xb88   : >> { %v2075_v43 = vpop.f32.mrf.mxu1 }
 0xb8b   : >> { %v2152_v44 = vpop.f32.mrf.mxu3 }
 0xb93   : >> { %v2126_v45 = vpop.f32.mrf.mxu2 }
 0xb94   : >> { %v2202_v46 = vsel %vm1550_vm1, %v2126_v45, -inf }
 0xb95   : >> { %v2198_v47 = vpop.f32.mrf.mxu1  ;;  %2203 = vmax.xlane.f32.xlu0 %v2202_v46 }
 0xb96   : >> { %v2211_v48 = vsel %vm1550_vm1, %v2198_v47, -inf }
 0xb97   : >> { %2212 = vmax.xlane.f32.xlu2 %v2211_v48 }
 0xb9b   : >> { %v2128_v49 = vpop.f32.mrf.mxu2 }
 0xb9d   : >> { %v2174_v50 = vpop.f32.mrf.mxu0  ;;  %v2200_v51 = vpop.f32.mrf.mxu1 }
 0xb9e   : >> { %v2208_v52 = vsel %vm1550_vm1, %v2174_v50, -inf }
 0xb9f   : >> { %2209 = vmax.xlane.f32.xlu1 %v2208_v52 }
 0xba5   : >> { %v2176_v53 = vpop.f32.mrf.mxu0 }
 0xbaf   : >> { %2058 = vrot.lane.b32.xlu2 %v5664_v10, %s4893_s5 }
 0xbf8   : >> { %v2207_v3 = vpop.xlane.xlu0 %2206 }
 0xbf9   : >> { %v2215_v0 = vsub.f32 %v2150_v41, %v2207_v3 }
 0xbfb   : >> { %v2220_v9 = vmul.f32 1.442695, %v2215_v0 }
 0xc08   : >> { %v2204_v12 = vpop.xlane.xlu0 %2203 }
 0xc09   : >> { %v2214_v14 = vsub.f32 %v2126_v45, %v2204_v12 }
 0xc0a   : >> { %v2213_v54 = vpop.xlane.xlu2 %2212 }
 0xc0b   : >> { %v2217_v59 = vsub.f32 %v2198_v47, %v2213_v54  ;;  %v2218_v16 = vmul.f32 1.442695, %v2214_v14 }
 0xc0d   : >> { %v2224_v63 = vmul.f32 1.442695, %v2217_v59 }
 0xc12   : >> { %v2210_v55 = vpop.xlane.xlu1 %2209  ;;  %v2059_v56 = vpop.permute.xlu2 %2058 }
 0xc13   : >> { %v2216_v57 = vsub.f32 %v2174_v50, %v2210_v55  ;;  %v2074_v58 = vadd.f32 %v2073_v40, %v2059_v56 }
 0xc15   : >> { %v2222_v60 = vmul.f32 1.442695, %v2216_v57  ;;  %2095 = vrot.lane.b32.xlu2 %v2074_v58, %s4892_s7  ;;  %2092 = vrot.lane.b32.xlu0 %v2074_v58, %s4891_s24  ;;  %v2101_v61 = vpack.c.bf16 %v2074_v58, %v2074_v58 }
 0xc17   : >> { %3961 = vpow2.f32 %v2222_v60  ;;  %v2255_v62 = vsel %vm1693_vm2, %v2101_v61, 0  ;;  %v3950_v61 = vld [vmem:[%s2016_s23] ss:$0 sm:$0xff]  ;;  %s2378_s23 = scalar_lea.vmem [#allocation28], %s4819_s2 }
 0xc18   : >> { %2264 = vmatpush.bf16.msrb.mxu2 %v2255_v62  ;;  %3963 = vpow2.f32 %v2224_v63 }
 0xc19   : >> { %3965 = vpow2.f32 %v2220_v9 }
 0xc1a   : >> { %3967 = vpow2.f32 %v2218_v16  ;;  %v2437_v16 = vpack.c.bf16 %v5643_v5, %v5643_v5 }
 0xc1d   : >> { %v3962_v1 = vpop.eup %3961 }
 0xc1e   : >> { %v2232_v8 = vsel %vm1550_vm1, %v3962_v1, 0.0  ;;  %v3964_v10 = vpop.eup %3963 }
 0xc1f   : >> { %2233 = vadd.xlane.f32.xlu1 %v2232_v8  ;;  %v2235_v11 = vsel %vm1550_vm1, %v3964_v10, 0.0  ;;  %v3966_v13 = vpop.eup %3965 }
 0xc20   : >> { %v2229_v15 = vsel %vm1550_vm1, %v3966_v13, 0.0  ;;  %v3968_v17 = vpop.eup %3967 }
 0xc21   : >> { %v2226_v18 = vsel %vm1550_vm1, %v3968_v17, 0.0 }
 0xc27   : >> { %2236 = vadd.xlane.f32.xlu1 %v2235_v11 }
 0xc2f   : >> { %2230 = vadd.xlane.f32.xlu1 %v2229_v15 }
 0xc3f   : >> { %2227 = vadd.xlane.f32.xlu0 %v2226_v18 }
 0xc48   : >> { %2098 = vrot.lane.b32.xlu1 %v2074_v58, %s5887_s22  ;;  %s2011_s22 = scalar_lea.vmem %s5981_s6, %s5656_s16  ;;  %s2376_s6 = scalar_lea.vmem [#allocation26], %s4819_s2 }
 0xc49   : >> { %v3611_v52 = vld [vmem:[%s2011_s22 + $0x8] sm:$0xff]  ;;  %v3610_v53 = vld [vmem:[%s2011_s22] sm:$0xff]  ;;  %s2420_s22 = scalar_lea.vmem [#allocation20], %s5656_s16 }
 0xc4a   : >> { %2369 = vmatpush.bf16.msra.mxu2 %v3611_v52  ;;  %v3614_v8 = vld [vmem:[%s2420_s22 + $0x8] sm:$0xff]  ;;  %v3613_v9 = vld [vmem:[%s2420_s22] sm:$0xff]  ;;  %s2844_s22 = scalar_lea.vmem [#allocation35], %s5656_s16 }
 0xc4e   : >> { %2370 = vmatpush.bf16.msra.mxu2 %v3610_v53 }
 0xc53   : >> { %2471 = vrot.lane.b32.xlu0 %v3614_v8, %s4894_s28 }
 0xc5b   : >> { %2469 = vrot.lane.b32.xlu0 %v3613_v9, %s4894_s28 }
 0xc63   : >> { %2496 = vrot.lane.b32.xlu0 %v3614_v8, %s4893_s5 }
 0xc6b   : >> { %2494 = vrot.lane.b32.xlu0 %v3613_v9, %s4893_s5 }
 0xc6f   : >> { %v2096_v19 = vpop.permute.xlu2 %2095 }
 0xc70   : >> { %v2103_v20 = vpack.c.bf16 %v2096_v19, %v2096_v19 }
 0xc72   : >> { %v2293_v21 = vsel %vm1693_vm2, %v2103_v20, 0 }
 0xc73   : >> { %2302 = vmatpush.bf16.msra.mxu0 %v2293_v21 }
 0xc87   : >> { %v2093_v22 = vpop.permute.xlu0 %2092 }
 0xc88   : >> { %v2102_v23 = vpack.c.bf16 %v2093_v22, %v2093_v22 }
 0xc8a   : >> { %v2274_v24 = vsel %vm1693_vm2, %v2102_v23, 0 }
 0xc8b   : >> { %2283 = vmatpush.bf16.msrb.mxu3 %v2274_v24 }
 0xc8f   : >> { %2462 = vmatpush.bf16.msra.mxu3 %v3614_v8 }
 0xc92   : >> { %v2234_v25 = vpop.xlane.xlu1 %2233 }
 0xc93   : >> { %3969 = vrcp.f32 %v2234_v25  ;;  %2463 = vmatpush.bf16.msra.mxu3 %v3613_v9 }
 0xc99   : >> { %v3970_v26 = vpop.eup %3969 }
 0xc9a   : >> { %v2244_v27 = vmul.f32 %v3970_v26, %v3962_v1  ;;  %v2237_v28 = vpop.xlane.xlu1 %2236 }
 0xc9c   : >> { %v2248_v29 = vpack.c.bf16 %v2244_v27, %v2244_v27  ;;  %v3951_v27 = vld [vmem:[%s2376_s6] ss:$0 sm:$0xff]  ;;  %s2849_s6 = scalar_lea.vmem [#allocation37], %s4819_s2 }
 0xc9e   : >> { %3518 = vmatmul.msk.bf16.vlgmr.msra.gmra.mxu0 %vm1550_vm1, %v2248_v29 }
 0xca2   : >> { %v2231_v30 = vpop.xlane.xlu1 %2230 }
 0xca3   : >> { %3971 = vrcp.f32 %v2231_v30  ;;  %v3952_v30 = vld [vmem:[%s2378_s23] ss:$0 sm:$0xff]  ;;  %s3621_s23 = sshll.u32 %s4819_s2, 5 }
 0xca4   : >> { %3973 = vrcp.f32 %v2237_v28 }
 0xca9   : >> { %v3972_v31 = vpop.eup %3971 }
 0xcaa   : >> { %v2243_v32 = vmul.f32 %v3972_v31, %v3966_v13  ;;  %v3974_v35 = vpop.eup %3973 }
 0xcab   : >> { %v2245_v39 = vmul.f32 %v3974_v35, %v3964_v10 }
 0xcac   : >> { %v2247_v33 = vpack.c.bf16 %v2243_v32, %v2243_v32 }
 0xcad   : >> { %v2249_v43 = vpack.c.bf16 %v2245_v39, %v2245_v39 }
 0xcae   : >> { %3517 = vmatmul.msk.bf16.vlgmr.msrb.gmra.mxu3 %vm1550_vm1, %v2247_v33 }
 0xcb2   : >> { %v2228_v34 = vpop.xlane.xlu0 %2227 }
 0xcb3   : >> { %3975 = vrcp.f32 %v2228_v34 }
 0xcb9   : >> { %v3976_v36 = vpop.eup %3975 }
 0xcba   : >> { %v2099_v37 = vpop.permute.xlu1 %2098  ;;  %v2242_v38 = vmul.f32 %v3976_v36, %v3968_v17 }
 0xcbb   : >> { %v2104_v40 = vpack.c.bf16 %v2099_v37, %v2099_v37 }
 0xcbc   : >> { %v2246_v41 = vpack.c.bf16 %v2242_v38, %v2242_v38 }
 0xcbd   : >> { %v2312_v42 = vsel %vm1693_vm2, %v2104_v40, 0 }
 0xcbe   : >> { %3516 = vmatmul.msk.bf16.vlgmr.msrb.gmra.mxu2 %vm1550_vm1, %v2246_v41  ;;  %2321 = vmatpush.bf16.msra.mxu1 %v2312_v42 }
 0xcc1   : >> { %3519 = vmatmul.msk.bf16.vlgmr.msra.gmra.mxu1 %vm1550_vm1, %v2249_v43 }
 0xcc5   : >> { %v2472_v14 = vpop.permute.xlu0 %2471 }
 0xcc6   : >> { %2487 = vmatpush.bf16.msrb.mxu0 %v2472_v14 }
 0xccd   : >> { %v2470_v15 = vpop.permute.xlu0 %2469 }
 0xcce   : >> { %2488 = vmatpush.bf16.msrb.mxu0 %v2470_v15 }
 0xcd1   : >> { %3540 = vmatmul.msk.bf16.vlgmr.msrb.gmra.mxu0 %vm1475_vm0, %v2437_v16 }
 0xd1b   : >> { %v2304_v44 = vpop.f32.mrf.mxu0 }
 0xd1c   : >> { %2332 = vrot.lane.b32.xlu2 %v2304_v44, %s4895_s4 }
 0xd23   : >> { %v2306_v45 = vpop.f32.mrf.mxu0 }
 0xd24   : >> { %v2497_v45 = vpop.permute.xlu0 %2496 }
 0xd25   : >> { %2512 = vmatpush.bf16.msrb.mxu1 %v2497_v45 }
 0xd31   : >> { %v2285_v46 = vpop.f32.mrf.mxu3 }
 0xd32   : >> { %2328 = vrot.lane.b32.xlu2 %v2285_v46, %s4896_s8  ;;  %v2495_v46 = vpop.permute.xlu0 %2494 }
 0xd33   : >> { %2513 = vmatpush.bf16.msrb.mxu1 %v2495_v46 }
 0xd39   : >> { %v2287_v47 = vpop.f32.mrf.mxu3 }
 0xd3a   : >> { %v2436_v47 = vpack.c.bf16 %v5978_v4, %v5978_v4 }
 0xd3c   : >> { %3541 = vmatmul.msk.bf16.vlgmr.msrb.gmra.mxu1 %vm1475_vm0, %v2436_v47 }
 0xd3e   : >> { %v2323_v48 = vpop.f32.mrf.mxu1 }
 0xd3f   : >> { %2336 = vrot.lane.b32.xlu2 %v2323_v48, %s5889_s12  ;;  %s2425_s12 = scalar_lea.vmem [#allocation22], %s4819_s2 }
 0xd40   : >> { %v5734_v19 = vld [vmem:[%s2425_s12] ss:$0 sm:$0xff]  ;;  %s2810_s12 = scalar_lea.vmem [#allocation31], %s4819_s2 }
 0xd41   : >> { %v2266_v49 = vpop.f32.mrf.mxu2 }
 0xd46   : >> { %v2325_v50 = vpop.f32.mrf.mxu1 }
 0xd49   : >> { %v2268_v51 = vpop.f32.mrf.mxu2 }
 0xd4e   : >> { %v2490_v36 = vpop.f32.mrf.mxu0 }
 0xd56   : >> { %v2492_v40 = vpop.f32.mrf.mxu0 }
 0xd76   : >> { %v2333_v54 = vpop.permute.xlu2 %2332 }
 0xd8c   : >> { %v2329_v55 = vpop.permute.xlu2 %2328 }
 0xd8d   : >> { %v2339_v56 = vsel %vm1550_vm1, %v2266_v49, %v2329_v55 }
 0xd8e   : >> { %v2341_v58 = vsel %vm1780_vm3, %v2339_v56, %v2333_v54 }
 0xd99   : >> { %v2337_v57 = vpop.permute.xlu2 %2336 }
 0xd9a   : >> { %v2343_v59 = vsel %vm1782_vm4, %v2341_v58, %v2337_v57 }
 0xd9b   : >> { %v2344_v60 = vpack.c.bf16 %v2343_v59, %v2343_v59 }
 0xd9d   : >> { %3528 = vmatmul.msk.bf16.vlgmr.msra.gmra.mxu2 %vm1475_vm0, %v2344_v60 }
 0xe20   : >> { %v2372_v62 = vpop.f32.mrf.mxu2 }
 0xe21   : >> { %v2373_v63 = vadd.f32 %v3950_v61, %v2372_v62 }
 0xe23   : >> { %v2380_v3 = vadd.f32 %v4815_v6, %v2373_v63 }
 0xe25   : >> { %v2381_v1 = vsel %vm1475_vm0, %v2380_v3, 0.0 }
 0xe26   : >> { %2382 = vadd.xlane.f32.xlu1 %v2381_v1  ;;  %v2515_v1 = vpop.f32.mrf.mxu1 }
 0xe28   : >> { %v2374_v0 = vpop.f32.mrf.mxu2 }
 0xe2e   : >> { %v2517_v0 = vpop.f32.mrf.mxu1 }
 0xe3f   : >> { %2475 = vrot.lane.b32.xlu1 %v5734_v19, %s4894_s28  ;;  %s5982_s28 = smov 104  }
 0xe99   : >> { %v2383_v10 = vpop.xlane.xlu1 %2382 }
 0xe9a   : >> { %v2391_v6 = vmul.f32 %v2383_v10, %v5608_v7 }
 0xe9c   : >> { %v2392_v11 = vsub.f32 %v2380_v3, %v2391_v6 }
 0xe9e   : >> { %v2393_v12 = vmul.f32 %v2392_v11, %v2392_v11 }
 0xea0   : >> { %v2394_v13 = vsel %vm1475_vm0, %v2393_v12, 0.0 }
 0xea1   : >> { %2395 = vadd.xlane.f32.xlu2 %v2394_v13 }
 0xeb1   : >> { %v2476_v35 = vpop.permute.xlu1 %2475 }
 0xeb2   : >> { %v2491_v37 = vadd.f32 %v2490_v36, %v2476_v35 }
 0xeb4   : >> { %2537 = vrot.lane.b32.xlu1 %v2491_v37, %s4892_s7  ;;  %v2543_v38 = vpack.c.bf16 %v2491_v37, %v2491_v37 }
 0xeb6   : >> { %v2565_v39 = vsel %vm1550_vm1, %v2543_v38, 0 }
 0xeb7   : >> { %2574 = vmatpush.bf16.xpose.msrb.mxu2 %v2565_v39 }
 0xeb9   : >> { %2534 = vrot.lane.b32.xlu2 %v2491_v37, %s4891_s24 }
 0xec1   : >> { %2540 = vrot.lane.b32.xlu2 %v2491_v37, %s5982_s28 }
 0xf14   : >> { %v2396_v17 = vpop.xlane.xlu2 %2395 }
 0xf15   : >> { %v2397_v18 = vmul.f32 %v2396_v17, %v5608_v7 }
 0xf17   : >> { %v2398_v20 = vadd.f32 1e-05, %v2397_v18 }
 0xf19   : >> { %3977 = vrsqrt.f32 %v2398_v20  ;;  %vm2405_vm14 = vweird.f32 %v2398_v20 }
 0xf1c   : >> { %v2535_v48 = vpop.permute.xlu2 %2534 }
 0xf1d   : >> { %v2544_v49 = vpack.c.bf16 %v2535_v48, %v2535_v48 }
 0xf1f   : >> { %v3978_v21 = vpop.eup %3977  ;;  %v2584_v50 = vsel %vm1550_vm1, %v2544_v49, 0 }
 0xf20   : >> { %v2400_v22 = vmul.f32 %v3978_v21, %v2398_v20  ;;  %vm2406_vm13 = vweird.f32 %v3978_v21  ;;  %2593 = vmatpush.bf16.xpose.msrb.mxu3 %v2584_v50 }
 0xf21   : >> { %vm2407_vm15 = vmor %vm2405_vm14, %vm2406_vm13 }
 0xf22   : >> { %v2401_v23 = vmul.f32 %v3978_v21, %v2400_v22 }
 0xf24   : >> { %v2402_v24 = vmul.f32 0.5, %v2401_v23  ;;  %v2541_v51 = vpop.permute.xlu2 %2540 }
 0xf25   : >> { %v2546_v52 = vpack.c.bf16 %v2541_v51, %v2541_v51 }
 0xf26   : >> { %v2403_v25 = vsub.f32 1.5, %v2402_v24  ;;  %v2538_v54 = vpop.permute.xlu1 %2537 }
 0xf27   : >> { %v2622_v53 = vsel %vm1550_vm1, %v2546_v52, 0  ;;  %v2545_v55 = vpack.c.bf16 %v2538_v54, %v2538_v54 }
 0xf28   : >> { %v2404_v26 = vmul.f32 %v3978_v21, %v2403_v25  ;;  %2631 = vmatpush.bf16.xpose.msra.mxu1 %v2622_v53 }
 0xf29   : >> { %v2603_v56 = vsel %vm1550_vm1, %v2545_v55, 0 }
 0xf2a   : >> { %v2408_v28 = vsel %vm2407_vm15, %v3978_v21, %v2404_v26  ;;  %2612 = vmatpush.bf16.xpose.msra.mxu0 %v2603_v56 }
 0xf2b   : >> { %v2409_v29 = vmul.f32 %v2408_v28, %v2392_v11 }
 0xf2d   : >> { %v2413_v31 = vmul.f32 %v3951_v27, %v2409_v29 }
 0xf2f   : >> { %v5740_v32 = vadd.f32 %v3952_v30, %v2413_v31 }
 0xf31   : >> { %v2418_v33 = vadd.f32 %v5740_v32, %v5532_v2 }
 0xf33   : >> { %v2435_v34 = vpack.c.bf16 %v2418_v33, %v2418_v33 }
 0xf35   : >> { %3539 = vmatmul.msk.bf16.vlgmr.msra.gmra.mxu3 %vm1475_vm0, %v2435_v34 }
 0xfb8   : >> { %v2465_v41 = vpop.f32.mrf.mxu3 }
 0xfb9   : >> { %v2466_v42 = vadd.f32 %v5734_v19, %v2465_v41 }
 0xfbb   : >> { %2520 = vrot.lane.b32.xlu0 %v2466_v42, %s4891_s24  ;;  %2526 = vrot.lane.b32.xlu1 %v2466_v42, %s5982_s28  ;;  %v2529_v43 = vpack.c.bf16 %v2466_v42, %v2466_v42 }
 0xfbd   : >> { %3542 = vmatmul.msk.bf16.vlgmr.msrb.gmra.mxu2 %vm1550_vm1, %v2529_v43 }
 0xfc0   : >> { %v2467_v44 = vpop.f32.mrf.mxu3 }
 0xfc3   : >> { %2523 = vrot.lane.b32.xlu0 %v2466_v42, %s4892_s7 }
0x102d   : >> { %v2521_v57 = vpop.permute.xlu0 %2520  ;;  %v2527_v58 = vpop.permute.xlu1 %2526 }
0x102e   : >> { %v2530_v59 = vpack.c.bf16 %v2521_v57, %v2521_v57  ;;  %v2532_v60 = vpack.c.bf16 %v2527_v58, %v2527_v58 }
0x1030   : >> { %3543 = vmatmul.msk.bf16.vlgmr.msrb.gmra.mxu3 %vm1550_vm1, %v2530_v59  ;;  %3545 = vmatmul.msk.bf16.vlgmr.msra.gmra.mxu1 %vm1550_vm1, %v2532_v60 }
0x1035   : >> { %v2524_v61 = vpop.permute.xlu0 %2523 }
0x1036   : >> { %v2531_v62 = vpack.c.bf16 %v2524_v61, %v2524_v61 }
0x1038   : >> { %3544 = vmatmul.msk.bf16.vlgmr.msra.gmra.mxu0 %vm1550_vm1, %v2531_v62 }
0x1040   : >> { %v2576_v63 = vpop.f32.mrf.mxu2 }
0x1041   : >> { %v2637_v16 = vsel %vm1550_vm1, %v2576_v63, -inf }
0x1048   : >> { %v2578_v3 = vpop.f32.mrf.mxu2 }
0x10ad   : >> { %v2633_v8 = vpop.f32.mrf.mxu1 }
0x10ae   : >> { %v2646_v9 = vsel %vm1550_vm1, %v2633_v8, -inf }
0x10af   : >> { %2647 = vmax.xlane.f32.xlu1 %v2646_v9 }
0x10b3   : >> { %v2595_v10 = vpop.f32.mrf.mxu3 }
0x10b4   : >> { %v2640_v6 = vsel %vm1550_vm1, %v2595_v10, -inf }
0x10b5   : >> { %v2614_v11 = vpop.f32.mrf.mxu0  ;;  %2641 = vmax.xlane.f32.xlu2 %v2640_v6  ;;  %v2635_v12 = vpop.f32.mrf.mxu1 }
0x10b6   : >> { %v2643_v13 = vsel %vm1550_vm1, %v2614_v11, -inf }
0x10b7   : >> { %2644 = vmax.xlane.f32.xlu0 %v2643_v13 }
0x10bb   : >> { %v2597_v14 = vpop.f32.mrf.mxu3 }
0x10bd   : >> { %v2616_v15 = vpop.f32.mrf.mxu0 }
0x10bf   : >> { %2638 = vmax.xlane.f32.xlu0 %v2637_v16 }
0x10cd   : >> { %2500 = vrot.lane.b32.xlu2 %v5734_v19, %s4893_s5  ;;  %s2428_s5 = scalar_lea.vmem [#allocation23], %s5656_s16  ;;  %s2862_s16 = scalar_lea.vmem [#allocation38], %s4819_s2 }
0x10ce   : >> { %v3617_v15 = vld [vmem:[%s2428_s5 + $0x8] sm:$0xff]  ;;  %v3616_v16 = vld [vmem:[%s2428_s5] sm:$0xff] }
0x1122   : >> { %v2648_v18 = vpop.xlane.xlu1 %2647 }
0x1123   : >> { %v2652_v22 = vsub.f32 %v2633_v8, %v2648_v18 }
0x1125   : >> { %v2659_v25 = vmul.f32 1.442695, %v2652_v22 }
0x1128   : >> { %v2642_v17 = vpop.xlane.xlu2 %2641 }
0x1129   : >> { %v2650_v29 = vsub.f32 %v2595_v10, %v2642_v17 }
0x112a   : >> { %v2645_v20 = vpop.xlane.xlu0 %2644 }
0x112b   : >> { %v2651_v21 = vsub.f32 %v2614_v11, %v2645_v20  ;;  %v2655_v31 = vmul.f32 1.442695, %v2650_v29 }
0x112d   : >> { %v2657_v23 = vmul.f32 1.442695, %v2651_v21 }
0x112f   : >> { %3979 = vpow2.f32 %v2657_v23 }
0x1130   : >> { %v2501_v24 = vpop.permute.xlu2 %2500  ;;  %3981 = vpow2.f32 %v2659_v25 }
0x1131   : >> { %v2516_v26 = vadd.f32 %v2515_v1, %v2501_v24  ;;  %3983 = vpow2.f32 %v2655_v31 }
0x1132   : >> { %v2639_v37 = vpop.xlane.xlu0 %2638 }
0x1133   : >> { %2551 = vrot.lane.b32.xlu2 %v2516_v26, %s4892_s7  ;;  %2548 = vrot.lane.b32.xlu0 %v2516_v26, %s4891_s24  ;;  %v2557_v27 = vpack.c.bf16 %v2516_v26, %v2516_v26  ;;  %v2649_v38 = vsub.f32 %v2576_v63, %v2639_v37  ;;  %s2433_s24 = scalar_lea.vmem [#allocation25], %s4819_s2  ;;  %s5983_s7 = smov 24  }
0x1134   : >> { %v3954_v25 = vld [vmem:[%s2433_s24] ss:$0 sm:$0xff]  ;;  %s2942_s24 = scalar_lea.vmem [#allocation32], %s4819_s2 }
0x1135   : >> { %v3980_v28 = vpop.eup %3979  ;;  %v2689_v19 = vsel %vm1693_vm2, %v2557_v27, 0  ;;  %v2653_v39 = vmul.f32 1.442695, %v2649_v38 }
0x1136   : >> { %2698 = vmatpush.bf16.msra.mxu2 %v2689_v19  ;;  %v2667_v30 = vsel %vm1550_vm1, %v3980_v28, 0.0  ;;  %v3982_v33 = vpop.eup %3981 }
0x1137   : >> { %2668 = vadd.xlane.f32.xlu1 %v2667_v30  ;;  %v2670_v34 = vsel %vm1550_vm1, %v3982_v33, 0.0  ;;  %v3984_v35 = vpop.eup %3983  ;;  %3985 = vpow2.f32 %v2653_v39 }
0x1138   : >> { %v2664_v36 = vsel %vm1550_vm1, %v3984_v35, 0.0 }
0x113a   : >> { %2801 = vmatpush.bf16.msrb.mxu2 %v3617_v15 }
0x113d   : >> { %v3986_v40 = vpop.eup %3985 }
0x113e   : >> { %v2661_v41 = vsel %vm1550_vm1, %v3986_v40, 0.0  ;;  %2802 = vmatpush.bf16.msrb.mxu2 %v3616_v16 }
0x113f   : >> { %2671 = vadd.xlane.f32.xlu1 %v2670_v34 }
0x1147   : >> { %2665 = vadd.xlane.f32.xlu1 %v2664_v36  ;;  %v3620_v36 = vld [vmem:[%s2844_s22 + $0x8] sm:$0xff] }
0x115d   : >> { %2662 = vadd.xlane.f32.xlu0 %v2661_v41 }
0x1160   : >> { %2554 = vrot.lane.b32.xlu1 %v2516_v26, %s5982_s28 }
0x118d   : >> { %v2552_v42 = vpop.permute.xlu2 %2551 }
0x118e   : >> { %v2559_v43 = vpack.c.bf16 %v2552_v42, %v2552_v42 }
0x1190   : >> { %v2727_v44 = vsel %vm1693_vm2, %v2559_v43, 0 }
0x1191   : >> { %2736 = vmatpush.bf16.msrb.mxu0 %v2727_v44 }
0x11a5   : >> { %v2549_v45 = vpop.permute.xlu0 %2548 }
0x11a6   : >> { %v2558_v46 = vpack.c.bf16 %v2549_v45, %v2549_v45 }
0x11a8   : >> { %v2708_v47 = vsel %vm1693_vm2, %v2558_v46, 0 }
0x11a9   : >> { %2717 = vmatpush.bf16.msra.mxu3 %v2708_v47 }
0x11aa   : >> { %v2669_v48 = vpop.xlane.xlu1 %2668 }
0x11ab   : >> { %3987 = vrcp.f32 %v2669_v48 }
0x11ad   : >> { %2889 = vmatpush.bf16.msrb.mxu3 %v3620_v36 }
0x11b1   : >> { %v3988_v49 = vpop.eup %3987 }
0x11b2   : >> { %v2679_v50 = vmul.f32 %v3988_v49, %v3980_v28  ;;  %v2672_v51 = vpop.xlane.xlu1 %2671 }
0x11b4   : >> { %v2683_v52 = vpack.c.bf16 %v2679_v50, %v2679_v50 }
0x11b6   : >> { %3548 = vmatmul.msk.bf16.vlgmr.msrb.gmra.mxu0 %vm1550_vm1, %v2683_v52 }
0x11ba   : >> { %v2666_v53 = vpop.xlane.xlu1 %2665 }
0x11bb   : >> { %3989 = vrcp.f32 %v2666_v53 }
0x11bc   : >> { %3991 = vrcp.f32 %v2672_v51  ;;  %v3956_v51 = vld [vmem:[%s2810_s12] ss:$0 sm:$0xff] }
0x11c1   : >> { %v3990_v54 = vpop.eup %3989 }
0x11c2   : >> { %v2678_v55 = vmul.f32 %v3990_v54, %v3984_v35  ;;  %v3992_v57 = vpop.eup %3991 }
0x11c3   : >> { %v2680_v60 = vmul.f32 %v3992_v57, %v3982_v33  ;;  %v3957_v57 = vld [vmem:[%s2849_s6] ss:$0 sm:$0xff] }
0x11c4   : >> { %v2682_v56 = vpack.c.bf16 %v2678_v55, %v2678_v55 }
0x11c5   : >> { %v2684_v3 = vpack.c.bf16 %v2680_v60, %v2680_v60 }
0x11c6   : >> { %3547 = vmatmul.msk.bf16.vlgmr.msra.gmra.mxu3 %vm1550_vm1, %v2682_v56 }
0x11d0   : >> { %v2663_v58 = vpop.xlane.xlu0 %2662 }
0x11d1   : >> { %3993 = vrcp.f32 %v2663_v58 }
0x11d2   : >> { %v2555_v59 = vpop.permute.xlu1 %2554 }
0x11d3   : >> { %v2560_v61 = vpack.c.bf16 %v2555_v59, %v2555_v59 }
0x11d5   : >> { %v2746_v62 = vsel %vm1693_vm2, %v2560_v61, 0 }
0x11d6   : >> { %2755 = vmatpush.bf16.msrb.mxu1 %v2746_v62 }
0x11d7   : >> { %v3994_v63 = vpop.eup %3993 }
0x11d8   : >> { %v2677_v1 = vmul.f32 %v3994_v63, %v3986_v40  ;;  %v3958_v63 = vld [vmem:[%s2862_s16] ss:$0 sm:$0xff] }
0x11d9   : >> { %3549 = vmatmul.msk.bf16.vlgmr.msrb.gmra.mxu1 %vm1550_vm1, %v2684_v3 }
0x11da   : >> { %v2681_v0 = vpack.c.bf16 %v2677_v1, %v2677_v1 }
0x11dc   : >> { %3546 = vmatmul.msk.bf16.vlgmr.msra.gmra.mxu2 %vm1550_vm1, %v2681_v0 }
0x1233   : >> { %v2738_v8 = vpop.f32.mrf.mxu0 }
0x1234   : >> { %2766 = vrot.lane.b32.xlu2 %v2738_v8, %s4895_s4  ;;  %s2808_s4 = scalar_lea.vmem [#allocation29], %s4819_s2 }
0x1235   : >> { %v3955_v48 = vld [vmem:[%s2808_s4] ss:$0 sm:$0xff] }
0x123b   : >> { %v2740_v9 = vpop.f32.mrf.mxu0 }
0x1249   : >> { %v2719_v10 = vpop.f32.mrf.mxu3 }
0x124a   : >> { %2762 = vrot.lane.b32.xlu2 %v2719_v10, %s4896_s8  ;;  %s5984_s8 = sld [smem:[#allocation77_spill]] }
0x1250   : >> { %s2853_s28 = scalar_lea.vmem %s5984_s8, %s3621_s23 }
0x1251   : >> { %v2721_v6 = vpop.f32.mrf.mxu3  ;;  %v3625_v37 = vld [vmem:[%s2853_s28 + $0x18] sm:$0xff]  ;;  %v3624_v40 = vld [vmem:[%s2853_s28 + $0x10] sm:$0xff]  ;;  %v3623_v55 = vld [vmem:[%s2853_s28 + $0x8] sm:$0xff] }
0x1252   : >> { %2933 = vmatpush.bf16.msra.mxu0 %v3625_v37  ;;  %v3622_v56 = vld [vmem:[%s2853_s28] sm:$0xff] }
0x1256   : >> { %v2757_v11 = vpop.f32.mrf.mxu1  ;;  %2934 = vmatpush.bf16.msra.mxu0 %v3624_v40 }
0x1257   : >> { %2770 = vrot.lane.b32.xlu2 %v2757_v11, %s5983_s7  ;;  %s2944_s7 = scalar_lea.vmem [#allocation34], %s4819_s2  ;;  %s1998_s2 = sadd.s32 1, %s4819_s2  }
0x1258   : >> { %p1995_p4 = scmp.ge.s32.totalorder %s1998_s2, 2  }
0x1259   : > { %s5986_s5 = sld [smem:[#allocation78_spill]] (%p1995_p4)  ;;  %s3589_s8 = sshll.u32 (%p1995_p4), %s5094_s15, 3 }
0x125a   : >> { %2935 = vmatpush.bf16.msra.mxu0 %v3623_v55  ;;  %s2992_s6 = sshll.u32 (%p1995_p4), %s5536_s3, 4  ;;  %s2980_s23 = scalar_lea.sflag (%p1995_p4), [#allocation4], %s5465_s0  ;;  %s2993_s6 = int_to_ptr.vmem [resolvable:$true] %s2992_s6 }
0x125e   : >> { %v2759_v12 = vpop.f32.mrf.mxu1  ;;  %2936 = vmatpush.bf16.msra.mxu0 %v3622_v56 }
0x125f   : >> { %v2700_v13 = vpop.f32.mrf.mxu2  ;;  %s2990_s12 = scalar_lea.hbm (%p1995_p4), %s5986_s5, %s3589_s8  ;;  %s4693_s16 = scalar_lea.hbm (%p1995_p4), %s5986_s5, 16 }
0x1267   : >> { %v2702_v14 = vpop.f32.mrf.mxu2 }
0x128e   : >> { %v2767_v17 = vpop.permute.xlu2 %2766 }
0x12a4   : >> { %v2763_v18 = vpop.permute.xlu2 %2762 }
0x12a5   : >> { %v2773_v20 = vsel %vm1550_vm1, %v2700_v13, %v2763_v18 }
0x12a6   : >> { %v2774_v22 = vsel %vm1780_vm3, %v2773_v20, %v2767_v17 }
0x12b1   : >> { %v2771_v21 = vpop.permute.xlu2 %2770 }
0x12b2   : >> { %v2775_v23 = vsel %vm1782_vm4, %v2774_v22, %v2771_v21 }
0x12b3   : >> { %v2776_v24 = vpack.c.bf16 %v2775_v23, %v2775_v23 }
0x12b5   : >> { %3558 = vmatmul.msk.bf16.vlgmr.msrb.gmra.mxu2 %vm1475_vm0, %v2776_v24  ;;  %v3959_v24 = vld [vmem:[%s2942_s24] ss:$0 sm:$0xff] }
0x1338   : >> { %v2804_v26 = vpop.f32.mrf.mxu2 }
0x1339   : >> { %v2805_v27 = vadd.f32 %v3954_v25, %v2804_v26  ;;  %v3960_v26 = vld [vmem:[%s2944_s7] ss:$0 sm:$0xff] }
0x133b   : >> { %v2812_v28 = vadd.f32 %v2805_v27, %v5740_v32  ;;  %v3619_v32 = vld [vmem:[%s2844_s22] sm:$0xff]  ;;  %s2994_s22 = sshll.u32 (%p1995_p4), %s2990_s12, 4  ;;  %s2995_s22 = int_to_ptr.hbm [resolvable:$true] %s2994_s22 }
0x133c   : >> { %2890 = vmatpush.bf16.msrb.mxu3 %v3619_v32  ;;  %s4687_s28 = sshra.s32 (%p1995_p4), %s2995_s22, 4  ;;  %s4688_s28 = int_to_ptr.hbm [resolvable:$true] %s4687_s28 }
0x133d   : >> { %v2813_v29 = vsel %vm1475_vm0, %v2812_v28, 0.0  ;;  %s4689_s2 = scalar_lea.hbm (%p1995_p4), %s4688_s28, 8  ;;  %p4694_p1 = scmp.lt.s32.totalorder (%p1995_p4), %s4688_s28, %s5986_s5 }
0x133e   : >> { %2814 = vadd.xlane.f32.xlu1 %v2813_v29  ;;  %p4690_p5 = scmp.ne.s32.totalorder (%p1995_p4), %s4688_s28, %s4689_s2  ;;  %p4695_p2 = scmp.lt.s32.totalorder (%p1995_p4), %s4693_s16, %s4689_s2 }
0x1340   : >> { %v2806_v19 = vpop.f32.mrf.mxu2  ;;  %p4691_p12 = pnand (%p1995_p4), %p4690_p5, %p5125_p11  ;;  %p4696_p6 = por (%p1995_p4), %p4695_p2, %p4694_p1 }
0x1342   : > { %p4692_p13 = pneg (%p1995_p4), %p4691_p12 }
0x1344   : > { %p4697_p3 = pnand (%p1995_p4), %p4696_p6, %p4692_p13 }
0x13b1   : >> { %v2815_v30 = vpop.xlane.xlu1 %2814 }
0x13b2   : >> { %v2816_v31 = vmul.f32 %v2815_v30, %v5608_v7 }
0x13b4   : >> { %v2817_v33 = vsub.f32 %v2812_v28, %v2816_v31 }
0x13b6   : >> { %v2818_v34 = vmul.f32 %v2817_v33, %v2817_v33 }
0x13b8   : >> { %v2819_v35 = vsel %vm1475_vm0, %v2818_v34, 0.0 }
0x13b9   : >> { %2820 = vadd.xlane.f32.xlu2 %v2819_v35 }
0x142c   : >> { %v2821_v38 = vpop.xlane.xlu2 %2820 }
0x142d   : >> { %v2822_v39 = vmul.f32 %v2821_v38, %v5608_v7 }
0x142f   : >> { %v2823_v41 = vadd.f32 1e-05, %v2822_v39 }
0x1431   : >> { %3995 = vrsqrt.f32 %v2823_v41  ;;  %vm2830_vm6 = vweird.f32 %v2823_v41 }
0x1437   : >> { %v3996_v42 = vpop.eup %3995 }
0x1438   : >> { %v2825_v43 = vmul.f32 %v3996_v42, %v2823_v41  ;;  %vm2831_vm5 = vweird.f32 %v3996_v42 }
0x1439   : >> { %vm2832_vm7 = vmor %vm2830_vm6, %vm2831_vm5 }
0x143a   : >> { %v2826_v44 = vmul.f32 %v3996_v42, %v2825_v43 }
0x143c   : >> { %v2827_v45 = vmul.f32 0.5, %v2826_v44 }
0x143e   : >> { %v2828_v46 = vsub.f32 1.5, %v2827_v45 }
0x1440   : >> { %v2829_v47 = vmul.f32 %v3996_v42, %v2828_v46 }
0x1442   : >> { %v2833_v49 = vsel %vm2832_vm7, %v3996_v42, %v2829_v47 }
0x1443   : >> { %v2834_v50 = vmul.f32 %v2833_v49, %v2817_v33 }
0x1445   : >> { %v2838_v52 = vmul.f32 %v3955_v48, %v2834_v50 }
0x1447   : >> { %v2842_v53 = vadd.f32 %v3956_v51, %v2838_v52 }
0x1449   : >> { %v2864_v54 = vpack.c.bf16 %v2842_v53, %v2842_v53 }
0x144b   : >> { %3570 = vmatmul.msk.bf16.vlgmr.msrb.gmra.mxu3 %vm1475_vm0, %v2864_v54 }
0x14ce   : >> { %v2892_v58 = vpop.f32.mrf.mxu3 }
0x14cf   : >> { %v2893_v59 = vadd.f32 %v3957_v57, %v2892_v58 }
0x14d1   : >> { %v2896_v60 = vmax.f32 %v2893_v59, 0.0 }
0x14d3   : >> { %v2897_v61 = vpack.c.bf16 %v2896_v60, %v2896_v60 }
0x14d5   : >> { %3587 = vmatmul.msk.bf16.vlgmr.msra.gmra.mxu0 %vm1940_vm9, %v2897_v61 }
0x14d6   : >> { %v2894_v62 = vpop.f32.mrf.mxu3 }
0x1552   : >> { %v2938_v3 = vpop.f32.mrf.mxu0 }
0x1553   : >> { %v2939_v1 = vadd.f32 %v3958_v63, %v2938_v3 }
0x1555   : >> { %v2946_v0 = vadd.f32 %v2939_v1, %v2842_v53 }
0x1557   : >> { %v2947_v8 = vsel %vm1475_vm0, %v2946_v0, 0.0 }
0x1558   : >> { %2948 = vadd.xlane.f32.xlu0 %v2947_v8 }
0x155a   : >> { %v2940_v9 = vpop.f32.mrf.mxu0 }
0x15cb   : >> { %v2949_v10 = vpop.xlane.xlu0 %2948 }
0x15cc   : >> { %v2950_v6 = vmul.f32 %v2949_v10, %v5608_v7 }
0x15ce   : >> { %v2951_v11 = vsub.f32 %v2946_v0, %v2950_v6 }
0x15d0   : >> { %v2952_v12 = vmul.f32 %v2951_v11, %v2951_v11 }
0x15d2   : >> { %v2953_v13 = vsel %vm1475_vm0, %v2952_v12, 0.0 }
0x15d3   : >> { %2954 = vadd.xlane.f32.xlu0 %v2953_v13 }
0x1646   : >> { %v2955_v14 = vpop.xlane.xlu0 %2954 }
0x1647   : >> { %v2956_v15 = vmul.f32 %v2955_v14, %v5608_v7 }
0x1649   : >> { %v2957_v16 = vadd.f32 1e-05, %v2956_v15 }
0x164b   : >> { %3997 = vrsqrt.f32 %v2957_v16  ;;  %vm2964_vm10 = vweird.f32 %v2957_v16 }
0x1651   : >> { %v3998_v17 = vpop.eup %3997 }
0x1652   : >> { %v2959_v18 = vmul.f32 %v3998_v17, %v2957_v16  ;;  %vm2965_vm8 = vweird.f32 %v3998_v17 }
0x1653   : >> { %vm2966_vm11 = vmor %vm2964_vm10, %vm2965_vm8 }
0x1654   : >> { %v2960_v20 = vmul.f32 %v3998_v17, %v2959_v18 }
0x1656   : >> { %v2961_v21 = vmul.f32 0.5, %v2960_v20 }
0x1658   : >> { %v2962_v22 = vsub.f32 1.5, %v2961_v21 }
0x165a   : >> { %v2963_v23 = vmul.f32 %v3998_v17, %v2962_v22 }
0x165c   : >> { %v2967_v25 = vsel %vm2966_vm11, %v3998_v17, %v2963_v23 }
0x165d   : >> { %v2968_v27 = vmul.f32 %v2967_v25, %v2951_v11 }
0x165f   : >> { %v2972_v28 = vmul.f32 %v3959_v24, %v2968_v27  ;;  %1997 = sbr.rel (!%p1995_p4) target bundleno = 2453 (0x995), region = 380 }
0x1661   : >> { %v2976_v29 = vadd.f32 %v3960_v26, %v2972_v28  }
0x1663   : >> { %v5985_v6 = vmov %v2976_v29  ;;  %2978 = vst.msk [vmem:[%s5536_s3] sm:$0xff] (%p1995_p4), %vm1475_vm0, %v2976_v29 }
0x1664   : > { %4700 = shalt.err (!%p4697_p3)
}
0x1665   : > { %3720 = dma.vmem_to_hbm [thread:$0]  (%p5125_p11), %s2993_s6, 128, %s2995_s22, %s2980_s23  }
0x1666 PF: > { %s5988_s15 = sld [smem:[#allocation79_spill]]  ;;  %p5991_p8 = scmp.ge.s32.totalorder %s4803_s11, 2 }
0x1667   : > { %s5989_s3 = sld [smem:[#allocation85_spill]] }
0x166c   : > { %s3006_s0 = sand.u32 1, %s5988_s15  }
0x166d   : > { %p5990_p7 = scmp.ne.s32.totalorder %s5989_s3, 0  ;;  %s3007_s24 = scalar_lea.sflag [#allocation4], %s3006_s0 }
0x166f   : > { %p3727_p9 = pnand %p5991_p8, %p5990_p7 }
0x1671   : > { %p3728_p10 = pneg %p3727_p9 }
0x1673   : > { %4786 = dma.done.wait (%p3728_p10), %s3007_s24, 128  }
0x1674   : > { %4788 = vsyncadd (%p3728_p10), %s3007_s24, 4294967168  ;;  %s5992_s11 = sld [smem:[#allocation81_spill]]  ;;  %s5995_s0 = smov %s4799_s10 }
0x1675   : > { %s5993_s7 = sld [smem:[#allocation80_spill]] }
0x1676   : > { %s5994_s8 = sld [smem:[#allocation82_spill]] }
0x167a   : > { %p92_p0 = scmp.ge.s32.totalorder %s5992_s11, 4  }
0x167c   : > { %s5996_s10 = smov %s5994_s8  ;;  %94 = sbr.rel (!%p92_p0) target bundleno = 78 (0x4e), region = 391 }
0x1681   :  { %3013 = vsyncpa [#allocation3], 1 }
0x1682   :  { %3015 = vsyncpa [#allocation3 + $0x1], 1 }
0x1683   :  { %3016 = vsyncpa [#allocation6], 1 }
0x1684   :  { %3017 = vsyncpa [#allocation9], 1 }
0x1685   :  { %3018 = vsyncpa [#allocation12], 1 }
0x1686   :  { %3019 = vsyncpa [#allocation15], 1 }
0x1687   :  { %3020 = vsyncpa [#allocation18], 1 }
0x1688   :  { %3021 = vsyncpa [#allocation21], 1 }
0x1689   :  { %3022 = vsyncpa [#allocation24], 1 }
0x168a   :  { %3023 = vsyncpa [#allocation27], 1 }
0x168b   :  { %3024 = vsyncpa [#allocation30], 1 }
0x168c   :  { %3025 = vsyncpa [#allocation33], 1 }
0x168d   :  { %3026 = vsyncpa [#allocation36], 1 }
0x168e   :  { %3027 = vsyncpa [#allocation39], 1 }
0x168f   :  { %3028 = vsyncpa [#allocation4], 1 }
0x1690   :  { %3030 = vsyncpa [#allocation4 + $0x1], 1 }

</bundles_post_ra>
